<compile_context>
chip_gen: v7x
topology: tpu7x:2x2x1
jax: 0.10.0
libtpu: 0.0.40
codegen_flags: <defaults>
</compile_context>

<pallas_src>
import random

import jax
import jax.numpy as jnp
from jax.experimental import pallas as pl
from jax.experimental.pallas import tpu as pltpu


# ---------------------------------------------------------------------------
# Model hyper-parameters (small, deterministic synthetic model)
# ---------------------------------------------------------------------------
SRC_VOCAB = 32      # encoder.input_dim
TRG_VOCAB = 32      # decoder.output_dim
EMB_DIM = 32
HID_DIM = 32        # encoder.hid_dim == decoder.hid_dim
SRC_LEN = 6
TRG_LEN = 8
BATCH = 2
TEACHER_FORCING_RATIO = 0.5
V_PAD = 128         # logits padded to a full 128-lane vreg for dense stores


# ---------------------------------------------------------------------------
# Fused Pallas kernel: encoder loop + decoder loop (attention -> LSTM cell ->
# output projection -> argmax -> teacher-forcing input select), fully unrolled.
# ---------------------------------------------------------------------------
def seq2seq_kernel(tf_ref,        # SMEM [T]            int32 teacher-forcing mask
                   src_emb_ref,   # VMEM [S, B, E]      f32  encoder input embeddings
                   trg_emb_ref,   # VMEM [T, B, E]      f32  target token embeddings
                   dec_emb_ref,   # VMEM [V_PAD, E]     bf16 decoder embedding table (padded)
                   w_enc_ref,     # VMEM [E+H, 4H]      bf16 merged encoder LSTM weight
                   b_enc_ref,     # VMEM [1, 4H]        f32
                   w_dlstm_ref,   # VMEM [E+2H, 4H]     bf16 merged decoder LSTM weight
                   b_dlstm_ref,   # VMEM [1, 4H]        f32
                   w_dout_ref,    # VMEM [2H+E, V_PAD]  bf16 merged output projection
                   b_dout_ref,    # VMEM [1, V_PAD]     f32  (-1e30 on padded lanes)
                   attn_mask_ref, # VMEM [B, S*B]       f32  0 on own batch, -1e30 elsewhere
                   out_ref,       # VMEM [T, B, V_PAD]  f32  logits slab
                   enc_scratch,   # VMEM [S*B, H]       f32  encoder states (scratch)
                   emb_scratch):  # VMEM [B, E]         f32  next-step input embedding
    S, B, _ = src_emb_ref.shape
    T = trg_emb_ref.shape[0]
    H = b_enc_ref.shape[1] // 4
    V_pad = out_ref.shape[2]

    def lstm_cell(x_cat, w_ref, b_ref, c_prev):
        # gates in PyTorch order (i, f, g, o); bf16 MXU matmul, f32 accumulate.
        gates = jnp.dot(x_cat.astype(jnp.bfloat16), w_ref[...],
                        preferred_element_type=jnp.float32) + b_ref[...]
        sig = jax.nn.sigmoid(gates)                  # one full-width EUP pass
        i_g = sig[:, 0 * H:1 * H]
        f_g = sig[:, 1 * H:2 * H]
        o_g = sig[:, 3 * H:4 * H]
        g_g = jnp.tanh(gates[:, 2 * H:3 * H])
        c_new = f_g * c_prev + i_g * g_g
        h_new = o_g * jnp.tanh(c_new)
        return h_new, c_new

    # --------------- encoder: unrolled over src time steps ---------------
    h = jnp.zeros((B, H), jnp.float32)
    c = jnp.zeros((B, H), jnp.float32)
    for t in range(S):
        h, c = lstm_cell(jnp.concatenate([src_emb_ref[t], h], axis=1),
                         w_enc_ref, b_enc_ref, c)
        # Row t*B + b of the encoder matrix holds (step t, batch b).
        enc_scratch[t * B:(t + 1) * B, :] = h

    enc_all = enc_scratch[...].astype(jnp.bfloat16)          # [S*B, H] bf16
    attn_mask = attn_mask_ref[...]                           # [B, S*B] f32

    # --------------- decoder: unrolled over trg time steps ---------------
    out_ref[0] = jnp.zeros((B, V_pad), jnp.float32)          # outputs[0] = 0
    pad_ids = jax.lax.broadcasted_iota(jnp.int32, (B, V_pad), 1)

    emb_scratch[...] = trg_emb_ref[0]                        # input = trg[0]
    for t in range(1, T):
        emb = emb_scratch[...]                               # [B, E] f32

        # Block-diagonal dot-product attention over encoder outputs (MXU).
        h_bf = h.astype(jnp.bfloat16)
        scores = jax.lax.dot_general(h_bf, enc_all, (((1,), (1,)), ((), ())),
                                     preferred_element_type=jnp.float32)  # [B, S*B]
        scores = scores + attn_mask
        scores = scores - jnp.max(scores, axis=1, keepdims=True)
        p = jnp.exp(scores)
        p = p * pl.reciprocal(jnp.sum(p, axis=1, keepdims=True), approx=True)
        context = jnp.dot(p.astype(jnp.bfloat16), enc_all,
                          preferred_element_type=jnp.float32)             # [B, H]

        # LSTM cell on [emb ; context] with previous hidden h (one merged GEMM).
        h, c = lstm_cell(jnp.concatenate([emb, context, h], axis=1),
                         w_dlstm_ref, b_dlstm_ref, c)

        # Output projection Linear([h_new ; context ; emb]) (merged, V padded;
        # padded lanes carry a -1e30 bias so they never win the argmax).
        o_cat = jnp.concatenate([h, context, emb], axis=1).astype(jnp.bfloat16)
        logits = jnp.dot(o_cat, w_dout_ref[...],
                         preferred_element_type=jnp.float32) + b_dout_ref[...]
        out_ref[t] = logits                                  # lane-dense store

        if t < T - 1:
            # Teacher forcing default: input_{t+1} = trg[t].
            emb_scratch[...] = trg_emb_ref[t]

            # Non-forced steps only: greedy top1 -> embedding (skipped at runtime
            # when the coin flip chose teacher forcing).
            @pl.when(tf_ref[t] == 0)
            def _():
                max_val = jnp.max(logits, axis=1, keepdims=True)
                top1 = jnp.min(jnp.where(logits == max_val, pad_ids, V_pad),
                               axis=1, keepdims=True)        # [B, 1] int32
                onehot = (pad_ids == top1).astype(jnp.bfloat16)   # [B, V_PAD]
                emb_scratch[...] = jnp.dot(onehot, dec_emb_ref[...],
                                           preferred_element_type=jnp.float32)


def _fused_seq2seq(tf_mask, src_emb, trg_emb, attn_mask, enc_params, dec_params):
    T, B, _ = trg_emb.shape
    S = src_emb.shape[0]
    vmem = pl.BlockSpec(memory_space=pltpu.MemorySpace.VMEM)
    smem = pl.BlockSpec(memory_space=pltpu.MemorySpace.SMEM)
    return pl.pallas_call(
        seq2seq_kernel,
        out_shape=jax.ShapeDtypeStruct((T, B, V_PAD), jnp.float32),
        in_specs=[smem] + [vmem] * 10,
        out_specs=vmem,
        scratch_shapes=[pltpu.VMEM((S * B, HID_DIM), jnp.float32),
                        pltpu.VMEM((B, EMB_DIM), jnp.float32)],
    )(tf_mask, src_emb, trg_emb, dec_params["emb_bf"],
      enc_params["w"], enc_params["b"],
      dec_params["w_lstm"], dec_params["b_lstm"],
      dec_params["w_out"], dec_params["b_out"], attn_mask)


# ---------------------------------------------------------------------------
# Parameter construction (deterministic); matmul weights stored in bf16,
# output projection padded to V_PAD lanes (bias padded with -1e30 so padded
# lanes can never win the in-kernel argmax).
# ---------------------------------------------------------------------------
def init_params(key):
    def nrm(k, shape, scale=0.1):
        return scale * jax.random.normal(k, shape, dtype=jnp.float32)

    ks = jax.random.split(key, 8)
    enc = {
        "emb": nrm(ks[0], (SRC_VOCAB, EMB_DIM)),                       # f32 gather table
        "w":   nrm(ks[1], (EMB_DIM + HID_DIM, 4 * HID_DIM)).astype(jnp.bfloat16),
        "b":   nrm(ks[2], (1, 4 * HID_DIM)),
    }
    dec_emb = nrm(ks[3], (TRG_VOCAB, EMB_DIM))
    w_out = nrm(ks[6], (2 * HID_DIM + EMB_DIM, TRG_VOCAB))
    b_out = nrm(ks[7], (1, TRG_VOCAB))
    dec = {
        "emb":    dec_emb,                                             # f32 gather table
        "emb_bf": jnp.pad(dec_emb,
                          ((0, V_PAD - TRG_VOCAB), (0, 0))).astype(jnp.bfloat16),
        "w_lstm": nrm(ks[4], (EMB_DIM + 2 * HID_DIM, 4 * HID_DIM)).astype(jnp.bfloat16),
        "b_lstm": nrm(ks[5], (1, 4 * HID_DIM)),
        "w_out":  jnp.pad(w_out, ((0, 0), (0, V_PAD - TRG_VOCAB))).astype(jnp.bfloat16),
        "b_out":  jnp.pad(b_out, ((0, 0), (0, V_PAD - TRG_VOCAB)),
                          constant_values=-1e30),
    }
    return enc, dec


# ---------------------------------------------------------------------------
# Jitted forward: embedding gathers for known tokens, block-diagonal attention
# mask (static), one fused kernel call, slice padded logits back to real vocab.
# ---------------------------------------------------------------------------
@jax.jit
def seq2seq_forward(src, trg, tf_mask, enc_params, dec_params):
    src_emb = jnp.take(enc_params["emb"], src, axis=0)      # [S, B, E]
    trg_emb = jnp.take(dec_params["emb"], trg, axis=0)      # [T, B, E]
    S, B = src.shape
    col = jnp.arange(S * B)
    row = jnp.arange(B)
    attn_mask = jnp.where((col[None, :] % B) == row[:, None],
                          0.0, -1e30).astype(jnp.float32)   # [B, S*B]
    out_pad = _fused_seq2seq(tf_mask, src_emb, trg_emb, attn_mask,
                             enc_params, dec_params)
    return out_pad[:, :, :TRG_VOCAB]                        # [T, B, V]


# ---------------------------------------------------------------------------
if __name__ == "__main__":
    random.seed(0)   # deterministic teacher-forcing decisions (host side)
    key = jax.random.PRNGKey(0)
    k_src, k_trg, k_params = jax.random.split(key, 3)

    src = jax.random.randint(k_src, (SRC_LEN, BATCH), 0, SRC_VOCAB, dtype=jnp.int32)
    trg = jax.random.randint(k_trg, (TRG_LEN, BATCH), 0, TRG_VOCAB, dtype=jnp.int32)
    enc_params, dec_params = init_params(k_params)

    # Host-side teacher-forcing coin flips (one per decoder step t=1..T-1),
    # mirroring `random.random() < teacher_forcing_ratio` in Seq2Seq.forward.
    tf_mask = jnp.array(
        [0] + [int(random.random() < TEACHER_FORCING_RATIO)
               for _ in range(1, TRG_LEN)], dtype=jnp.int32)

    outputs = seq2seq_forward(src, trg, tf_mask, enc_params, dec_params)
    outputs = jax.block_until_ready(outputs)

    assert outputs.shape == (TRG_LEN, BATCH, TRG_VOCAB)
    assert bool(jnp.all(jnp.isfinite(outputs)))
    assert bool(jnp.all(outputs[0] == 0.0))   # outputs[0] stays zero, as in reference
    print("KERNEL_OK")
</pallas_src>

<mosaic_0001>
module attributes {stable_mosaic.version = 11 : i64} {
  func.func @seq2seq_kernel(%arg0: memref<8xi32, #tpu.memory_space<smem>>, %arg1: memref<6x2x32xf32, #tpu.memory_space<vmem>>, %arg2: memref<8x2x32xf32, #tpu.memory_space<vmem>>, %arg3: memref<128x32xbf16, #tpu.memory_space<vmem>>, %arg4: memref<64x128xbf16, #tpu.memory_space<vmem>>, %arg5: memref<1x128xf32, #tpu.memory_space<vmem>>, %arg6: memref<96x128xbf16, #tpu.memory_space<vmem>>, %arg7: memref<1x128xf32, #tpu.memory_space<vmem>>, %arg8: memref<96x128xbf16, #tpu.memory_space<vmem>>, %arg9: memref<1x128xf32, #tpu.memory_space<vmem>>, %arg10: memref<2x12xf32, #tpu.memory_space<vmem>>, %arg11: memref<8x2x128xf32, #tpu.memory_space<vmem>>, %arg12: memref<12x32xf32, #tpu.memory_space<vmem>>, %arg13: memref<2x32xf32, #tpu.memory_space<vmem>>) attributes {dimension_semantics = [], scalar_prefetch = 0 : i64, scratch_operands = 2 : i64, tpu.core_type = #tpu.core_type<tc>} {
    %cst = arith.constant 0.000000e+00 : f32
    %0 = vector.broadcast %cst : f32 to vector<2x32xf32>
    %cst_0 = arith.constant 0.000000e+00 : f32
    %1 = vector.broadcast %cst_0 : f32 to vector<2x32xf32>
    %c0 = arith.constant 0 : index
    %c0_1 = arith.constant 0 : index
    %c0_2 = arith.constant 0 : index
    %2 = vector.load %arg1[%c0, %c0_1, %c0_2] : memref<6x2x32xf32, #tpu.memory_space<vmem>>, vector<1x2x32xf32>
    %3 = vector.shape_cast %2 : vector<1x2x32xf32> to vector<2x32xf32>
    %4 = tpu.concatenate %3, %0 in 1 : vector<2x32xf32>, vector<2x32xf32> -> vector<2x64xf32>
    %5 = arith.truncf %4 : vector<2x64xf32> to vector<2x64xbf16>
    %c0_3 = arith.constant 0 : index
    %c0_4 = arith.constant 0 : index
    %6 = vector.load %arg4[%c0_3, %c0_4] : memref<64x128xbf16, #tpu.memory_space<vmem>>, vector<64x128xbf16>
    %cst_5 = arith.constant dense<0.000000e+00> : vector<2x128xf32>
    %7 = tpu.matmul %5, %6, %cst_5 {dimension_numbers = #tpu.dot_dimension_numbers<[1], [0], [0], [1], [0, 0, 1, 1], [], []>} : vector<2x64xbf16>, vector<64x128xbf16>, vector<2x128xf32> -> vector<2x128xf32>
    %c0_6 = arith.constant 0 : index
    %c0_7 = arith.constant 0 : index
    %8 = vector.load %arg5[%c0_6, %c0_7] : memref<1x128xf32, #tpu.memory_space<vmem>>, vector<1x128xf32>
    %9 = vector.broadcast %8 : vector<1x128xf32> to vector<2x128xf32>
    %10 = arith.addf %7, %9 : vector<2x128xf32>
    %11 = arith.negf %10 : vector<2x128xf32>
    %12 = math.exp %11 : vector<2x128xf32>
    %cst_8 = arith.constant 1.000000e+00 : f32
    %13 = vector.broadcast %cst_8 : f32 to vector<2x128xf32>
    %14 = arith.addf %13, %12 : vector<2x128xf32>
    %15 = arith.divf %13, %14 : vector<2x128xf32>
    %16 = vector.extract_strided_slice %15 {offsets = [0, 0], sizes = [2, 32], strides = [1, 1]} : vector<2x128xf32> to vector<2x32xf32>
    %17 = vector.extract_strided_slice %15 {offsets = [0, 32], sizes = [2, 32], strides = [1, 1]} : vector<2x128xf32> to vector<2x32xf32>
    %18 = vector.extract_strided_slice %15 {offsets = [0, 96], sizes = [2, 32], strides = [1, 1]} : vector<2x128xf32> to vector<2x32xf32>
    %19 = vector.extract_strided_slice %10 {offsets = [0, 64], sizes = [2, 32], strides = [1, 1]} : vector<2x128xf32> to vector<2x32xf32>
    %20 = math.tanh %19 : vector<2x32xf32>
    %21 = arith.mulf %17, %1 : vector<2x32xf32>
    %22 = arith.mulf %16, %20 : vector<2x32xf32>
    %23 = arith.addf %21, %22 : vector<2x32xf32>
    %24 = math.tanh %23 : vector<2x32xf32>
    %25 = arith.mulf %18, %24 : vector<2x32xf32>
    %c0_9 = arith.constant 0 : index
    %c0_10 = arith.constant 0 : index
    %26 = vector.load %arg12[%c0_9, %c0_10] : memref<12x32xf32, #tpu.memory_space<vmem>>, vector<2x32xf32>
    tpu.vector_store %arg12[%c0_9, %c0_10], %25 {strides = array<i32>} : memref<12x32xf32, #tpu.memory_space<vmem>>, vector<2x32xf32>,
    %c1 = arith.constant 1 : index
    %c0_11 = arith.constant 0 : index
    %c0_12 = arith.constant 0 : index
    %27 = vector.load %arg1[%c1, %c0_11, %c0_12] : memref<6x2x32xf32, #tpu.memory_space<vmem>>, vector<1x2x32xf32>
    %28 = vector.shape_cast %27 : vector<1x2x32xf32> to vector<2x32xf32>
    %29 = tpu.concatenate %28, %25 in 1 : vector<2x32xf32>, vector<2x32xf32> -> vector<2x64xf32>
    %30 = arith.truncf %29 : vector<2x64xf32> to vector<2x64xbf16>
    %c0_13 = arith.constant 0 : index
    %c0_14 = arith.constant 0 : index
    %31 = vector.load %arg4[%c0_13, %c0_14] : memref<64x128xbf16, #tpu.memory_space<vmem>>, vector<64x128xbf16>
    %cst_15 = arith.constant dense<0.000000e+00> : vector<2x128xf32>
    %32 = tpu.matmul %30, %31, %cst_15 {dimension_numbers = #tpu.dot_dimension_numbers<[1], [0], [0], [1], [0, 0, 1, 1], [], []>} : vector<2x64xbf16>, vector<64x128xbf16>, vector<2x128xf32> -> vector<2x128xf32>
    %c0_16 = arith.constant 0 : index
    %c0_17 = arith.constant 0 : index
    %33 = vector.load %arg5[%c0_16, %c0_17] : memref<1x128xf32, #tpu.memory_space<vmem>>, vector<1x128xf32>
    %34 = vector.broadcast %33 : vector<1x128xf32> to vector<2x128xf32>
    %35 = arith.addf %32, %34 : vector<2x128xf32>
    %36 = arith.negf %35 : vector<2x128xf32>
    %37 = math.exp %36 : vector<2x128xf32>
    %cst_18 = arith.constant 1.000000e+00 : f32
    %38 = vector.broadcast %cst_18 : f32 to vector<2x128xf32>
    %39 = arith.addf %38, %37 : vector<2x128xf32>
    %40 = arith.divf %38, %39 : vector<2x128xf32>
    %41 = vector.extract_strided_slice %40 {offsets = [0, 0], sizes = [2, 32], strides = [1, 1]} : vector<2x128xf32> to vector<2x32xf32>
    %42 = vector.extract_strided_slice %40 {offsets = [0, 32], sizes = [2, 32], strides = [1, 1]} : vector<2x128xf32> to vector<2x32xf32>
    %43 = vector.extract_strided_slice %40 {offsets = [0, 96], sizes = [2, 32], strides = [1, 1]} : vector<2x128xf32> to vector<2x32xf32>
    %44 = vector.extract_strided_slice %35 {offsets = [0, 64], sizes = [2, 32], strides = [1, 1]} : vector<2x128xf32> to vector<2x32xf32>
    %45 = math.tanh %44 : vector<2x32xf32>
    %46 = arith.mulf %42, %23 : vector<2x32xf32>
    %47 = arith.mulf %41, %45 : vector<2x32xf32>
    %48 = arith.addf %46, %47 : vector<2x32xf32>
    %49 = math.tanh %48 : vector<2x32xf32>
    %50 = arith.mulf %43, %49 : vector<2x32xf32>
    %c2 = arith.constant 2 : index
    %c0_19 = arith.constant 0 : index
    %51 = vector.load %arg12[%c2, %c0_19] : memref<12x32xf32, #tpu.memory_space<vmem>>, vector<2x32xf32>
    tpu.vector_store %arg12[%c2, %c0_19], %50 {strides = array<i32>} : memref<12x32xf32, #tpu.memory_space<vmem>>, vector<2x32xf32>,
    %c2_20 = arith.constant 2 : index
    %c0_21 = arith.constant 0 : index
    %c0_22 = arith.constant 0 : index
    %52 = vector.load %arg1[%c2_20, %c0_21, %c0_22] : memref<6x2x32xf32, #tpu.memory_space<vmem>>, vector<1x2x32xf32>
    %53 = vector.shape_cast %52 : vector<1x2x32xf32> to vector<2x32xf32>
    %54 = tpu.concatenate %53, %50 in 1 : vector<2x32xf32>, vector<2x32xf32> -> vector<2x64xf32>
    %55 = arith.truncf %54 : vector<2x64xf32> to vector<2x64xbf16>
    %c0_23 = arith.constant 0 : index
    %c0_24 = arith.constant 0 : index
    %56 = vector.load %arg4[%c0_23, %c0_24] : memref<64x128xbf16, #tpu.memory_space<vmem>>, vector<64x128xbf16>
    %cst_25 = arith.constant dense<0.000000e+00> : vector<2x128xf32>
    %57 = tpu.matmul %55, %56, %cst_25 {dimension_numbers = #tpu.dot_dimension_numbers<[1], [0], [0], [1], [0, 0, 1, 1], [], []>} : vector<2x64xbf16>, vector<64x128xbf16>, vector<2x128xf32> -> vector<2x128xf32>
    %c0_26 = arith.constant 0 : index
    %c0_27 = arith.constant 0 : index
    %58 = vector.load %arg5[%c0_26, %c0_27] : memref<1x128xf32, #tpu.memory_space<vmem>>, vector<1x128xf32>
    %59 = vector.broadcast %58 : vector<1x128xf32> to vector<2x128xf32>
    %60 = arith.addf %57, %59 : vector<2x128xf32>
    %61 = arith.negf %60 : vector<2x128xf32>
    %62 = math.exp %61 : vector<2x128xf32>
    %cst_28 = arith.constant 1.000000e+00 : f32
    %63 = vector.broadcast %cst_28 : f32 to vector<2x128xf32>
    %64 = arith.addf %63, %62 : vector<2x128xf32>
    %65 = arith.divf %63, %64 : vector<2x128xf32>
    %66 = vector.extract_strided_slice %65 {offsets = [0, 0], sizes = [2, 32], strides = [1, 1]} : vector<2x128xf32> to vector<2x32xf32>
    %67 = vector.extract_strided_slice %65 {offsets = [0, 32], sizes = [2, 32], strides = [1, 1]} : vector<2x128xf32> to vector<2x32xf32>
    %68 = vector.extract_strided_slice %65 {offsets = [0, 96], sizes = [2, 32], strides = [1, 1]} : vector<2x128xf32> to vector<2x32xf32>
    %69 = vector.extract_strided_slice %60 {offsets = [0, 64], sizes = [2, 32], strides = [1, 1]} : vector<2x128xf32> to vector<2x32xf32>
    %70 = math.tanh %69 : vector<2x32xf32>
    %71 = arith.mulf %67, %48 : vector<2x32xf32>
    %72 = arith.mulf %66, %70 : vector<2x32xf32>
    %73 = arith.addf %71, %72 : vector<2x32xf32>
    %74 = math.tanh %73 : vector<2x32xf32>
    %75 = arith.mulf %68, %74 : vector<2x32xf32>
    %c4 = arith.constant 4 : index
    %c0_29 = arith.constant 0 : index
    %76 = vector.load %arg12[%c4, %c0_29] : memref<12x32xf32, #tpu.memory_space<vmem>>, vector<2x32xf32>
    tpu.vector_store %arg12[%c4, %c0_29], %75 {strides = array<i32>} : memref<12x32xf32, #tpu.memory_space<vmem>>, vector<2x32xf32>,
    %c3 = arith.constant 3 : index
    %c0_30 = arith.constant 0 : index
    %c0_31 = arith.constant 0 : index
    %77 = vector.load %arg1[%c3, %c0_30, %c0_31] : memref<6x2x32xf32, #tpu.memory_space<vmem>>, vector<1x2x32xf32>
    %78 = vector.shape_cast %77 : vector<1x2x32xf32> to vector<2x32xf32>
    %79 = tpu.concatenate %78, %75 in 1 : vector<2x32xf32>, vector<2x32xf32> -> vector<2x64xf32>
    %80 = arith.truncf %79 : vector<2x64xf32> to vector<2x64xbf16>
    %c0_32 = arith.constant 0 : index
    %c0_33 = arith.constant 0 : index
    %81 = vector.load %arg4[%c0_32, %c0_33] : memref<64x128xbf16, #tpu.memory_space<vmem>>, vector<64x128xbf16>
    %cst_34 = arith.constant dense<0.000000e+00> : vector<2x128xf32>
    %82 = tpu.matmul %80, %81, %cst_34 {dimension_numbers = #tpu.dot_dimension_numbers<[1], [0], [0], [1], [0, 0, 1, 1], [], []>} : vector<2x64xbf16>, vector<64x128xbf16>, vector<2x128xf32> -> vector<2x128xf32>
    %c0_35 = arith.constant 0 : index
    %c0_36 = arith.constant 0 : index
    %83 = vector.load %arg5[%c0_35, %c0_36] : memref<1x128xf32, #tpu.memory_space<vmem>>, vector<1x128xf32>
    %84 = vector.broadcast %83 : vector<1x128xf32> to vector<2x128xf32>
    %85 = arith.addf %82, %84 : vector<2x128xf32>
    %86 = arith.negf %85 : vector<2x128xf32>
    %87 = math.exp %86 : vector<2x128xf32>
    %cst_37 = arith.constant 1.000000e+00 : f32
    %88 = vector.broadcast %cst_37 : f32 to vector<2x128xf32>
    %89 = arith.addf %88, %87 : vector<2x128xf32>
    %90 = arith.divf %88, %89 : vector<2x128xf32>
    %91 = vector.extract_strided_slice %90 {offsets = [0, 0], sizes = [2, 32], strides = [1, 1]} : vector<2x128xf32> to vector<2x32xf32>
    %92 = vector.extract_strided_slice %90 {offsets = [0, 32], sizes = [2, 32], strides = [1, 1]} : vector<2x128xf32> to vector<2x32xf32>
    %93 = vector.extract_strided_slice %90 {offsets = [0, 96], sizes = [2, 32], strides = [1, 1]} : vector<2x128xf32> to vector<2x32xf32>
    %94 = vector.extract_strided_slice %85 {offsets = [0, 64], sizes = [2, 32], strides = [1, 1]} : vector<2x128xf32> to vector<2x32xf32>
    %95 = math.tanh %94 : vector<2x32xf32>
    %96 = arith.mulf %92, %73 : vector<2x32xf32>
    %97 = arith.mulf %91, %95 : vector<2x32xf32>
    %98 = arith.addf %96, %97 : vector<2x32xf32>
    %99 = math.tanh %98 : vector<2x32xf32>
    %100 = arith.mulf %93, %99 : vector<2x32xf32>
    %c6 = arith.constant 6 : index
    %c0_38 = arith.constant 0 : index
    %101 = vector.load %arg12[%c6, %c0_38] : memref<12x32xf32, #tpu.memory_space<vmem>>, vector<2x32xf32>
    tpu.vector_store %arg12[%c6, %c0_38], %100 {strides = array<i32>} : memref<12x32xf32, #tpu.memory_space<vmem>>, vector<2x32xf32>,
    %c4_39 = arith.constant 4 : index
    %c0_40 = arith.constant 0 : index
    %c0_41 = arith.constant 0 : index
    %102 = vector.load %arg1[%c4_39, %c0_40, %c0_41] : memref<6x2x32xf32, #tpu.memory_space<vmem>>, vector<1x2x32xf32>
    %103 = vector.shape_cast %102 : vector<1x2x32xf32> to vector<2x32xf32>
    %104 = tpu.concatenate %103, %100 in 1 : vector<2x32xf32>, vector<2x32xf32> -> vector<2x64xf32>
    %105 = arith.truncf %104 : vector<2x64xf32> to vector<2x64xbf16>
    %c0_42 = arith.constant 0 : index
    %c0_43 = arith.constant 0 : index
    %106 = vector.load %arg4[%c0_42, %c0_43] : memref<64x128xbf16, #tpu.memory_space<vmem>>, vector<64x128xbf16>
    %cst_44 = arith.constant dense<0.000000e+00> : vector<2x128xf32>
    %107 = tpu.matmul %105, %106, %cst_44 {dimension_numbers = #tpu.dot_dimension_numbers<[1], [0], [0], [1], [0, 0, 1, 1], [], []>} : vector<2x64xbf16>, vector<64x128xbf16>, vector<2x128xf32> -> vector<2x128xf32>
    %c0_45 = arith.constant 0 : index
    %c0_46 = arith.constant 0 : index
    %108 = vector.load %arg5[%c0_45, %c0_46] : memref<1x128xf32, #tpu.memory_space<vmem>>, vector<1x128xf32>
    %109 = vector.broadcast %108 : vector<1x128xf32> to vector<2x128xf32>
    %110 = arith.addf %107, %109 : vector<2x128xf32>
    %111 = arith.negf %110 : vector<2x128xf32>
    %112 = math.exp %111 : vector<2x128xf32>
    %cst_47 = arith.constant 1.000000e+00 : f32
    %113 = vector.broadcast %cst_47 : f32 to vector<2x128xf32>
    %114 = arith.addf %113, %112 : vector<2x128xf32>
    %115 = arith.divf %113, %114 : vector<2x128xf32>
    %116 = vector.extract_strided_slice %115 {offsets = [0, 0], sizes = [2, 32], strides = [1, 1]} : vector<2x128xf32> to vector<2x32xf32>
    %117 = vector.extract_strided_slice %115 {offsets = [0, 32], sizes = [2, 32], strides = [1, 1]} : vector<2x128xf32> to vector<2x32xf32>
    %118 = vector.extract_strided_slice %115 {offsets = [0, 96], sizes = [2, 32], strides = [1, 1]} : vector<2x128xf32> to vector<2x32xf32>
    %119 = vector.extract_strided_slice %110 {offsets = [0, 64], sizes = [2, 32], strides = [1, 1]} : vector<2x128xf32> to vector<2x32xf32>
    %120 = math.tanh %119 : vector<2x32xf32>
    %121 = arith.mulf %117, %98 : vector<2x32xf32>
    %122 = arith.mulf %116, %120 : vector<2x32xf32>
    %123 = arith.addf %121, %122 : vector<2x32xf32>
    %124 = math.tanh %123 : vector<2x32xf32>
    %125 = arith.mulf %118, %124 : vector<2x32xf32>
    %c8 = arith.constant 8 : index
    %c0_48 = arith.constant 0 : index
    %126 = vector.load %arg12[%c8, %c0_48] : memref<12x32xf32, #tpu.memory_space<vmem>>, vector<2x32xf32>
    tpu.vector_store %arg12[%c8, %c0_48], %125 {strides = array<i32>} : memref<12x32xf32, #tpu.memory_space<vmem>>, vector<2x32xf32>,
    %c5 = arith.constant 5 : index
    %c0_49 = arith.constant 0 : index
    %c0_50 = arith.constant 0 : index
    %127 = vector.load %arg1[%c5, %c0_49, %c0_50] : memref<6x2x32xf32, #tpu.memory_space<vmem>>, vector<1x2x32xf32>
    %128 = vector.shape_cast %127 : vector<1x2x32xf32> to vector<2x32xf32>
    %129 = tpu.concatenate %128, %125 in 1 : vector<2x32xf32>, vector<2x32xf32> -> vector<2x64xf32>
    %130 = arith.truncf %129 : vector<2x64xf32> to vector<2x64xbf16>
    %c0_51 = arith.constant 0 : index
    %c0_52 = arith.constant 0 : index
    %131 = vector.load %arg4[%c0_51, %c0_52] : memref<64x128xbf16, #tpu.memory_space<vmem>>, vector<64x128xbf16>
    %cst_53 = arith.constant dense<0.000000e+00> : vector<2x128xf32>
    %132 = tpu.matmul %130, %131, %cst_53 {dimension_numbers = #tpu.dot_dimension_numbers<[1], [0], [0], [1], [0, 0, 1, 1], [], []>} : vector<2x64xbf16>, vector<64x128xbf16>, vector<2x128xf32> -> vector<2x128xf32>
    %c0_54 = arith.constant 0 : index
    %c0_55 = arith.constant 0 : index
    %133 = vector.load %arg5[%c0_54, %c0_55] : memref<1x128xf32, #tpu.memory_space<vmem>>, vector<1x128xf32>
    %134 = vector.broadcast %133 : vector<1x128xf32> to vector<2x128xf32>
    %135 = arith.addf %132, %134 : vector<2x128xf32>
    %136 = arith.negf %135 : vector<2x128xf32>
    %137 = math.exp %136 : vector<2x128xf32>
    %cst_56 = arith.constant 1.000000e+00 : f32
    %138 = vector.broadcast %cst_56 : f32 to vector<2x128xf32>
    %139 = arith.addf %138, %137 : vector<2x128xf32>
    %140 = arith.divf %138, %139 : vector<2x128xf32>
    %141 = vector.extract_strided_slice %140 {offsets = [0, 0], sizes = [2, 32], strides = [1, 1]} : vector<2x128xf32> to vector<2x32xf32>
    %142 = vector.extract_strided_slice %140 {offsets = [0, 32], sizes = [2, 32], strides = [1, 1]} : vector<2x128xf32> to vector<2x32xf32>
    %143 = vector.extract_strided_slice %140 {offsets = [0, 96], sizes = [2, 32], strides = [1, 1]} : vector<2x128xf32> to vector<2x32xf32>
    %144 = vector.extract_strided_slice %135 {offsets = [0, 64], sizes = [2, 32], strides = [1, 1]} : vector<2x128xf32> to vector<2x32xf32>
    %145 = math.tanh %144 : vector<2x32xf32>
    %146 = arith.mulf %142, %123 : vector<2x32xf32>
    %147 = arith.mulf %141, %145 : vector<2x32xf32>
    %148 = arith.addf %146, %147 : vector<2x32xf32>
    %149 = math.tanh %148 : vector<2x32xf32>
    %150 = arith.mulf %143, %149 : vector<2x32xf32>
    %c10 = arith.constant 10 : index
    %c0_57 = arith.constant 0 : index
    %151 = vector.load %arg12[%c10, %c0_57] : memref<12x32xf32, #tpu.memory_space<vmem>>, vector<2x32xf32>
    tpu.vector_store %arg12[%c10, %c0_57], %150 {strides = array<i32>} : memref<12x32xf32, #tpu.memory_space<vmem>>, vector<2x32xf32>,
    %c0_58 = arith.constant 0 : index
    %c0_59 = arith.constant 0 : index
    %152 = vector.load %arg12[%c0_58, %c0_59] : memref<12x32xf32, #tpu.memory_space<vmem>>, vector<12x32xf32>
    %153 = arith.truncf %152 : vector<12x32xf32> to vector<12x32xbf16>
    %c0_60 = arith.constant 0 : index
    %c0_61 = arith.constant 0 : index
    %154 = vector.load %arg10[%c0_60, %c0_61] : memref<2x12xf32, #tpu.memory_space<vmem>>, vector<2x12xf32>
    %cst_62 = arith.constant 0.000000e+00 : f32
    %155 = vector.broadcast %cst_62 : f32 to vector<2x128xf32>
    %c0_63 = arith.constant 0 : index
    %c0_64 = arith.constant 0 : index
    %c0_65 = arith.constant 0 : index
    %156 = vector.load %arg11[%c0_63, %c0_64, %c0_65] : memref<8x2x128xf32, #tpu.memory_space<vmem>>, vector<1x2x128xf32>
    %157 = vector.shape_cast %156 : vector<1x2x128xf32> to vector<2x128xf32>
    %158 = vector.shape_cast %155 : vector<2x128xf32> to vector<1x2x128xf32>
    tpu.vector_store %arg11[%c0_63, %c0_64, %c0_65], %158 {strides = array<i32>} : memref<8x2x128xf32, #tpu.memory_space<vmem>>, vector<1x2x128xf32>,
    %159 = tpu.iota {dimensions = array<i32: 1>} : vector<2x128xi32>
    %c0_66 = arith.constant 0 : index
    %c0_67 = arith.constant 0 : index
    %c0_68 = arith.constant 0 : index
    %160 = vector.load %arg2[%c0_66, %c0_67, %c0_68] : memref<8x2x32xf32, #tpu.memory_space<vmem>>, vector<1x2x32xf32>
    %161 = vector.shape_cast %160 : vector<1x2x32xf32> to vector<2x32xf32>
    %c0_69 = arith.constant 0 : index
    %c0_70 = arith.constant 0 : index
    %162 = vector.load %arg13[%c0_69, %c0_70] : memref<2x32xf32, #tpu.memory_space<vmem>>, vector<2x32xf32>
    tpu.vector_store %arg13[%c0_69, %c0_70], %161 {strides = array<i32>} : memref<2x32xf32, #tpu.memory_space<vmem>>, vector<2x32xf32>,
    %c0_71 = arith.constant 0 : index
    %c0_72 = arith.constant 0 : index
    %163 = vector.load %arg13[%c0_71, %c0_72] : memref<2x32xf32, #tpu.memory_space<vmem>>, vector<2x32xf32>
    %164 = arith.truncf %150 : vector<2x32xf32> to vector<2x32xbf16>
    %cst_73 = arith.constant dense<0.000000e+00> : vector<2x12xf32>
    %165 = tpu.matmul %164, %153, %cst_73 {dimension_numbers = #tpu.dot_dimension_numbers<[1], [1], [0], [0], [0, 0, 1, 0], [], []>} : vector<2x32xbf16>, vector<12x32xbf16>, vector<2x12xf32> -> vector<2x12xf32>
    %166 = arith.addf %165, %154 : vector<2x12xf32>
    %cst_74 = arith.constant dense<0xFF800000> : vector<2xf32>
    %167 = vector.multi_reduction <maximumf>, %166, %cst_74 [1] : vector<2x12xf32> to vector<2xf32>
    %168 = vector.shape_cast %167 : vector<2xf32> to vector<2x1xf32>
    %169 = vector.broadcast %168 : vector<2x1xf32> to vector<2x12xf32>
    %170 = arith.subf %166, %169 : vector<2x12xf32>
    %171 = math.exp %170 : vector<2x12xf32>
    %cst_75 = arith.constant dense<0.000000e+00> : vector<2xf32>
    %172 = vector.multi_reduction <add>, %171, %cst_75 [1] : vector<2x12xf32> to vector<2xf32>
    %173 = vector.shape_cast %172 : vector<2xf32> to vector<2x1xf32>
    %174 = tpu.reciprocal %173 {approx = true} : vector<2x1xf32> -> vector<2x1xf32>
    %175 = vector.broadcast %174 : vector<2x1xf32> to vector<2x12xf32>
    %176 = arith.mulf %171, %175 : vector<2x12xf32>
    %177 = arith.truncf %176 : vector<2x12xf32> to vector<2x12xbf16>
    %cst_76 = arith.constant dense<0.000000e+00> : vector<2x32xf32>
    %178 = tpu.matmul %177, %153, %cst_76 {dimension_numbers = #tpu.dot_dimension_numbers<[1], [0], [0], [1], [0, 0, 1, 1], [], []>} : vector<2x12xbf16>, vector<12x32xbf16>, vector<2x32xf32> -> vector<2x32xf32>
    %179 = tpu.concatenate %163, %178, %150 in 1 : vector<2x32xf32>, vector<2x32xf32>, vector<2x32xf32> -> vector<2x96xf32>
    %180 = arith.truncf %179 : vector<2x96xf32> to vector<2x96xbf16>
    %c0_77 = arith.constant 0 : index
    %c0_78 = arith.constant 0 : index
    %181 = vector.load %arg6[%c0_77, %c0_78] : memref<96x128xbf16, #tpu.memory_space<vmem>>, vector<96x128xbf16>
    %cst_79 = arith.constant dense<0.000000e+00> : vector<2x128xf32>
    %182 = tpu.matmul %180, %181, %cst_79 {dimension_numbers = #tpu.dot_dimension_numbers<[1], [0], [0], [1], [0, 0, 1, 1], [], []>} : vector<2x96xbf16>, vector<96x128xbf16>, vector<2x128xf32> -> vector<2x128xf32>
    %c0_80 = arith.constant 0 : index
    %c0_81 = arith.constant 0 : index
    %183 = vector.load %arg7[%c0_80, %c0_81] : memref<1x128xf32, #tpu.memory_space<vmem>>, vector<1x128xf32>
    %184 = vector.broadcast %183 : vector<1x128xf32> to vector<2x128xf32>
    %185 = arith.addf %182, %184 : vector<2x128xf32>
    %186 = arith.negf %185 : vector<2x128xf32>
    %187 = math.exp %186 : vector<2x128xf32>
    %cst_82 = arith.constant 1.000000e+00 : f32
    %188 = vector.broadcast %cst_82 : f32 to vector<2x128xf32>
    %189 = arith.addf %188, %187 : vector<2x128xf32>
    %190 = arith.divf %188, %189 : vector<2x128xf32>
    %191 = vector.extract_strided_slice %190 {offsets = [0, 0], sizes = [2, 32], strides = [1, 1]} : vector<2x128xf32> to vector<2x32xf32>
    %192 = vector.extract_strided_slice %190 {offsets = [0, 32], sizes = [2, 32], strides = [1, 1]} : vector<2x128xf32> to vector<2x32xf32>
    %193 = vector.extract_strided_slice %190 {offsets = [0, 96], sizes = [2, 32], strides = [1, 1]} : vector<2x128xf32> to vector<2x32xf32>
    %194 = vector.extract_strided_slice %185 {offsets = [0, 64], sizes = [2, 32], strides = [1, 1]} : vector<2x128xf32> to vector<2x32xf32>
    %195 = math.tanh %194 : vector<2x32xf32>
    %196 = arith.mulf %192, %148 : vector<2x32xf32>
    %197 = arith.mulf %191, %195 : vector<2x32xf32>
    %198 = arith.addf %196, %197 : vector<2x32xf32>
    %199 = math.tanh %198 : vector<2x32xf32>
    %200 = arith.mulf %193, %199 : vector<2x32xf32>
    %201 = tpu.concatenate %200, %178, %163 in 1 : vector<2x32xf32>, vector<2x32xf32>, vector<2x32xf32> -> vector<2x96xf32>
    %202 = arith.truncf %201 : vector<2x96xf32> to vector<2x96xbf16>
    %c0_83 = arith.constant 0 : index
    %c0_84 = arith.constant 0 : index
    %203 = vector.load %arg8[%c0_83, %c0_84] : memref<96x128xbf16, #tpu.memory_space<vmem>>, vector<96x128xbf16>
    %cst_85 = arith.constant dense<0.000000e+00> : vector<2x128xf32>
    %204 = tpu.matmul %202, %203, %cst_85 {dimension_numbers = #tpu.dot_dimension_numbers<[1], [0], [0], [1], [0, 0, 1, 1], [], []>} : vector<2x96xbf16>, vector<96x128xbf16>, vector<2x128xf32> -> vector<2x128xf32>
    %c0_86 = arith.constant 0 : index
    %c0_87 = arith.constant 0 : index
    %205 = vector.load %arg9[%c0_86, %c0_87] : memref<1x128xf32, #tpu.memory_space<vmem>>, vector<1x128xf32>
    %206 = vector.broadcast %205 : vector<1x128xf32> to vector<2x128xf32>
    %207 = arith.addf %204, %206 : vector<2x128xf32>
    %c1_88 = arith.constant 1 : index
    %c0_89 = arith.constant 0 : index
    %c0_90 = arith.constant 0 : index
    %208 = vector.load %arg11[%c1_88, %c0_89, %c0_90] : memref<8x2x128xf32, #tpu.memory_space<vmem>>, vector<1x2x128xf32>
    %209 = vector.shape_cast %208 : vector<1x2x128xf32> to vector<2x128xf32>
    %210 = vector.shape_cast %207 : vector<2x128xf32> to vector<1x2x128xf32>
    tpu.vector_store %arg11[%c1_88, %c0_89, %c0_90], %210 {strides = array<i32>} : memref<8x2x128xf32, #tpu.memory_space<vmem>>, vector<1x2x128xf32>,
    %c1_91 = arith.constant 1 : index
    %c0_92 = arith.constant 0 : index
    %c0_93 = arith.constant 0 : index
    %211 = vector.load %arg2[%c1_91, %c0_92, %c0_93] : memref<8x2x32xf32, #tpu.memory_space<vmem>>, vector<1x2x32xf32>
    %212 = vector.shape_cast %211 : vector<1x2x32xf32> to vector<2x32xf32>
    %c0_94 = arith.constant 0 : index
    %c0_95 = arith.constant 0 : index
    %213 = vector.load %arg13[%c0_94, %c0_95] : memref<2x32xf32, #tpu.memory_space<vmem>>, vector<2x32xf32>
    tpu.vector_store %arg13[%c0_94, %c0_95], %212 {strides = array<i32>} : memref<2x32xf32, #tpu.memory_space<vmem>>, vector<2x32xf32>,
    %c1_96 = arith.constant 1 : index
    %214 = memref.load %arg0[%c1_96] : memref<8xi32, #tpu.memory_space<smem>>
    %c0_i32 = arith.constant 0 : i32
    %215 = arith.cmpi eq, %214, %c0_i32 : i32
    %216 = arith.extui %215 : i1 to i32
    %c0_i32_97 = arith.constant 0 : i32
    %217 = arith.cmpi ne, %216, %c0_i32_97 : i32
    scf.if %217 {
      %cst_257 = arith.constant dense<0xFF800000> : vector<2xf32>
      %541 = vector.multi_reduction <maximumf>, %207, %cst_257 [1] : vector<2x128xf32> to vector<2xf32>
      %542 = vector.shape_cast %541 : vector<2xf32> to vector<2x1xf32>
      %543 = vector.broadcast %542 : vector<2x1xf32> to vector<2x128xf32>
      %544 = arith.cmpf oeq, %207, %543 : vector<2x128xf32>
      %c128_i32 = arith.constant 128 : i32
      %545 = vector.broadcast %c128_i32 : i32 to vector<2x128xi32>
      %546 = arith.select %544, %159, %545 : vector<2x128xi1>, vector<2x128xi32>
      %cst_258 = arith.constant dense<2147483647> : vector<2xi32>
      %547 = vector.multi_reduction <minsi>, %546, %cst_258 [1] : vector<2x128xi32> to vector<2xi32>
      %548 = vector.shape_cast %547 : vector<2xi32> to vector<2x1xi32>
      %549 = vector.broadcast %548 : vector<2x1xi32> to vector<2x128xi32>
      %550 = arith.cmpi eq, %159, %549 : vector<2x128xi32>
      %551 = arith.extui %550 : vector<2x128xi1> to vector<2x128xi32>
      %552 = arith.sitofp %551 : vector<2x128xi32> to vector<2x128xf32>
      %553 = arith.truncf %552 : vector<2x128xf32> to vector<2x128xbf16>
      %c0_259 = arith.constant 0 : index
      %c0_260 = arith.constant 0 : index
      %554 = vector.load %arg3[%c0_259, %c0_260] : memref<128x32xbf16, #tpu.memory_space<vmem>>, vector<128x32xbf16>
      %cst_261 = arith.constant dense<0.000000e+00> : vector<2x32xf32>
      %555 = tpu.matmul %553, %554, %cst_261 {dimension_numbers = #tpu.dot_dimension_numbers<[1], [0], [0], [1], [0, 0, 1, 1], [], []>} : vector<2x128xbf16>, vector<128x32xbf16>, vector<2x32xf32> -> vector<2x32xf32>
      %c0_262 = arith.constant 0 : index
      %c0_263 = arith.constant 0 : index
      %556 = vector.load %arg13[%c0_262, %c0_263] : memref<2x32xf32, #tpu.memory_space<vmem>>, vector<2x32xf32>
      tpu.vector_store %arg13[%c0_262, %c0_263], %555 {strides = array<i32>} : memref<2x32xf32, #tpu.memory_space<vmem>>, vector<2x32xf32>,
    } else {
    }
    %c0_98 = arith.constant 0 : index
    %c0_99 = arith.constant 0 : index
    %218 = vector.load %arg13[%c0_98, %c0_99] : memref<2x32xf32, #tpu.memory_space<vmem>>, vector<2x32xf32>
    %219 = arith.truncf %200 : vector<2x32xf32> to vector<2x32xbf16>
    %cst_100 = arith.constant dense<0.000000e+00> : vector<2x12xf32>
    %220 = tpu.matmul %219, %153, %cst_100 {dimension_numbers = #tpu.dot_dimension_numbers<[1], [1], [0], [0], [0, 0, 1, 0], [], []>} : vector<2x32xbf16>, vector<12x32xbf16>, vector<2x12xf32> -> vector<2x12xf32>
    %221 = arith.addf %220, %154 : vector<2x12xf32>
    %cst_101 = arith.constant dense<0xFF800000> : vector<2xf32>
    %222 = vector.multi_reduction <maximumf>, %221, %cst_101 [1] : vector<2x12xf32> to vector<2xf32>
    %223 = vector.shape_cast %222 : vector<2xf32> to vector<2x1xf32>
    %224 = vector.broadcast %223 : vector<2x1xf32> to vector<2x12xf32>
    %225 = arith.subf %221, %224 : vector<2x12xf32>
    %226 = math.exp %225 : vector<2x12xf32>
    %cst_102 = arith.constant dense<0.000000e+00> : vector<2xf32>
    %227 = vector.multi_reduction <add>, %226, %cst_102 [1] : vector<2x12xf32> to vector<2xf32>
    %228 = vector.shape_cast %227 : vector<2xf32> to vector<2x1xf32>
    %229 = tpu.reciprocal %228 {approx = true} : vector<2x1xf32> -> vector<2x1xf32>
    %230 = vector.broadcast %229 : vector<2x1xf32> to vector<2x12xf32>
    %231 = arith.mulf %226, %230 : vector<2x12xf32>
    %232 = arith.truncf %231 : vector<2x12xf32> to vector<2x12xbf16>
    %cst_103 = arith.constant dense<0.000000e+00> : vector<2x32xf32>
    %233 = tpu.matmul %232, %153, %cst_103 {dimension_numbers = #tpu.dot_dimension_numbers<[1], [0], [0], [1], [0, 0, 1, 1], [], []>} : vector<2x12xbf16>, vector<12x32xbf16>, vector<2x32xf32> -> vector<2x32xf32>
    %234 = tpu.concatenate %218, %233, %200 in 1 : vector<2x32xf32>, vector<2x32xf32>, vector<2x32xf32> -> vector<2x96xf32>
    %235 = arith.truncf %234 : vector<2x96xf32> to vector<2x96xbf16>
    %c0_104 = arith.constant 0 : index
    %c0_105 = arith.constant 0 : index
    %236 = vector.load %arg6[%c0_104, %c0_105] : memref<96x128xbf16, #tpu.memory_space<vmem>>, vector<96x128xbf16>
    %cst_106 = arith.constant dense<0.000000e+00> : vector<2x128xf32>
    %237 = tpu.matmul %235, %236, %cst_106 {dimension_numbers = #tpu.dot_dimension_numbers<[1], [0], [0], [1], [0, 0, 1, 1], [], []>} : vector<2x96xbf16>, vector<96x128xbf16>, vector<2x128xf32> -> vector<2x128xf32>
    %c0_107 = arith.constant 0 : index
    %c0_108 = arith.constant 0 : index
    %238 = vector.load %arg7[%c0_107, %c0_108] : memref<1x128xf32, #tpu.memory_space<vmem>>, vector<1x128xf32>
    %239 = vector.broadcast %238 : vector<1x128xf32> to vector<2x128xf32>
    %240 = arith.addf %237, %239 : vector<2x128xf32>
    %241 = arith.negf %240 : vector<2x128xf32>
    %242 = math.exp %241 : vector<2x128xf32>
    %cst_109 = arith.constant 1.000000e+00 : f32
    %243 = vector.broadcast %cst_109 : f32 to vector<2x128xf32>
    %244 = arith.addf %243, %242 : vector<2x128xf32>
    %245 = arith.divf %243, %244 : vector<2x128xf32>
    %246 = vector.extract_strided_slice %245 {offsets = [0, 0], sizes = [2, 32], strides = [1, 1]} : vector<2x128xf32> to vector<2x32xf32>
    %247 = vector.extract_strided_slice %245 {offsets = [0, 32], sizes = [2, 32], strides = [1, 1]} : vector<2x128xf32> to vector<2x32xf32>
    %248 = vector.extract_strided_slice %245 {offsets = [0, 96], sizes = [2, 32], strides = [1, 1]} : vector<2x128xf32> to vector<2x32xf32>
    %249 = vector.extract_strided_slice %240 {offsets = [0, 64], sizes = [2, 32], strides = [1, 1]} : vector<2x128xf32> to vector<2x32xf32>
    %250 = math.tanh %249 : vector<2x32xf32>
    %251 = arith.mulf %247, %198 : vector<2x32xf32>
    %252 = arith.mulf %246, %250 : vector<2x32xf32>
    %253 = arith.addf %251, %252 : vector<2x32xf32>
    %254 = math.tanh %253 : vector<2x32xf32>
    %255 = arith.mulf %248, %254 : vector<2x32xf32>
    %256 = tpu.concatenate %255, %233, %218 in 1 : vector<2x32xf32>, vector<2x32xf32>, vector<2x32xf32> -> vector<2x96xf32>
    %257 = arith.truncf %256 : vector<2x96xf32> to vector<2x96xbf16>
    %c0_110 = arith.constant 0 : index
    %c0_111 = arith.constant 0 : index
    %258 = vector.load %arg8[%c0_110, %c0_111] : memref<96x128xbf16, #tpu.memory_space<vmem>>, vector<96x128xbf16>
    %cst_112 = arith.constant dense<0.000000e+00> : vector<2x128xf32>
    %259 = tpu.matmul %257, %258, %cst_112 {dimension_numbers = #tpu.dot_dimension_numbers<[1], [0], [0], [1], [0, 0, 1, 1], [], []>} : vector<2x96xbf16>, vector<96x128xbf16>, vector<2x128xf32> -> vector<2x128xf32>
    %c0_113 = arith.constant 0 : index
    %c0_114 = arith.constant 0 : index
    %260 = vector.load %arg9[%c0_113, %c0_114] : memref<1x128xf32, #tpu.memory_space<vmem>>, vector<1x128xf32>
    %261 = vector.broadcast %260 : vector<1x128xf32> to vector<2x128xf32>
    %262 = arith.addf %259, %261 : vector<2x128xf32>
    %c2_115 = arith.constant 2 : index
    %c0_116 = arith.constant 0 : index
    %c0_117 = arith.constant 0 : index
    %263 = vector.load %arg11[%c2_115, %c0_116, %c0_117] : memref<8x2x128xf32, #tpu.memory_space<vmem>>, vector<1x2x128xf32>
    %264 = vector.shape_cast %263 : vector<1x2x128xf32> to vector<2x128xf32>
    %265 = vector.shape_cast %262 : vector<2x128xf32> to vector<1x2x128xf32>
    tpu.vector_store %arg11[%c2_115, %c0_116, %c0_117], %265 {strides = array<i32>} : memref<8x2x128xf32, #tpu.memory_space<vmem>>, vector<1x2x128xf32>,
    %c2_118 = arith.constant 2 : index
    %c0_119 = arith.constant 0 : index
    %c0_120 = arith.constant 0 : index
    %266 = vector.load %arg2[%c2_118, %c0_119, %c0_120] : memref<8x2x32xf32, #tpu.memory_space<vmem>>, vector<1x2x32xf32>
    %267 = vector.shape_cast %266 : vector<1x2x32xf32> to vector<2x32xf32>
    %c0_121 = arith.constant 0 : index
    %c0_122 = arith.constant 0 : index
    %268 = vector.load %arg13[%c0_121, %c0_122] : memref<2x32xf32, #tpu.memory_space<vmem>>, vector<2x32xf32>
    tpu.vector_store %arg13[%c0_121, %c0_122], %267 {strides = array<i32>} : memref<2x32xf32, #tpu.memory_space<vmem>>, vector<2x32xf32>,
    %c2_123 = arith.constant 2 : index
    %269 = memref.load %arg0[%c2_123] : memref<8xi32, #tpu.memory_space<smem>>
    %c0_i32_124 = arith.constant 0 : i32
    %270 = arith.cmpi eq, %269, %c0_i32_124 : i32
    %271 = arith.extui %270 : i1 to i32
    %c0_i32_125 = arith.constant 0 : i32
    %272 = arith.cmpi ne, %271, %c0_i32_125 : i32
    scf.if %272 {
      %cst_257 = arith.constant dense<0xFF800000> : vector<2xf32>
      %541 = vector.multi_reduction <maximumf>, %262, %cst_257 [1] : vector<2x128xf32> to vector<2xf32>
      %542 = vector.shape_cast %541 : vector<2xf32> to vector<2x1xf32>
      %543 = vector.broadcast %542 : vector<2x1xf32> to vector<2x128xf32>
      %544 = arith.cmpf oeq, %262, %543 : vector<2x128xf32>
      %c128_i32 = arith.constant 128 : i32
      %545 = vector.broadcast %c128_i32 : i32 to vector<2x128xi32>
      %546 = arith.select %544, %159, %545 : vector<2x128xi1>, vector<2x128xi32>
      %cst_258 = arith.constant dense<2147483647> : vector<2xi32>
      %547 = vector.multi_reduction <minsi>, %546, %cst_258 [1] : vector<2x128xi32> to vector<2xi32>
      %548 = vector.shape_cast %547 : vector<2xi32> to vector<2x1xi32>
      %549 = vector.broadcast %548 : vector<2x1xi32> to vector<2x128xi32>
      %550 = arith.cmpi eq, %159, %549 : vector<2x128xi32>
      %551 = arith.extui %550 : vector<2x128xi1> to vector<2x128xi32>
      %552 = arith.sitofp %551 : vector<2x128xi32> to vector<2x128xf32>
      %553 = arith.truncf %552 : vector<2x128xf32> to vector<2x128xbf16>
      %c0_259 = arith.constant 0 : index
      %c0_260 = arith.constant 0 : index
      %554 = vector.load %arg3[%c0_259, %c0_260] : memref<128x32xbf16, #tpu.memory_space<vmem>>, vector<128x32xbf16>
      %cst_261 = arith.constant dense<0.000000e+00> : vector<2x32xf32>
      %555 = tpu.matmul %553, %554, %cst_261 {dimension_numbers = #tpu.dot_dimension_numbers<[1], [0], [0], [1], [0, 0, 1, 1], [], []>} : vector<2x128xbf16>, vector<128x32xbf16>, vector<2x32xf32> -> vector<2x32xf32>
      %c0_262 = arith.constant 0 : index
      %c0_263 = arith.constant 0 : index
      %556 = vector.load %arg13[%c0_262, %c0_263] : memref<2x32xf32, #tpu.memory_space<vmem>>, vector<2x32xf32>
      tpu.vector_store %arg13[%c0_262, %c0_263], %555 {strides = array<i32>} : memref<2x32xf32, #tpu.memory_space<vmem>>, vector<2x32xf32>,
    } else {
    }
    %c0_126 = arith.constant 0 : index
    %c0_127 = arith.constant 0 : index
    %273 = vector.load %arg13[%c0_126, %c0_127] : memref<2x32xf32, #tpu.memory_space<vmem>>, vector<2x32xf32>
    %274 = arith.truncf %255 : vector<2x32xf32> to vector<2x32xbf16>
    %cst_128 = arith.constant dense<0.000000e+00> : vector<2x12xf32>
    %275 = tpu.matmul %274, %153, %cst_128 {dimension_numbers = #tpu.dot_dimension_numbers<[1], [1], [0], [0], [0, 0, 1, 0], [], []>} : vector<2x32xbf16>, vector<12x32xbf16>, vector<2x12xf32> -> vector<2x12xf32>
    %276 = arith.addf %275, %154 : vector<2x12xf32>
    %cst_129 = arith.constant dense<0xFF800000> : vector<2xf32>
    %277 = vector.multi_reduction <maximumf>, %276, %cst_129 [1] : vector<2x12xf32> to vector<2xf32>
    %278 = vector.shape_cast %277 : vector<2xf32> to vector<2x1xf32>
    %279 = vector.broadcast %278 : vector<2x1xf32> to vector<2x12xf32>
    %280 = arith.subf %276, %279 : vector<2x12xf32>
    %281 = math.exp %280 : vector<2x12xf32>
    %cst_130 = arith.constant dense<0.000000e+00> : vector<2xf32>
    %282 = vector.multi_reduction <add>, %281, %cst_130 [1] : vector<2x12xf32> to vector<2xf32>
    %283 = vector.shape_cast %282 : vector<2xf32> to vector<2x1xf32>
    %284 = tpu.reciprocal %283 {approx = true} : vector<2x1xf32> -> vector<2x1xf32>
    %285 = vector.broadcast %284 : vector<2x1xf32> to vector<2x12xf32>
    %286 = arith.mulf %281, %285 : vector<2x12xf32>
    %287 = arith.truncf %286 : vector<2x12xf32> to vector<2x12xbf16>
    %cst_131 = arith.constant dense<0.000000e+00> : vector<2x32xf32>
    %288 = tpu.matmul %287, %153, %cst_131 {dimension_numbers = #tpu.dot_dimension_numbers<[1], [0], [0], [1], [0, 0, 1, 1], [], []>} : vector<2x12xbf16>, vector<12x32xbf16>, vector<2x32xf32> -> vector<2x32xf32>
    %289 = tpu.concatenate %273, %288, %255 in 1 : vector<2x32xf32>, vector<2x32xf32>, vector<2x32xf32> -> vector<2x96xf32>
    %290 = arith.truncf %289 : vector<2x96xf32> to vector<2x96xbf16>
    %c0_132 = arith.constant 0 : index
    %c0_133 = arith.constant 0 : index
    %291 = vector.load %arg6[%c0_132, %c0_133] : memref<96x128xbf16, #tpu.memory_space<vmem>>, vector<96x128xbf16>
    %cst_134 = arith.constant dense<0.000000e+00> : vector<2x128xf32>
    %292 = tpu.matmul %290, %291, %cst_134 {dimension_numbers = #tpu.dot_dimension_numbers<[1], [0], [0], [1], [0, 0, 1, 1], [], []>} : vector<2x96xbf16>, vector<96x128xbf16>, vector<2x128xf32> -> vector<2x128xf32>
    %c0_135 = arith.constant 0 : index
    %c0_136 = arith.constant 0 : index
    %293 = vector.load %arg7[%c0_135, %c0_136] : memref<1x128xf32, #tpu.memory_space<vmem>>, vector<1x128xf32>
    %294 = vector.broadcast %293 : vector<1x128xf32> to vector<2x128xf32>
    %295 = arith.addf %292, %294 : vector<2x128xf32>
    %296 = arith.negf %295 : vector<2x128xf32>
    %297 = math.exp %296 : vector<2x128xf32>
    %cst_137 = arith.constant 1.000000e+00 : f32
    %298 = vector.broadcast %cst_137 : f32 to vector<2x128xf32>
    %299 = arith.addf %298, %297 : vector<2x128xf32>
    %300 = arith.divf %298, %299 : vector<2x128xf32>
    %301 = vector.extract_strided_slice %300 {offsets = [0, 0], sizes = [2, 32], strides = [1, 1]} : vector<2x128xf32> to vector<2x32xf32>
    %302 = vector.extract_strided_slice %300 {offsets = [0, 32], sizes = [2, 32], strides = [1, 1]} : vector<2x128xf32> to vector<2x32xf32>
    %303 = vector.extract_strided_slice %300 {offsets = [0, 96], sizes = [2, 32], strides = [1, 1]} : vector<2x128xf32> to vector<2x32xf32>
    %304 = vector.extract_strided_slice %295 {offsets = [0, 64], sizes = [2, 32], strides = [1, 1]} : vector<2x128xf32> to vector<2x32xf32>
    %305 = math.tanh %304 : vector<2x32xf32>
    %306 = arith.mulf %302, %253 : vector<2x32xf32>
    %307 = arith.mulf %301, %305 : vector<2x32xf32>
    %308 = arith.addf %306, %307 : vector<2x32xf32>
    %309 = math.tanh %308 : vector<2x32xf32>
    %310 = arith.mulf %303, %309 : vector<2x32xf32>
    %311 = tpu.concatenate %310, %288, %273 in 1 : vector<2x32xf32>, vector<2x32xf32>, vector<2x32xf32> -> vector<2x96xf32>
    %312 = arith.truncf %311 : vector<2x96xf32> to vector<2x96xbf16>
    %c0_138 = arith.constant 0 : index
    %c0_139 = arith.constant 0 : index
    %313 = vector.load %arg8[%c0_138, %c0_139] : memref<96x128xbf16, #tpu.memory_space<vmem>>, vector<96x128xbf16>
    %cst_140 = arith.constant dense<0.000000e+00> : vector<2x128xf32>
    %314 = tpu.matmul %312, %313, %cst_140 {dimension_numbers = #tpu.dot_dimension_numbers<[1], [0], [0], [1], [0, 0, 1, 1], [], []>} : vector<2x96xbf16>, vector<96x128xbf16>, vector<2x128xf32> -> vector<2x128xf32>
    %c0_141 = arith.constant 0 : index
    %c0_142 = arith.constant 0 : index
    %315 = vector.load %arg9[%c0_141, %c0_142] : memref<1x128xf32, #tpu.memory_space<vmem>>, vector<1x128xf32>
    %316 = vector.broadcast %315 : vector<1x128xf32> to vector<2x128xf32>
    %317 = arith.addf %314, %316 : vector<2x128xf32>
    %c3_143 = arith.constant 3 : index
    %c0_144 = arith.constant 0 : index
    %c0_145 = arith.constant 0 : index
    %318 = vector.load %arg11[%c3_143, %c0_144, %c0_145] : memref<8x2x128xf32, #tpu.memory_space<vmem>>, vector<1x2x128xf32>
    %319 = vector.shape_cast %318 : vector<1x2x128xf32> to vector<2x128xf32>
    %320 = vector.shape_cast %317 : vector<2x128xf32> to vector<1x2x128xf32>
    tpu.vector_store %arg11[%c3_143, %c0_144, %c0_145], %320 {strides = array<i32>} : memref<8x2x128xf32, #tpu.memory_space<vmem>>, vector<1x2x128xf32>,
    %c3_146 = arith.constant 3 : index
    %c0_147 = arith.constant 0 : index
    %c0_148 = arith.constant 0 : index
    %321 = vector.load %arg2[%c3_146, %c0_147, %c0_148] : memref<8x2x32xf32, #tpu.memory_space<vmem>>, vector<1x2x32xf32>
    %322 = vector.shape_cast %321 : vector<1x2x32xf32> to vector<2x32xf32>
    %c0_149 = arith.constant 0 : index
    %c0_150 = arith.constant 0 : index
    %323 = vector.load %arg13[%c0_149, %c0_150] : memref<2x32xf32, #tpu.memory_space<vmem>>, vector<2x32xf32>
    tpu.vector_store %arg13[%c0_149, %c0_150], %322 {strides = array<i32>} : memref<2x32xf32, #tpu.memory_space<vmem>>, vector<2x32xf32>,
    %c3_151 = arith.constant 3 : index
    %324 = memref.load %arg0[%c3_151] : memref<8xi32, #tpu.memory_space<smem>>
    %c0_i32_152 = arith.constant 0 : i32
    %325 = arith.cmpi eq, %324, %c0_i32_152 : i32
    %326 = arith.extui %325 : i1 to i32
    %c0_i32_153 = arith.constant 0 : i32
    %327 = arith.cmpi ne, %326, %c0_i32_153 : i32
    scf.if %327 {
      %cst_257 = arith.constant dense<0xFF800000> : vector<2xf32>
      %541 = vector.multi_reduction <maximumf>, %317, %cst_257 [1] : vector<2x128xf32> to vector<2xf32>
      %542 = vector.shape_cast %541 : vector<2xf32> to vector<2x1xf32>
      %543 = vector.broadcast %542 : vector<2x1xf32> to vector<2x128xf32>
      %544 = arith.cmpf oeq, %317, %543 : vector<2x128xf32>
      %c128_i32 = arith.constant 128 : i32
      %545 = vector.broadcast %c128_i32 : i32 to vector<2x128xi32>
      %546 = arith.select %544, %159, %545 : vector<2x128xi1>, vector<2x128xi32>
      %cst_258 = arith.constant dense<2147483647> : vector<2xi32>
      %547 = vector.multi_reduction <minsi>, %546, %cst_258 [1] : vector<2x128xi32> to vector<2xi32>
      %548 = vector.shape_cast %547 : vector<2xi32> to vector<2x1xi32>
      %549 = vector.broadcast %548 : vector<2x1xi32> to vector<2x128xi32>
      %550 = arith.cmpi eq, %159, %549 : vector<2x128xi32>
      %551 = arith.extui %550 : vector<2x128xi1> to vector<2x128xi32>
      %552 = arith.sitofp %551 : vector<2x128xi32> to vector<2x128xf32>
      %553 = arith.truncf %552 : vector<2x128xf32> to vector<2x128xbf16>
      %c0_259 = arith.constant 0 : index
      %c0_260 = arith.constant 0 : index
      %554 = vector.load %arg3[%c0_259, %c0_260] : memref<128x32xbf16, #tpu.memory_space<vmem>>, vector<128x32xbf16>
      %cst_261 = arith.constant dense<0.000000e+00> : vector<2x32xf32>
      %555 = tpu.matmul %553, %554, %cst_261 {dimension_numbers = #tpu.dot_dimension_numbers<[1], [0], [0], [1], [0, 0, 1, 1], [], []>} : vector<2x128xbf16>, vector<128x32xbf16>, vector<2x32xf32> -> vector<2x32xf32>
      %c0_262 = arith.constant 0 : index
      %c0_263 = arith.constant 0 : index
      %556 = vector.load %arg13[%c0_262, %c0_263] : memref<2x32xf32, #tpu.memory_space<vmem>>, vector<2x32xf32>
      tpu.vector_store %arg13[%c0_262, %c0_263], %555 {strides = array<i32>} : memref<2x32xf32, #tpu.memory_space<vmem>>, vector<2x32xf32>,
    } else {
    }
    %c0_154 = arith.constant 0 : index
    %c0_155 = arith.constant 0 : index
    %328 = vector.load %arg13[%c0_154, %c0_155] : memref<2x32xf32, #tpu.memory_space<vmem>>, vector<2x32xf32>
    %329 = arith.truncf %310 : vector<2x32xf32> to vector<2x32xbf16>
    %cst_156 = arith.constant dense<0.000000e+00> : vector<2x12xf32>
    %330 = tpu.matmul %329, %153, %cst_156 {dimension_numbers = #tpu.dot_dimension_numbers<[1], [1], [0], [0], [0, 0, 1, 0], [], []>} : vector<2x32xbf16>, vector<12x32xbf16>, vector<2x12xf32> -> vector<2x12xf32>
    %331 = arith.addf %330, %154 : vector<2x12xf32>
    %cst_157 = arith.constant dense<0xFF800000> : vector<2xf32>
    %332 = vector.multi_reduction <maximumf>, %331, %cst_157 [1] : vector<2x12xf32> to vector<2xf32>
    %333 = vector.shape_cast %332 : vector<2xf32> to vector<2x1xf32>
    %334 = vector.broadcast %333 : vector<2x1xf32> to vector<2x12xf32>
    %335 = arith.subf %331, %334 : vector<2x12xf32>
    %336 = math.exp %335 : vector<2x12xf32>
    %cst_158 = arith.constant dense<0.000000e+00> : vector<2xf32>
    %337 = vector.multi_reduction <add>, %336, %cst_158 [1] : vector<2x12xf32> to vector<2xf32>
    %338 = vector.shape_cast %337 : vector<2xf32> to vector<2x1xf32>
    %339 = tpu.reciprocal %338 {approx = true} : vector<2x1xf32> -> vector<2x1xf32>
    %340 = vector.broadcast %339 : vector<2x1xf32> to vector<2x12xf32>
    %341 = arith.mulf %336, %340 : vector<2x12xf32>
    %342 = arith.truncf %341 : vector<2x12xf32> to vector<2x12xbf16>
    %cst_159 = arith.constant dense<0.000000e+00> : vector<2x32xf32>
    %343 = tpu.matmul %342, %153, %cst_159 {dimension_numbers = #tpu.dot_dimension_numbers<[1], [0], [0], [1], [0, 0, 1, 1], [], []>} : vector<2x12xbf16>, vector<12x32xbf16>, vector<2x32xf32> -> vector<2x32xf32>
    %344 = tpu.concatenate %328, %343, %310 in 1 : vector<2x32xf32>, vector<2x32xf32>, vector<2x32xf32> -> vector<2x96xf32>
    %345 = arith.truncf %344 : vector<2x96xf32> to vector<2x96xbf16>
    %c0_160 = arith.constant 0 : index
    %c0_161 = arith.constant 0 : index
    %346 = vector.load %arg6[%c0_160, %c0_161] : memref<96x128xbf16, #tpu.memory_space<vmem>>, vector<96x128xbf16>
    %cst_162 = arith.constant dense<0.000000e+00> : vector<2x128xf32>
    %347 = tpu.matmul %345, %346, %cst_162 {dimension_numbers = #tpu.dot_dimension_numbers<[1], [0], [0], [1], [0, 0, 1, 1], [], []>} : vector<2x96xbf16>, vector<96x128xbf16>, vector<2x128xf32> -> vector<2x128xf32>
    %c0_163 = arith.constant 0 : index
    %c0_164 = arith.constant 0 : index
    %348 = vector.load %arg7[%c0_163, %c0_164] : memref<1x128xf32, #tpu.memory_space<vmem>>, vector<1x128xf32>
    %349 = vector.broadcast %348 : vector<1x128xf32> to vector<2x128xf32>
    %350 = arith.addf %347, %349 : vector<2x128xf32>
    %351 = arith.negf %350 : vector<2x128xf32>
    %352 = math.exp %351 : vector<2x128xf32>
    %cst_165 = arith.constant 1.000000e+00 : f32
    %353 = vector.broadcast %cst_165 : f32 to vector<2x128xf32>
    %354 = arith.addf %353, %352 : vector<2x128xf32>
    %355 = arith.divf %353, %354 : vector<2x128xf32>
    %356 = vector.extract_strided_slice %355 {offsets = [0, 0], sizes = [2, 32], strides = [1, 1]} : vector<2x128xf32> to vector<2x32xf32>
    %357 = vector.extract_strided_slice %355 {offsets = [0, 32], sizes = [2, 32], strides = [1, 1]} : vector<2x128xf32> to vector<2x32xf32>
    %358 = vector.extract_strided_slice %355 {offsets = [0, 96], sizes = [2, 32], strides = [1, 1]} : vector<2x128xf32> to vector<2x32xf32>
    %359 = vector.extract_strided_slice %350 {offsets = [0, 64], sizes = [2, 32], strides = [1, 1]} : vector<2x128xf32> to vector<2x32xf32>
    %360 = math.tanh %359 : vector<2x32xf32>
    %361 = arith.mulf %357, %308 : vector<2x32xf32>
    %362 = arith.mulf %356, %360 : vector<2x32xf32>
    %363 = arith.addf %361, %362 : vector<2x32xf32>
    %364 = math.tanh %363 : vector<2x32xf32>
    %365 = arith.mulf %358, %364 : vector<2x32xf32>
    %366 = tpu.concatenate %365, %343, %328 in 1 : vector<2x32xf32>, vector<2x32xf32>, vector<2x32xf32> -> vector<2x96xf32>
    %367 = arith.truncf %366 : vector<2x96xf32> to vector<2x96xbf16>
    %c0_166 = arith.constant 0 : index
    %c0_167 = arith.constant 0 : index
    %368 = vector.load %arg8[%c0_166, %c0_167] : memref<96x128xbf16, #tpu.memory_space<vmem>>, vector<96x128xbf16>
    %cst_168 = arith.constant dense<0.000000e+00> : vector<2x128xf32>
    %369 = tpu.matmul %367, %368, %cst_168 {dimension_numbers = #tpu.dot_dimension_numbers<[1], [0], [0], [1], [0, 0, 1, 1], [], []>} : vector<2x96xbf16>, vector<96x128xbf16>, vector<2x128xf32> -> vector<2x128xf32>
    %c0_169 = arith.constant 0 : index
    %c0_170 = arith.constant 0 : index
    %370 = vector.load %arg9[%c0_169, %c0_170] : memref<1x128xf32, #tpu.memory_space<vmem>>, vector<1x128xf32>
    %371 = vector.broadcast %370 : vector<1x128xf32> to vector<2x128xf32>
    %372 = arith.addf %369, %371 : vector<2x128xf32>
    %c4_171 = arith.constant 4 : index
    %c0_172 = arith.constant 0 : index
    %c0_173 = arith.constant 0 : index
    %373 = vector.load %arg11[%c4_171, %c0_172, %c0_173] : memref<8x2x128xf32, #tpu.memory_space<vmem>>, vector<1x2x128xf32>
    %374 = vector.shape_cast %373 : vector<1x2x128xf32> to vector<2x128xf32>
    %375 = vector.shape_cast %372 : vector<2x128xf32> to vector<1x2x128xf32>
    tpu.vector_store %arg11[%c4_171, %c0_172, %c0_173], %375 {strides = array<i32>} : memref<8x2x128xf32, #tpu.memory_space<vmem>>, vector<1x2x128xf32>,
    %c4_174 = arith.constant 4 : index
    %c0_175 = arith.constant 0 : index
    %c0_176 = arith.constant 0 : index
    %376 = vector.load %arg2[%c4_174, %c0_175, %c0_176] : memref<8x2x32xf32, #tpu.memory_space<vmem>>, vector<1x2x32xf32>
    %377 = vector.shape_cast %376 : vector<1x2x32xf32> to vector<2x32xf32>
    %c0_177 = arith.constant 0 : index
    %c0_178 = arith.constant 0 : index
    %378 = vector.load %arg13[%c0_177, %c0_178] : memref<2x32xf32, #tpu.memory_space<vmem>>, vector<2x32xf32>
    tpu.vector_store %arg13[%c0_177, %c0_178], %377 {strides = array<i32>} : memref<2x32xf32, #tpu.memory_space<vmem>>, vector<2x32xf32>,
    %c4_179 = arith.constant 4 : index
    %379 = memref.load %arg0[%c4_179] : memref<8xi32, #tpu.memory_space<smem>>
    %c0_i32_180 = arith.constant 0 : i32
    %380 = arith.cmpi eq, %379, %c0_i32_180 : i32
    %381 = arith.extui %380 : i1 to i32
    %c0_i32_181 = arith.constant 0 : i32
    %382 = arith.cmpi ne, %381, %c0_i32_181 : i32
    scf.if %382 {
      %cst_257 = arith.constant dense<0xFF800000> : vector<2xf32>
      %541 = vector.multi_reduction <maximumf>, %372, %cst_257 [1] : vector<2x128xf32> to vector<2xf32>
      %542 = vector.shape_cast %541 : vector<2xf32> to vector<2x1xf32>
      %543 = vector.broadcast %542 : vector<2x1xf32> to vector<2x128xf32>
      %544 = arith.cmpf oeq, %372, %543 : vector<2x128xf32>
      %c128_i32 = arith.constant 128 : i32
      %545 = vector.broadcast %c128_i32 : i32 to vector<2x128xi32>
      %546 = arith.select %544, %159, %545 : vector<2x128xi1>, vector<2x128xi32>
      %cst_258 = arith.constant dense<2147483647> : vector<2xi32>
      %547 = vector.multi_reduction <minsi>, %546, %cst_258 [1] : vector<2x128xi32> to vector<2xi32>
      %548 = vector.shape_cast %547 : vector<2xi32> to vector<2x1xi32>
      %549 = vector.broadcast %548 : vector<2x1xi32> to vector<2x128xi32>
      %550 = arith.cmpi eq, %159, %549 : vector<2x128xi32>
      %551 = arith.extui %550 : vector<2x128xi1> to vector<2x128xi32>
      %552 = arith.sitofp %551 : vector<2x128xi32> to vector<2x128xf32>
      %553 = arith.truncf %552 : vector<2x128xf32> to vector<2x128xbf16>
      %c0_259 = arith.constant 0 : index
      %c0_260 = arith.constant 0 : index
      %554 = vector.load %arg3[%c0_259, %c0_260] : memref<128x32xbf16, #tpu.memory_space<vmem>>, vector<128x32xbf16>
      %cst_261 = arith.constant dense<0.000000e+00> : vector<2x32xf32>
      %555 = tpu.matmul %553, %554, %cst_261 {dimension_numbers = #tpu.dot_dimension_numbers<[1], [0], [0], [1], [0, 0, 1, 1], [], []>} : vector<2x128xbf16>, vector<128x32xbf16>, vector<2x32xf32> -> vector<2x32xf32>
      %c0_262 = arith.constant 0 : index
      %c0_263 = arith.constant 0 : index
      %556 = vector.load %arg13[%c0_262, %c0_263] : memref<2x32xf32, #tpu.memory_space<vmem>>, vector<2x32xf32>
      tpu.vector_store %arg13[%c0_262, %c0_263], %555 {strides = array<i32>} : memref<2x32xf32, #tpu.memory_space<vmem>>, vector<2x32xf32>,
    } else {
    }
    %c0_182 = arith.constant 0 : index
    %c0_183 = arith.constant 0 : index
    %383 = vector.load %arg13[%c0_182, %c0_183] : memref<2x32xf32, #tpu.memory_space<vmem>>, vector<2x32xf32>
    %384 = arith.truncf %365 : vector<2x32xf32> to vector<2x32xbf16>
    %cst_184 = arith.constant dense<0.000000e+00> : vector<2x12xf32>
    %385 = tpu.matmul %384, %153, %cst_184 {dimension_numbers = #tpu.dot_dimension_numbers<[1], [1], [0], [0], [0, 0, 1, 0], [], []>} : vector<2x32xbf16>, vector<12x32xbf16>, vector<2x12xf32> -> vector<2x12xf32>
    %386 = arith.addf %385, %154 : vector<2x12xf32>
    %cst_185 = arith.constant dense<0xFF800000> : vector<2xf32>
    %387 = vector.multi_reduction <maximumf>, %386, %cst_185 [1] : vector<2x12xf32> to vector<2xf32>
    %388 = vector.shape_cast %387 : vector<2xf32> to vector<2x1xf32>
    %389 = vector.broadcast %388 : vector<2x1xf32> to vector<2x12xf32>
    %390 = arith.subf %386, %389 : vector<2x12xf32>
    %391 = math.exp %390 : vector<2x12xf32>
    %cst_186 = arith.constant dense<0.000000e+00> : vector<2xf32>
    %392 = vector.multi_reduction <add>, %391, %cst_186 [1] : vector<2x12xf32> to vector<2xf32>
    %393 = vector.shape_cast %392 : vector<2xf32> to vector<2x1xf32>
    %394 = tpu.reciprocal %393 {approx = true} : vector<2x1xf32> -> vector<2x1xf32>
    %395 = vector.broadcast %394 : vector<2x1xf32> to vector<2x12xf32>
    %396 = arith.mulf %391, %395 : vector<2x12xf32>
    %397 = arith.truncf %396 : vector<2x12xf32> to vector<2x12xbf16>
    %cst_187 = arith.constant dense<0.000000e+00> : vector<2x32xf32>
    %398 = tpu.matmul %397, %153, %cst_187 {dimension_numbers = #tpu.dot_dimension_numbers<[1], [0], [0], [1], [0, 0, 1, 1], [], []>} : vector<2x12xbf16>, vector<12x32xbf16>, vector<2x32xf32> -> vector<2x32xf32>
    %399 = tpu.concatenate %383, %398, %365 in 1 : vector<2x32xf32>, vector<2x32xf32>, vector<2x32xf32> -> vector<2x96xf32>
    %400 = arith.truncf %399 : vector<2x96xf32> to vector<2x96xbf16>
    %c0_188 = arith.constant 0 : index
    %c0_189 = arith.constant 0 : index
    %401 = vector.load %arg6[%c0_188, %c0_189] : memref<96x128xbf16, #tpu.memory_space<vmem>>, vector<96x128xbf16>
    %cst_190 = arith.constant dense<0.000000e+00> : vector<2x128xf32>
    %402 = tpu.matmul %400, %401, %cst_190 {dimension_numbers = #tpu.dot_dimension_numbers<[1], [0], [0], [1], [0, 0, 1, 1], [], []>} : vector<2x96xbf16>, vector<96x128xbf16>, vector<2x128xf32> -> vector<2x128xf32>
    %c0_191 = arith.constant 0 : index
    %c0_192 = arith.constant 0 : index
    %403 = vector.load %arg7[%c0_191, %c0_192] : memref<1x128xf32, #tpu.memory_space<vmem>>, vector<1x128xf32>
    %404 = vector.broadcast %403 : vector<1x128xf32> to vector<2x128xf32>
    %405 = arith.addf %402, %404 : vector<2x128xf32>
    %406 = arith.negf %405 : vector<2x128xf32>
    %407 = math.exp %406 : vector<2x128xf32>
    %cst_193 = arith.constant 1.000000e+00 : f32
    %408 = vector.broadcast %cst_193 : f32 to vector<2x128xf32>
    %409 = arith.addf %408, %407 : vector<2x128xf32>
    %410 = arith.divf %408, %409 : vector<2x128xf32>
    %411 = vector.extract_strided_slice %410 {offsets = [0, 0], sizes = [2, 32], strides = [1, 1]} : vector<2x128xf32> to vector<2x32xf32>
    %412 = vector.extract_strided_slice %410 {offsets = [0, 32], sizes = [2, 32], strides = [1, 1]} : vector<2x128xf32> to vector<2x32xf32>
    %413 = vector.extract_strided_slice %410 {offsets = [0, 96], sizes = [2, 32], strides = [1, 1]} : vector<2x128xf32> to vector<2x32xf32>
    %414 = vector.extract_strided_slice %405 {offsets = [0, 64], sizes = [2, 32], strides = [1, 1]} : vector<2x128xf32> to vector<2x32xf32>
    %415 = math.tanh %414 : vector<2x32xf32>
    %416 = arith.mulf %412, %363 : vector<2x32xf32>
    %417 = arith.mulf %411, %415 : vector<2x32xf32>
    %418 = arith.addf %416, %417 : vector<2x32xf32>
    %419 = math.tanh %418 : vector<2x32xf32>
    %420 = arith.mulf %413, %419 : vector<2x32xf32>
    %421 = tpu.concatenate %420, %398, %383 in 1 : vector<2x32xf32>, vector<2x32xf32>, vector<2x32xf32> -> vector<2x96xf32>
    %422 = arith.truncf %421 : vector<2x96xf32> to vector<2x96xbf16>
    %c0_194 = arith.constant 0 : index
    %c0_195 = arith.constant 0 : index
    %423 = vector.load %arg8[%c0_194, %c0_195] : memref<96x128xbf16, #tpu.memory_space<vmem>>, vector<96x128xbf16>
    %cst_196 = arith.constant dense<0.000000e+00> : vector<2x128xf32>
    %424 = tpu.matmul %422, %423, %cst_196 {dimension_numbers = #tpu.dot_dimension_numbers<[1], [0], [0], [1], [0, 0, 1, 1], [], []>} : vector<2x96xbf16>, vector<96x128xbf16>, vector<2x128xf32> -> vector<2x128xf32>
    %c0_197 = arith.constant 0 : index
    %c0_198 = arith.constant 0 : index
    %425 = vector.load %arg9[%c0_197, %c0_198] : memref<1x128xf32, #tpu.memory_space<vmem>>, vector<1x128xf32>
    %426 = vector.broadcast %425 : vector<1x128xf32> to vector<2x128xf32>
    %427 = arith.addf %424, %426 : vector<2x128xf32>
    %c5_199 = arith.constant 5 : index
    %c0_200 = arith.constant 0 : index
    %c0_201 = arith.constant 0 : index
    %428 = vector.load %arg11[%c5_199, %c0_200, %c0_201] : memref<8x2x128xf32, #tpu.memory_space<vmem>>, vector<1x2x128xf32>
    %429 = vector.shape_cast %428 : vector<1x2x128xf32> to vector<2x128xf32>
    %430 = vector.shape_cast %427 : vector<2x128xf32> to vector<1x2x128xf32>
    tpu.vector_store %arg11[%c5_199, %c0_200, %c0_201], %430 {strides = array<i32>} : memref<8x2x128xf32, #tpu.memory_space<vmem>>, vector<1x2x128xf32>,
    %c5_202 = arith.constant 5 : index
    %c0_203 = arith.constant 0 : index
    %c0_204 = arith.constant 0 : index
    %431 = vector.load %arg2[%c5_202, %c0_203, %c0_204] : memref<8x2x32xf32, #tpu.memory_space<vmem>>, vector<1x2x32xf32>
    %432 = vector.shape_cast %431 : vector<1x2x32xf32> to vector<2x32xf32>
    %c0_205 = arith.constant 0 : index
    %c0_206 = arith.constant 0 : index
    %433 = vector.load %arg13[%c0_205, %c0_206] : memref<2x32xf32, #tpu.memory_space<vmem>>, vector<2x32xf32>
    tpu.vector_store %arg13[%c0_205, %c0_206], %432 {strides = array<i32>} : memref<2x32xf32, #tpu.memory_space<vmem>>, vector<2x32xf32>,
    %c5_207 = arith.constant 5 : index
    %434 = memref.load %arg0[%c5_207] : memref<8xi32, #tpu.memory_space<smem>>
    %c0_i32_208 = arith.constant 0 : i32
    %435 = arith.cmpi eq, %434, %c0_i32_208 : i32
    %436 = arith.extui %435 : i1 to i32
    %c0_i32_209 = arith.constant 0 : i32
    %437 = arith.cmpi ne, %436, %c0_i32_209 : i32
    scf.if %437 {
      %cst_257 = arith.constant dense<0xFF800000> : vector<2xf32>
      %541 = vector.multi_reduction <maximumf>, %427, %cst_257 [1] : vector<2x128xf32> to vector<2xf32>
      %542 = vector.shape_cast %541 : vector<2xf32> to vector<2x1xf32>
      %543 = vector.broadcast %542 : vector<2x1xf32> to vector<2x128xf32>
      %544 = arith.cmpf oeq, %427, %543 : vector<2x128xf32>
      %c128_i32 = arith.constant 128 : i32
      %545 = vector.broadcast %c128_i32 : i32 to vector<2x128xi32>
      %546 = arith.select %544, %159, %545 : vector<2x128xi1>, vector<2x128xi32>
      %cst_258 = arith.constant dense<2147483647> : vector<2xi32>
      %547 = vector.multi_reduction <minsi>, %546, %cst_258 [1] : vector<2x128xi32> to vector<2xi32>
      %548 = vector.shape_cast %547 : vector<2xi32> to vector<2x1xi32>
      %549 = vector.broadcast %548 : vector<2x1xi32> to vector<2x128xi32>
      %550 = arith.cmpi eq, %159, %549 : vector<2x128xi32>
      %551 = arith.extui %550 : vector<2x128xi1> to vector<2x128xi32>
      %552 = arith.sitofp %551 : vector<2x128xi32> to vector<2x128xf32>
      %553 = arith.truncf %552 : vector<2x128xf32> to vector<2x128xbf16>
      %c0_259 = arith.constant 0 : index
      %c0_260 = arith.constant 0 : index
      %554 = vector.load %arg3[%c0_259, %c0_260] : memref<128x32xbf16, #tpu.memory_space<vmem>>, vector<128x32xbf16>
      %cst_261 = arith.constant dense<0.000000e+00> : vector<2x32xf32>
      %555 = tpu.matmul %553, %554, %cst_261 {dimension_numbers = #tpu.dot_dimension_numbers<[1], [0], [0], [1], [0, 0, 1, 1], [], []>} : vector<2x128xbf16>, vector<128x32xbf16>, vector<2x32xf32> -> vector<2x32xf32>
      %c0_262 = arith.constant 0 : index
      %c0_263 = arith.constant 0 : index
      %556 = vector.load %arg13[%c0_262, %c0_263] : memref<2x32xf32, #tpu.memory_space<vmem>>, vector<2x32xf32>
      tpu.vector_store %arg13[%c0_262, %c0_263], %555 {strides = array<i32>} : memref<2x32xf32, #tpu.memory_space<vmem>>, vector<2x32xf32>,
    } else {
    }
    %c0_210 = arith.constant 0 : index
    %c0_211 = arith.constant 0 : index
    %438 = vector.load %arg13[%c0_210, %c0_211] : memref<2x32xf32, #tpu.memory_space<vmem>>, vector<2x32xf32>
    %439 = arith.truncf %420 : vector<2x32xf32> to vector<2x32xbf16>
    %cst_212 = arith.constant dense<0.000000e+00> : vector<2x12xf32>
    %440 = tpu.matmul %439, %153, %cst_212 {dimension_numbers = #tpu.dot_dimension_numbers<[1], [1], [0], [0], [0, 0, 1, 0], [], []>} : vector<2x32xbf16>, vector<12x32xbf16>, vector<2x12xf32> -> vector<2x12xf32>
    %441 = arith.addf %440, %154 : vector<2x12xf32>
    %cst_213 = arith.constant dense<0xFF800000> : vector<2xf32>
    %442 = vector.multi_reduction <maximumf>, %441, %cst_213 [1] : vector<2x12xf32> to vector<2xf32>
    %443 = vector.shape_cast %442 : vector<2xf32> to vector<2x1xf32>
    %444 = vector.broadcast %443 : vector<2x1xf32> to vector<2x12xf32>
    %445 = arith.subf %441, %444 : vector<2x12xf32>
    %446 = math.exp %445 : vector<2x12xf32>
    %cst_214 = arith.constant dense<0.000000e+00> : vector<2xf32>
    %447 = vector.multi_reduction <add>, %446, %cst_214 [1] : vector<2x12xf32> to vector<2xf32>
    %448 = vector.shape_cast %447 : vector<2xf32> to vector<2x1xf32>
    %449 = tpu.reciprocal %448 {approx = true} : vector<2x1xf32> -> vector<2x1xf32>
    %450 = vector.broadcast %449 : vector<2x1xf32> to vector<2x12xf32>
    %451 = arith.mulf %446, %450 : vector<2x12xf32>
    %452 = arith.truncf %451 : vector<2x12xf32> to vector<2x12xbf16>
    %cst_215 = arith.constant dense<0.000000e+00> : vector<2x32xf32>
    %453 = tpu.matmul %452, %153, %cst_215 {dimension_numbers = #tpu.dot_dimension_numbers<[1], [0], [0], [1], [0, 0, 1, 1], [], []>} : vector<2x12xbf16>, vector<12x32xbf16>, vector<2x32xf32> -> vector<2x32xf32>
    %454 = tpu.concatenate %438, %453, %420 in 1 : vector<2x32xf32>, vector<2x32xf32>, vector<2x32xf32> -> vector<2x96xf32>
    %455 = arith.truncf %454 : vector<2x96xf32> to vector<2x96xbf16>
    %c0_216 = arith.constant 0 : index
    %c0_217 = arith.constant 0 : index
    %456 = vector.load %arg6[%c0_216, %c0_217] : memref<96x128xbf16, #tpu.memory_space<vmem>>, vector<96x128xbf16>
    %cst_218 = arith.constant dense<0.000000e+00> : vector<2x128xf32>
    %457 = tpu.matmul %455, %456, %cst_218 {dimension_numbers = #tpu.dot_dimension_numbers<[1], [0], [0], [1], [0, 0, 1, 1], [], []>} : vector<2x96xbf16>, vector<96x128xbf16>, vector<2x128xf32> -> vector<2x128xf32>
    %c0_219 = arith.constant 0 : index
    %c0_220 = arith.constant 0 : index
    %458 = vector.load %arg7[%c0_219, %c0_220] : memref<1x128xf32, #tpu.memory_space<vmem>>, vector<1x128xf32>
    %459 = vector.broadcast %458 : vector<1x128xf32> to vector<2x128xf32>
    %460 = arith.addf %457, %459 : vector<2x128xf32>
    %461 = arith.negf %460 : vector<2x128xf32>
    %462 = math.exp %461 : vector<2x128xf32>
    %cst_221 = arith.constant 1.000000e+00 : f32
    %463 = vector.broadcast %cst_221 : f32 to vector<2x128xf32>
    %464 = arith.addf %463, %462 : vector<2x128xf32>
    %465 = arith.divf %463, %464 : vector<2x128xf32>
    %466 = vector.extract_strided_slice %465 {offsets = [0, 0], sizes = [2, 32], strides = [1, 1]} : vector<2x128xf32> to vector<2x32xf32>
    %467 = vector.extract_strided_slice %465 {offsets = [0, 32], sizes = [2, 32], strides = [1, 1]} : vector<2x128xf32> to vector<2x32xf32>
    %468 = vector.extract_strided_slice %465 {offsets = [0, 96], sizes = [2, 32], strides = [1, 1]} : vector<2x128xf32> to vector<2x32xf32>
    %469 = vector.extract_strided_slice %460 {offsets = [0, 64], sizes = [2, 32], strides = [1, 1]} : vector<2x128xf32> to vector<2x32xf32>
    %470 = math.tanh %469 : vector<2x32xf32>
    %471 = arith.mulf %467, %418 : vector<2x32xf32>
    %472 = arith.mulf %466, %470 : vector<2x32xf32>
    %473 = arith.addf %471, %472 : vector<2x32xf32>
    %474 = math.tanh %473 : vector<2x32xf32>
    %475 = arith.mulf %468, %474 : vector<2x32xf32>
    %476 = tpu.concatenate %475, %453, %438 in 1 : vector<2x32xf32>, vector<2x32xf32>, vector<2x32xf32> -> vector<2x96xf32>
    %477 = arith.truncf %476 : vector<2x96xf32> to vector<2x96xbf16>
    %c0_222 = arith.constant 0 : index
    %c0_223 = arith.constant 0 : index
    %478 = vector.load %arg8[%c0_222, %c0_223] : memref<96x128xbf16, #tpu.memory_space<vmem>>, vector<96x128xbf16>
    %cst_224 = arith.constant dense<0.000000e+00> : vector<2x128xf32>
    %479 = tpu.matmul %477, %478, %cst_224 {dimension_numbers = #tpu.dot_dimension_numbers<[1], [0], [0], [1], [0, 0, 1, 1], [], []>} : vector<2x96xbf16>, vector<96x128xbf16>, vector<2x128xf32> -> vector<2x128xf32>
    %c0_225 = arith.constant 0 : index
    %c0_226 = arith.constant 0 : index
    %480 = vector.load %arg9[%c0_225, %c0_226] : memref<1x128xf32, #tpu.memory_space<vmem>>, vector<1x128xf32>
    %481 = vector.broadcast %480 : vector<1x128xf32> to vector<2x128xf32>
    %482 = arith.addf %479, %481 : vector<2x128xf32>
    %c6_227 = arith.constant 6 : index
    %c0_228 = arith.constant 0 : index
    %c0_229 = arith.constant 0 : index
    %483 = vector.load %arg11[%c6_227, %c0_228, %c0_229] : memref<8x2x128xf32, #tpu.memory_space<vmem>>, vector<1x2x128xf32>
    %484 = vector.shape_cast %483 : vector<1x2x128xf32> to vector<2x128xf32>
    %485 = vector.shape_cast %482 : vector<2x128xf32> to vector<1x2x128xf32>
    tpu.vector_store %arg11[%c6_227, %c0_228, %c0_229], %485 {strides = array<i32>} : memref<8x2x128xf32, #tpu.memory_space<vmem>>, vector<1x2x128xf32>,
    %c6_230 = arith.constant 6 : index
    %c0_231 = arith.constant 0 : index
    %c0_232 = arith.constant 0 : index
    %486 = vector.load %arg2[%c6_230, %c0_231, %c0_232] : memref<8x2x32xf32, #tpu.memory_space<vmem>>, vector<1x2x32xf32>
    %487 = vector.shape_cast %486 : vector<1x2x32xf32> to vector<2x32xf32>
    %c0_233 = arith.constant 0 : index
    %c0_234 = arith.constant 0 : index
    %488 = vector.load %arg13[%c0_233, %c0_234] : memref<2x32xf32, #tpu.memory_space<vmem>>, vector<2x32xf32>
    tpu.vector_store %arg13[%c0_233, %c0_234], %487 {strides = array<i32>} : memref<2x32xf32, #tpu.memory_space<vmem>>, vector<2x32xf32>,
    %c6_235 = arith.constant 6 : index
    %489 = memref.load %arg0[%c6_235] : memref<8xi32, #tpu.memory_space<smem>>
    %c0_i32_236 = arith.constant 0 : i32
    %490 = arith.cmpi eq, %489, %c0_i32_236 : i32
    %491 = arith.extui %490 : i1 to i32
    %c0_i32_237 = arith.constant 0 : i32
    %492 = arith.cmpi ne, %491, %c0_i32_237 : i32
    scf.if %492 {
      %cst_257 = arith.constant dense<0xFF800000> : vector<2xf32>
      %541 = vector.multi_reduction <maximumf>, %482, %cst_257 [1] : vector<2x128xf32> to vector<2xf32>
      %542 = vector.shape_cast %541 : vector<2xf32> to vector<2x1xf32>
      %543 = vector.broadcast %542 : vector<2x1xf32> to vector<2x128xf32>
      %544 = arith.cmpf oeq, %482, %543 : vector<2x128xf32>
      %c128_i32 = arith.constant 128 : i32
      %545 = vector.broadcast %c128_i32 : i32 to vector<2x128xi32>
      %546 = arith.select %544, %159, %545 : vector<2x128xi1>, vector<2x128xi32>
      %cst_258 = arith.constant dense<2147483647> : vector<2xi32>
      %547 = vector.multi_reduction <minsi>, %546, %cst_258 [1] : vector<2x128xi32> to vector<2xi32>
      %548 = vector.shape_cast %547 : vector<2xi32> to vector<2x1xi32>
      %549 = vector.broadcast %548 : vector<2x1xi32> to vector<2x128xi32>
      %550 = arith.cmpi eq, %159, %549 : vector<2x128xi32>
      %551 = arith.extui %550 : vector<2x128xi1> to vector<2x128xi32>
      %552 = arith.sitofp %551 : vector<2x128xi32> to vector<2x128xf32>
      %553 = arith.truncf %552 : vector<2x128xf32> to vector<2x128xbf16>
      %c0_259 = arith.constant 0 : index
      %c0_260 = arith.constant 0 : index
      %554 = vector.load %arg3[%c0_259, %c0_260] : memref<128x32xbf16, #tpu.memory_space<vmem>>, vector<128x32xbf16>
      %cst_261 = arith.constant dense<0.000000e+00> : vector<2x32xf32>
      %555 = tpu.matmul %553, %554, %cst_261 {dimension_numbers = #tpu.dot_dimension_numbers<[1], [0], [0], [1], [0, 0, 1, 1], [], []>} : vector<2x128xbf16>, vector<128x32xbf16>, vector<2x32xf32> -> vector<2x32xf32>
      %c0_262 = arith.constant 0 : index
      %c0_263 = arith.constant 0 : index
      %556 = vector.load %arg13[%c0_262, %c0_263] : memref<2x32xf32, #tpu.memory_space<vmem>>, vector<2x32xf32>
      tpu.vector_store %arg13[%c0_262, %c0_263], %555 {strides = array<i32>} : memref<2x32xf32, #tpu.memory_space<vmem>>, vector<2x32xf32>,
    } else {
    }
    %c0_238 = arith.constant 0 : index
    %c0_239 = arith.constant 0 : index
    %493 = vector.load %arg13[%c0_238, %c0_239] : memref<2x32xf32, #tpu.memory_space<vmem>>, vector<2x32xf32>
    %494 = arith.truncf %475 : vector<2x32xf32> to vector<2x32xbf16>
    %cst_240 = arith.constant dense<0.000000e+00> : vector<2x12xf32>
    %495 = tpu.matmul %494, %153, %cst_240 {dimension_numbers = #tpu.dot_dimension_numbers<[1], [1], [0], [0], [0, 0, 1, 0], [], []>} : vector<2x32xbf16>, vector<12x32xbf16>, vector<2x12xf32> -> vector<2x12xf32>
    %496 = arith.addf %495, %154 : vector<2x12xf32>
    %cst_241 = arith.constant dense<0xFF800000> : vector<2xf32>
    %497 = vector.multi_reduction <maximumf>, %496, %cst_241 [1] : vector<2x12xf32> to vector<2xf32>
    %498 = vector.shape_cast %497 : vector<2xf32> to vector<2x1xf32>
    %499 = vector.broadcast %498 : vector<2x1xf32> to vector<2x12xf32>
    %500 = arith.subf %496, %499 : vector<2x12xf32>
    %501 = math.exp %500 : vector<2x12xf32>
    %cst_242 = arith.constant dense<0.000000e+00> : vector<2xf32>
    %502 = vector.multi_reduction <add>, %501, %cst_242 [1] : vector<2x12xf32> to vector<2xf32>
    %503 = vector.shape_cast %502 : vector<2xf32> to vector<2x1xf32>
    %504 = tpu.reciprocal %503 {approx = true} : vector<2x1xf32> -> vector<2x1xf32>
    %505 = vector.broadcast %504 : vector<2x1xf32> to vector<2x12xf32>
    %506 = arith.mulf %501, %505 : vector<2x12xf32>
    %507 = arith.truncf %506 : vector<2x12xf32> to vector<2x12xbf16>
    %cst_243 = arith.constant dense<0.000000e+00> : vector<2x32xf32>
    %508 = tpu.matmul %507, %153, %cst_243 {dimension_numbers = #tpu.dot_dimension_numbers<[1], [0], [0], [1], [0, 0, 1, 1], [], []>} : vector<2x12xbf16>, vector<12x32xbf16>, vector<2x32xf32> -> vector<2x32xf32>
    %509 = tpu.concatenate %493, %508, %475 in 1 : vector<2x32xf32>, vector<2x32xf32>, vector<2x32xf32> -> vector<2x96xf32>
    %510 = arith.truncf %509 : vector<2x96xf32> to vector<2x96xbf16>
    %c0_244 = arith.constant 0 : index
    %c0_245 = arith.constant 0 : index
    %511 = vector.load %arg6[%c0_244, %c0_245] : memref<96x128xbf16, #tpu.memory_space<vmem>>, vector<96x128xbf16>
    %cst_246 = arith.constant dense<0.000000e+00> : vector<2x128xf32>
    %512 = tpu.matmul %510, %511, %cst_246 {dimension_numbers = #tpu.dot_dimension_numbers<[1], [0], [0], [1], [0, 0, 1, 1], [], []>} : vector<2x96xbf16>, vector<96x128xbf16>, vector<2x128xf32> -> vector<2x128xf32>
    %c0_247 = arith.constant 0 : index
    %c0_248 = arith.constant 0 : index
    %513 = vector.load %arg7[%c0_247, %c0_248] : memref<1x128xf32, #tpu.memory_space<vmem>>, vector<1x128xf32>
    %514 = vector.broadcast %513 : vector<1x128xf32> to vector<2x128xf32>
    %515 = arith.addf %512, %514 : vector<2x128xf32>
    %516 = arith.negf %515 : vector<2x128xf32>
    %517 = math.exp %516 : vector<2x128xf32>
    %cst_249 = arith.constant 1.000000e+00 : f32
    %518 = vector.broadcast %cst_249 : f32 to vector<2x128xf32>
    %519 = arith.addf %518, %517 : vector<2x128xf32>
    %520 = arith.divf %518, %519 : vector<2x128xf32>
    %521 = vector.extract_strided_slice %520 {offsets = [0, 0], sizes = [2, 32], strides = [1, 1]} : vector<2x128xf32> to vector<2x32xf32>
    %522 = vector.extract_strided_slice %520 {offsets = [0, 32], sizes = [2, 32], strides = [1, 1]} : vector<2x128xf32> to vector<2x32xf32>
    %523 = vector.extract_strided_slice %520 {offsets = [0, 96], sizes = [2, 32], strides = [1, 1]} : vector<2x128xf32> to vector<2x32xf32>
    %524 = vector.extract_strided_slice %515 {offsets = [0, 64], sizes = [2, 32], strides = [1, 1]} : vector<2x128xf32> to vector<2x32xf32>
    %525 = math.tanh %524 : vector<2x32xf32>
    %526 = arith.mulf %522, %473 : vector<2x32xf32>
    %527 = arith.mulf %521, %525 : vector<2x32xf32>
    %528 = arith.addf %526, %527 : vector<2x32xf32>
    %529 = math.tanh %528 : vector<2x32xf32>
    %530 = arith.mulf %523, %529 : vector<2x32xf32>
    %531 = tpu.concatenate %530, %508, %493 in 1 : vector<2x32xf32>, vector<2x32xf32>, vector<2x32xf32> -> vector<2x96xf32>
    %532 = arith.truncf %531 : vector<2x96xf32> to vector<2x96xbf16>
    %c0_250 = arith.constant 0 : index
    %c0_251 = arith.constant 0 : index
    %533 = vector.load %arg8[%c0_250, %c0_251] : memref<96x128xbf16, #tpu.memory_space<vmem>>, vector<96x128xbf16>
    %cst_252 = arith.constant dense<0.000000e+00> : vector<2x128xf32>
    %534 = tpu.matmul %532, %533, %cst_252 {dimension_numbers = #tpu.dot_dimension_numbers<[1], [0], [0], [1], [0, 0, 1, 1], [], []>} : vector<2x96xbf16>, vector<96x128xbf16>, vector<2x128xf32> -> vector<2x128xf32>
    %c0_253 = arith.constant 0 : index
    %c0_254 = arith.constant 0 : index
    %535 = vector.load %arg9[%c0_253, %c0_254] : memref<1x128xf32, #tpu.memory_space<vmem>>, vector<1x128xf32>
    %536 = vector.broadcast %535 : vector<1x128xf32> to vector<2x128xf32>
    %537 = arith.addf %534, %536 : vector<2x128xf32>
    %c7 = arith.constant 7 : index
    %c0_255 = arith.constant 0 : index
    %c0_256 = arith.constant 0 : index
    %538 = vector.load %arg11[%c7, %c0_255, %c0_256] : memref<8x2x128xf32, #tpu.memory_space<vmem>>, vector<1x2x128xf32>
    %539 = vector.shape_cast %538 : vector<1x2x128xf32> to vector<2x128xf32>
    %540 = vector.shape_cast %537 : vector<2x128xf32> to vector<1x2x128xf32>
    tpu.vector_store %arg11[%c7, %c0_255, %c0_256], %540 {strides = array<i32>} : memref<8x2x128xf32, #tpu.memory_space<vmem>>, vector<1x2x128xf32>,
    return
  }
}

</mosaic_0001>

<bundles_post_ra>
// kernel: seq2seq_forward.1
= control target key start
LH: loop header
LB: loop body
LE: loop exit
PB: predicated region body
PF: predicated region fallthrough
CT: control target
= control target key end

     0   :  { %16 = vsyncpa [#allocation6], 0  ;;  %s6536_s0 = inlined_call_operand.vmem [shape: s32[8], index: 0, kind: input, shape index: {}]   ;;  %s6537_s1 = inlined_call_operand.vmem [shape: f32[6,2,32], index: 1, kind: input, shape index: {}]   ;;  %s6538_s2 = inlined_call_operand.vmem [shape: f32[8,2,32], index: 2, kind: input, shape index: {}]   ;;  %s6539_s3 = inlined_call_operand.vmem [shape: bf16[128,32], index: 3, kind: input, shape index: {}]   ;;  %s6540_s4 = inlined_call_operand.vmem [shape: bf16[64,128], index: 4, kind: input, shape index: {}]   ;;  %s6541_s5 = inlined_call_operand.vmem [shape: f32[1,128], index: 5, kind: input, shape index: {}]   ;;  %s6542_s6 = inlined_call_operand.vmem [shape: bf16[96,128], index: 6, kind: input, shape index: {}]   ;;  %s6543_s7 = inlined_call_operand.vmem [shape: f32[1,128], index: 7, kind: input, shape index: {}]   ;;  %s6544_s8 = inlined_call_operand.vmem [shape: bf16[96,128], index: 8, kind: input, shape index: {}]   ;;  %s6545_s9 = inlined_call_operand.vmem [shape: f32[1,128], index: 9, kind: input, shape index: {}]   ;;  %s6546_s10 = inlined_call_operand.vmem [shape: f32[2,12], index: 10, kind: input, shape index: {}]   ;;  %s6547_s11 = inlined_call_operand.hbm [shape: f32[8,2,128], index: 11, kind: output, shape index: {}]  }
   0x1   :  { %17 = vsyncpa [#allocation5], 0  ;;  %s24_s19 = sshll.u32 %s6536_s0, 4  ;;  %s25_s19 = int_to_ptr.vmem [resolvable:$true] %s24_s19 }
   0x2   :  { %s5333_s20 = scalar_lea.vmem %s25_s19, 16  ;;  %p5338_p1 = scmp.lt.s32.totalorder %s25_s19, %s25_s19 }
   0x3   :  { %p5334_p0 = scmp.ne.s32.totalorder %s25_s19, %s5333_s20  ;;  %p5339_p2 = scmp.lt.s32.totalorder %s5333_s20, %s5333_s20 }
   0x5   :  { %p5340_p3 = por %p5339_p2, %p5338_p1 }
   0x7   :  { %p5341_p4 = pnand %p5340_p3, %p5334_p0 }
   0x9   :  { %5344 = shalt.err (!%p5341_p4)
}
   0xa   :  { %s5371_s21 = smov [#allocation4]  }
   0xb   :  { %27 = dma.vmem_to_smem %s25_s19, 16, %s5371_s21, [#allocation6]  }
   0xc   :  { %5367 = dma.done.wait [#allocation6], 16  }
   0xd   :  { %5368 = vsyncadd [#allocation6], 4294967280 }
   0xe   :  { %51 = sfence }
   0xf   :  { %v5045_v0 = vld [vmem:[%s6540_s4] sm:$0xff]   ;;  %v5372_v1 = vmov 0.0   ;;  %v5046_v2 = vld [vmem:[%s6540_s4 + $0x8] sm:$0xff]   ;;  %vm5373_vm0 = vmmov 0   ;;  %vm54_vm1 = vcmask 261120   ;;  %v5047_v4 = vld [vmem:[%s6540_s4 + $0x10] sm:$0xff]  }
  0x10   :  { %4519 = vmatprep.subr.bf16.mxu0 %v5372_v1  ;;  %764 = vst [vmem:[#allocation7] sm:$0x3] %v5372_v1  ;;  %4531 = vmatprep.subr.bf16.mxu1 %v5372_v1  ;;  %v53_v3 = vld [vmem:[%s6537_s1] sm:$0x3]  ;;  %vm96_vm2 = vcmask 523264   ;;  %v5048_v6 = vld [vmem:[%s6540_s4 + $0x18] sm:$0xff]  }
  0x11   :  { %4520 = vmatpush3.bf16.msra.mxu0 %v5045_v0  ;;  %4527 = vmatprep.mubr.msk.bf16.mxu0 %vm5373_vm0, %v5372_v1  ;;  %v55_v5 = vsel %vm54_vm1, %v53_v3, 0.0  ;;  %v5493_v8 = vld [vmem:[%s6541_s5] ss:$0 sm:$0xff]  ;;  %s5374_s14 = smov 64   ;;  %s5375_s5 = smov 32   ;;  %v5050_v25 = vld [vmem:[%s6540_s4 + $0x8] sm:$0xff]  }
  0x12   :  { %4521 = vmatprep.subr.bf16.mxu0 %v5372_v1  ;;  %4539 = vmatprep.mubr.msk.bf16.mxu1 %vm5373_vm0, %v5372_v1  ;;  %v56_v7 = vpack.c.bf16 %v55_v5, %v55_v5  ;;  %v5049_v24 = vld [vmem:[%s6540_s4] sm:$0xff]   ;;  %v5051_v26 = vld [vmem:[%s6540_s4 + $0x10] sm:$0xff]   ;;  %v5052_v28 = vld [vmem:[%s6540_s4 + $0x18] sm:$0xff]   ;;  %vm168_vm3 = vcmask 254976   ;;  %vm837_vm4 = vcmask 1045504   ;;  %vm820_vm5 = vcmask 91136  }
  0x13   :  { %4532 = vmatpush3.bf16.msra.mxu1 %v5049_v24  ;;  %v4052_v31 = vld [vmem:[%s6537_s1 + $0x2] sm:$0x3]  ;;  %v5054_v51 = vld [vmem:[%s6540_s4 + $0x8] sm:$0xff]   ;;  %v5055_v52 = vld [vmem:[%s6540_s4 + $0x10] sm:$0xff]   ;;  %vm833_vm6 = vcmask 97280   ;;  %vm945_vm7 = vcmask 785408  }
  0x14   :  { %4533 = vmatprep.subr.bf16.mxu1 %v5372_v1  ;;  %v5053_v50 = vld [vmem:[%s6540_s4] sm:$0xff]   ;;  %v5056_v54 = vld [vmem:[%s6540_s4 + $0x18] sm:$0xff]   ;;  %s4112_s17 = sld [smem:[#allocation4 + $0x1]] }
  0x15   :  { %4522 = vmatpush3.bf16.msra.mxu0 %v5046_v2  ;;  %v4060_v57 = vld [vmem:[%s6537_s1 + $0x4] sm:$0x3] }
  0x16   :  { %4523 = vmatprep.subr.bf16.mxu0 %v5372_v1 }
  0x17   :  { %4534 = vmatpush3.bf16.msra.mxu1 %v5050_v25 }
  0x18   :  { %4535 = vmatprep.subr.bf16.mxu1 %v5372_v1 }
  0x19   :  { %4524 = vmatpush3.bf16.msra.mxu0 %v5047_v4 }
  0x1a   :  { %4525 = vmatprep.subr.bf16.mxu0 %v5372_v1  ;;  %p4113_p5 = scmp.ne.s32.totalorder %s4112_s17, 0 }
  0x1b   :  { %4536 = vmatpush3.bf16.msra.mxu1 %v5051_v26  ;;  %vm1132_vm8 = vcmask (!%p4113_p5), 1041408   ;;  %vm5378_vm11 = vmmov (!%p4113_p5), 0  }
  0x1c   :  { %4537 = vmatprep.subr.bf16.mxu1 %v5372_v1 }
  0x1d   :  { %4526 = vmatpush3.bf16.msra.mxu0 %v5048_v6 }
  0x1e   :  { %4543 = vmatprep.subr.bf16.mxu0 %v5372_v1 }
  0x1f   :  { %4538 = vmatpush3.bf16.msra.mxu1 %v5052_v28 }
  0x20   :  { %4528 = vmatmul.mubr.msk.bf16.vlgmr.msra.gmra.mrb[0].mxu0 %vm96_vm2, %v56_v7  ;;  %4555 = vmatprep.subr.bf16.mxu1 %v5372_v1 }
  0x21   :  { %4551 = vmatprep.mubr.msk.bf16.mxu0 %vm5373_vm0, %v5372_v1  ;;  %4544 = vmatpush3.bf16.msra.mxu0 %v5053_v50 }
  0x22   :  { %4545 = vmatprep.subr.bf16.mxu0 %v5372_v1 }
  0x25   :  { %4546 = vmatpush3.bf16.msra.mxu0 %v5054_v51 }
  0x26   :  { %4547 = vmatprep.subr.bf16.mxu0 %v5372_v1 }
  0x29   :  { %4548 = vmatpush3.bf16.msra.mxu0 %v5055_v52 }
  0x2a   :  { %4549 = vmatprep.subr.bf16.mxu0 %v5372_v1 }
  0x2d   :  { %4550 = vmatpush3.bf16.msra.mxu0 %v5056_v54 }
  0x2e   :  { %4567 = vmatprep.subr.bf16.mxu0 %v5372_v1 }
  0xf3   :  { %v134_v9 = vpop.f32.mrb[0].mxu0 }
  0xf4   :  { %v135_v10 = vadd.f32 %v5493_v8, %v134_v9  ;;  %v4529_v11 = vpop.f32.mrb[1].mxu0 }
  0xf5   :  { %v137_v12 = vpop.f32.mrb[2].mxu0 }
  0xf6   :  { %5081 = vtanh.f32 %v135_v10  ;;  %v4530_v13 = vpop.f32.mrb[3].mxu0  ;;  %v4051_v15 = vmul.f32 -1.442695, %v135_v10 }
  0xf8   :  { %5083 = vpow2.f32 %v4051_v15  ;;  %v5058_v15 = vld [vmem:[%s6540_s4 + $0x8] sm:$0xff]  }
 0x100   :  { %v5082_v14 = vpop.eup %5081 }
 0x101   :  { %149 = vrot.lane.b32.xlu0 %v5082_v14, %s5374_s14  ;;  %v5057_v14 = vld [vmem:[%s6540_s4] sm:$0xff]  }
 0x102   :  { %v5084_v16 = vpop.eup %5083 }
 0x103   :  { %v143_v17 = vadd.f32 1.0, %v5084_v16  ;;  %v5059_v16 = vld [vmem:[%s6540_s4 + $0x10] sm:$0xff]  }
 0x105   :  { %5085 = vrcp.f32 %v143_v17 }
 0x10f   :  { %v5086_v18 = vpop.eup %5085 }
 0x110   :  { %v147_v21 = vmul.f32 0.0, %v5086_v18 }
 0x173   :  { %v150_v19 = vpop.permute.xlu0 %149 }
 0x174   :  { %v152_v20 = vmul.f32 %v5086_v18, %v150_v19 }
 0x176   :  { %154 = vrot.lane.b32.xlu0 %v152_v20, %s5375_s5 }
 0x1e8   :  { %v155_v22 = vpop.permute.xlu0 %154 }
 0x1e9   :  { %v157_v23 = vadd.f32 %v155_v22, %v147_v21  ;;  %v4068_v21 = vld [vmem:[%s6537_s1 + $0x6] sm:$0x3] }
 0x1eb   :  { %5087 = vtanh.f32 %v157_v23 }
 0x1f5   :  { %v5088_v27 = vpop.eup %5087 }
 0x1f6   :  { %160 = vrot.lane.b32.xlu1 %v5088_v27, %s5374_s14 }
 0x268   :  { %v161_v29 = vpop.permute.xlu1 %160 }
 0x269   :  { %v5515_v30 = vmul.f32 %v5086_v18, %v161_v29  ;;  %v5060_v18 = vld [vmem:[%s6540_s4 + $0x18] sm:$0xff]  }
 0x26b   :  { %172 = vrot.lane.b32.xlu1 %v5515_v30, %s5374_s14 }
 0x2dd   :  { %v173_v32 = vpop.permute.xlu1 %172 }
 0x2de   :  { %v175_v33 = vsel %vm54_vm1, %v4052_v31, %v173_v32 }
 0x2df   :  { %v176_v34 = vpack.c.bf16 %v175_v33, %v175_v33 }
 0x2e1   :  { %4540 = vmatmul.mubr.msk.bf16.vlgmr.msra.gmra.mrb[0].mxu1 %vm96_vm2, %v176_v34 }
 0x2e2   :  { %4563 = vmatprep.mubr.msk.bf16.mxu1 %vm5373_vm0, %v5372_v1  ;;  %4556 = vmatpush3.bf16.msra.mxu1 %v5057_v14 }
 0x2e3   :  { %4557 = vmatprep.subr.bf16.mxu1 %v5372_v1 }
 0x2e6   :  { %4558 = vmatpush3.bf16.msra.mxu1 %v5058_v15 }
 0x2e7   :  { %4559 = vmatprep.subr.bf16.mxu1 %v5372_v1 }
 0x2ea   :  { %4560 = vmatpush3.bf16.msra.mxu1 %v5059_v16 }
 0x2eb   :  { %4561 = vmatprep.subr.bf16.mxu1 %v5372_v1 }
 0x2ee   :  { %4562 = vmatpush3.bf16.msra.mxu1 %v5060_v18 }
 0x2ef   :  { %4579 = vmatprep.subr.bf16.mxu1 %v5372_v1 }
 0x3b4   :  { %v253_v35 = vpop.f32.mrb[0].mxu1 }
 0x3b5   :  { %v254_v36 = vadd.f32 %v5493_v8, %v253_v35  ;;  %v4541_v37 = vpop.f32.mrb[1].mxu1 }
 0x3b6   :  { %v256_v38 = vpop.f32.mrb[2].mxu1 }
 0x3b7   :  { %5089 = vtanh.f32 %v254_v36  ;;  %v4542_v39 = vpop.f32.mrb[3].mxu1  ;;  %v4059_v41 = vmul.f32 -1.442695, %v254_v36 }
 0x3b9   :  { %5091 = vpow2.f32 %v4059_v41  ;;  %v5061_v41 = vld [vmem:[%s6540_s4] sm:$0xff]  }
 0x3c1   :  { %v5090_v40 = vpop.eup %5089 }
 0x3c2   :  { %268 = vrot.lane.b32.xlu0 %v5090_v40, %s5374_s14 }
 0x3c3   :  { %v5092_v42 = vpop.eup %5091 }
 0x3c4   :  { %v262_v43 = vadd.f32 1.0, %v5092_v42  ;;  %v5062_v42 = vld [vmem:[%s6540_s4 + $0x8] sm:$0xff]  }
 0x3c6   :  { %5093 = vrcp.f32 %v262_v43  ;;  %v5063_v43 = vld [vmem:[%s6540_s4 + $0x10] sm:$0xff]  }
 0x3d0   :  { %v5094_v44 = vpop.eup %5093 }
 0x3d1   :  { %v266_v47 = vmul.f32 %v5094_v44, %v157_v23 }
 0x434   :  { %v269_v45 = vpop.permute.xlu0 %268 }
 0x435   :  { %v271_v46 = vmul.f32 %v5094_v44, %v269_v45  ;;  %v5064_v45 = vld [vmem:[%s6540_s4 + $0x18] sm:$0xff]  }
 0x437   :  { %273 = vrot.lane.b32.xlu1 %v271_v46, %s5375_s5 }
 0x4a9   :  { %v274_v48 = vpop.permute.xlu1 %273 }
 0x4aa   :  { %v276_v49 = vadd.f32 %v274_v48, %v266_v47  ;;  %v4076_v48 = vld [vmem:[%s6537_s1 + $0x8] sm:$0x3] }
 0x4ac   :  { %5095 = vtanh.f32 %v276_v49 }
 0x4b6   :  { %v5096_v53 = vpop.eup %5095 }
 0x4b7   :  { %279 = vrot.lane.b32.xlu0 %v5096_v53, %s5374_s14 }
 0x529   :  { %v280_v55 = vpop.permute.xlu0 %279 }
 0x52a   :  { %v5546_v56 = vmul.f32 %v5094_v44, %v280_v55 }
 0x52c   :  { %290 = vrot.lane.b32.xlu1 %v5546_v56, %s5374_s14 }
 0x59e   :  { %v291_v58 = vpop.permute.xlu1 %290 }
 0x59f   :  { %v293_v59 = vsel %vm54_vm1, %v4060_v57, %v291_v58 }
 0x5a0   :  { %v294_v60 = vpack.c.bf16 %v293_v59, %v293_v59 }
 0x5a2   :  { %4552 = vmatmul.mubr.msk.bf16.vlgmr.msra.gmra.mrb[4].mxu0 %vm96_vm2, %v294_v60 }
 0x5a3   :  { %4575 = vmatprep.mubr.msk.bf16.mxu0 %vm5373_vm0, %v5372_v1  ;;  %4568 = vmatpush3.bf16.msra.mxu0 %v5061_v41 }
 0x5a4   :  { %4569 = vmatprep.subr.bf16.mxu0 %v5372_v1 }
 0x5a7   :  { %4570 = vmatpush3.bf16.msra.mxu0 %v5062_v42 }
 0x5a8   :  { %4571 = vmatprep.subr.bf16.mxu0 %v5372_v1 }
 0x5ab   :  { %4572 = vmatpush3.bf16.msra.mxu0 %v5063_v43 }
 0x5ac   :  { %4573 = vmatprep.subr.bf16.mxu0 %v5372_v1 }
 0x5af   :  { %4574 = vmatpush3.bf16.msra.mxu0 %v5064_v45 }
 0x5b0   :  { %4591 = vmatprep.subr.bf16.mxu0 %v5372_v1 }
 0x675   :  { %v371_v61 = vpop.f32.mrb[4].mxu0 }
 0x676   :  { %v372_v62 = vadd.f32 %v5493_v8, %v371_v61  ;;  %v4553_v63 = vpop.f32.mrb[5].mxu0 }
 0x677   :  { %v374_v0 = vpop.f32.mrb[6].mxu0 }
 0x678   :  { %5097 = vtanh.f32 %v372_v62  ;;  %v4554_v2 = vpop.f32.mrb[7].mxu0  ;;  %v4067_v4 = vmul.f32 -1.442695, %v372_v62 }
 0x67a   :  { %5099 = vpow2.f32 %v4067_v4 }
 0x682   :  { %v5098_v3 = vpop.eup %5097 }
 0x683   :  { %386 = vrot.lane.b32.xlu0 %v5098_v3, %s5374_s14 }
 0x684   :  { %v5100_v5 = vpop.eup %5099 }
 0x685   :  { %v380_v6 = vadd.f32 1.0, %v5100_v5  ;;  %v5065_v5 = vld [vmem:[%s6540_s4] sm:$0xff]  }
 0x687   :  { %5101 = vrcp.f32 %v380_v6  ;;  %v5066_v6 = vld [vmem:[%s6540_s4 + $0x8] sm:$0xff]  }
 0x691   :  { %v5102_v7 = vpop.eup %5101 }
 0x692   :  { %v384_v11 = vmul.f32 %v5102_v7, %v276_v49 }
 0x6f5   :  { %v387_v9 = vpop.permute.xlu0 %386 }
 0x6f6   :  { %v389_v10 = vmul.f32 %v5102_v7, %v387_v9 }
 0x6f8   :  { %391 = vrot.lane.b32.xlu1 %v389_v10, %s5375_s5  ;;  %v5068_v10 = vld [vmem:[%s6540_s4 + $0x18] sm:$0xff]  }
 0x76a   :  { %v392_v12 = vpop.permute.xlu1 %391 }
 0x76b   :  { %v394_v13 = vadd.f32 %v392_v12, %v384_v11 }
 0x76d   :  { %5103 = vtanh.f32 %v394_v13 }
 0x777   :  { %v5104_v17 = vpop.eup %5103 }
 0x778   :  { %397 = vrot.lane.b32.xlu0 %v5104_v17, %s5374_s14 }
 0x7ea   :  { %v398_v19 = vpop.permute.xlu0 %397 }
 0x7eb   :  { %v5577_v20 = vmul.f32 %v5102_v7, %v398_v19  ;;  %v5067_v7 = vld [vmem:[%s6540_s4 + $0x10] sm:$0xff]  }
 0x7ed   :  { %408 = vrot.lane.b32.xlu1 %v5577_v20, %s5374_s14 }
 0x85f   :  { %v409_v22 = vpop.permute.xlu1 %408 }
 0x860   :  { %v411_v23 = vsel %vm54_vm1, %v4068_v21, %v409_v22 }
 0x861   :  { %v412_v24 = vpack.c.bf16 %v411_v23, %v411_v23 }
 0x863   :  { %4564 = vmatmul.mubr.msk.bf16.vlgmr.msra.gmra.mrb[4].mxu1 %vm96_vm2, %v412_v24 }
 0x864   :  { %4587 = vmatprep.mubr.msk.bf16.mxu1 %vm5373_vm0, %v5372_v1  ;;  %4580 = vmatpush3.bf16.msra.mxu1 %v5065_v5  ;;  %v5071_v5 = vld [vmem:[%s6542_s6 + $0x10] sm:$0xff]  }
 0x865   :  { %4581 = vmatprep.subr.bf16.mxu1 %v5372_v1 }
 0x868   :  { %4582 = vmatpush3.bf16.msra.mxu1 %v5066_v6  ;;  %v4111_v6 = vld [vmem:[%s6538_s2 + $0x2] sm:$0x3] }
 0x869   :  { %4583 = vmatprep.subr.bf16.mxu1 %v5372_v1 }
 0x86c   :  { %4584 = vmatpush3.bf16.msra.mxu1 %v5067_v7 }
 0x86d   :  { %4585 = vmatprep.subr.bf16.mxu1 %v5372_v1 }
 0x870   :  { %4586 = vmatpush3.bf16.msra.mxu1 %v5068_v10  ;;  %v5073_v10 = vld [vmem:[%s6542_s6 + $0x20] sm:$0xff]  }
 0x871   :  { %4597 = vmatprep.subr.bf16.mxu1 %v5372_v1 }
 0x936   :  { %v489_v25 = vpop.f32.mrb[4].mxu1 }
 0x937   :  { %v490_v26 = vadd.f32 %v5493_v8, %v489_v25  ;;  %v4565_v27 = vpop.f32.mrb[5].mxu1 }
 0x938   :  { %v492_v28 = vpop.f32.mrb[6].mxu1 }
 0x939   :  { %5105 = vtanh.f32 %v490_v26  ;;  %v4566_v29 = vpop.f32.mrb[7].mxu1  ;;  %v4075_v32 = vmul.f32 -1.442695, %v490_v26 }
 0x93b   :  { %5107 = vpow2.f32 %v4075_v32 }
 0x943   :  { %v5106_v31 = vpop.eup %5105 }
 0x944   :  { %504 = vrot.lane.b32.xlu0 %v5106_v31, %s5374_s14 }
 0x945   :  { %v5108_v33 = vpop.eup %5107 }
 0x946   :  { %v498_v34 = vadd.f32 1.0, %v5108_v33 }
 0x948   :  { %5109 = vrcp.f32 %v498_v34 }
 0x952   :  { %v5110_v35 = vpop.eup %5109 }
 0x953   :  { %v502_v38 = vmul.f32 %v5110_v35, %v394_v13  ;;  %v4084_v13 = vld [vmem:[%s6537_s1 + $0xa] sm:$0x3] }
 0x9b6   :  { %v505_v36 = vpop.permute.xlu0 %504 }
 0x9b7   :  { %v507_v37 = vmul.f32 %v5110_v35, %v505_v36 }
 0x9b9   :  { %509 = vrot.lane.b32.xlu1 %v507_v37, %s5375_s5 }
 0xa2b   :  { %v510_v39 = vpop.permute.xlu1 %509 }
 0xa2c   :  { %v512_v40 = vadd.f32 %v510_v39, %v502_v38 }
 0xa2e   :  { %5111 = vtanh.f32 %v512_v40 }
 0xa38   :  { %v5112_v44 = vpop.eup %5111 }
 0xa39   :  { %515 = vrot.lane.b32.xlu0 %v5112_v44, %s5374_s14 }
 0xaab   :  { %v516_v46 = vpop.permute.xlu0 %515 }
 0xaac   :  { %v5608_v47 = vmul.f32 %v5110_v35, %v516_v46 }
 0xaae   :  { %526 = vrot.lane.b32.xlu1 %v5608_v47, %s5374_s14 }
 0xb20   :  { %v527_v49 = vpop.permute.xlu1 %526 }
 0xb21   :  { %v529_v50 = vsel %vm54_vm1, %v4076_v48, %v527_v49  ;;  %v5688_v48 = vld [vmem:[%s6546_s10] sm:$0x3]  ;;  %s5376_s10 = smov 96  }
 0xb22   :  { %v530_v51 = vpack.c.bf16 %v529_v50, %v529_v50 }
 0xb24   :  { %4576 = vmatmul.mubr.msk.bf16.vlgmr.msra.gmra.mrb[8].mxu0 %vm96_vm2, %v530_v51 }
 0xb25   :  { %4593 = vmatprep.mubr.msk.bf16.mxu0 %vm5373_vm0, %v5372_v1 }
 0xbf7   :  { %v607_v52 = vpop.f32.mrb[8].mxu0 }
 0xbf8   :  { %v608_v53 = vadd.f32 %v5493_v8, %v607_v52  ;;  %v4577_v54 = vpop.f32.mrb[9].mxu0 }
 0xbf9   :  { %v610_v55 = vpop.f32.mrb[10].mxu0 }
 0xbfa   :  { %5113 = vtanh.f32 %v608_v53  ;;  %v4578_v57 = vpop.f32.mrb[11].mxu0  ;;  %v4083_v59 = vmul.f32 -1.442695, %v608_v53 }
 0xbfc   :  { %5115 = vpow2.f32 %v4083_v59 }
 0xc04   :  { %v5114_v58 = vpop.eup %5113 }
 0xc05   :  { %622 = vrot.lane.b32.xlu0 %v5114_v58, %s5374_s14 }
 0xc06   :  { %v5116_v60 = vpop.eup %5115 }
 0xc07   :  { %v616_v61 = vadd.f32 1.0, %v5116_v60 }
 0xc09   :  { %5117 = vrcp.f32 %v616_v61 }
 0xc13   :  { %v5118_v62 = vpop.eup %5117 }
 0xc14   :  { %v620_v2 = vmul.f32 %v5118_v62, %v512_v40 }
 0xc77   :  { %v623_v63 = vpop.permute.xlu0 %622 }
 0xc78   :  { %v625_v0 = vmul.f32 %v5118_v62, %v623_v63 }
 0xc7a   :  { %627 = vrot.lane.b32.xlu1 %v625_v0, %s5375_s5 }
 0xcec   :  { %v628_v3 = vpop.permute.xlu1 %627 }
 0xced   :  { %v630_v4 = vadd.f32 %v628_v3, %v620_v2  ;;  %v5069_v2 = vld [vmem:[%s6542_s6] sm:$0xff]  }
 0xcee   :  { %v767_v3 = vld [vmem:[%s6538_s2] sm:$0x3] }
 0xcef   :  { %5119 = vtanh.f32 %v630_v4  ;;  %768 = vst.msk [vmem:[#allocation3] sm:$0x3] %vm168_vm3, %v767_v3  ;;  %v5141_v3 = vld [vmem:[%s6539_s3] sm:$0xff] (!%p4113_p5)  }
 0xcf6   :  { %v769_v7 = vld [vmem:[#allocation3] sm:$0x3] }
 0xcf7   :  { %1126 = vst.msk [vmem:[#allocation3] sm:$0x3] %vm168_vm3, %v4111_v6  ;;  %v5143_v6 = vld [vmem:[%s6539_s3 + $0x10] sm:$0xff] (!%p4113_p5)  }
 0xcf9   :  { %v5120_v9 = vpop.eup %5119 }
 0xcfa   :  { %633 = vrot.lane.b32.xlu0 %v5120_v9, %s5374_s14  ;;  %v5072_v9 = vld [vmem:[%s6542_s6 + $0x18] sm:$0xff]  }
 0xd6c   :  { %v634_v11 = vpop.permute.xlu0 %633 }
 0xd6d   :  { %v636_v12 = vmul.f32 %v5118_v62, %v634_v11  ;;  %v5074_v11 = vld [vmem:[%s6542_s6 + $0x28] sm:$0xff]  }
 0xd6f   :  { %644 = vrot.lane.b32.xlu1 %v636_v12, %s5374_s14 }
 0xde1   :  { %v645_v14 = vpop.permute.xlu1 %644 }
 0xde2   :  { %v647_v15 = vsel %vm54_vm1, %v4084_v13, %v645_v14 }
 0xde3   :  { %v648_v16 = vpack.c.bf16 %v647_v15, %v647_v15 }
 0xde5   :  { %4588 = vmatmul.mubr.msk.bf16.vlgmr.msra.gmra.mrb[8].mxu1 %vm96_vm2, %v648_v16 }
 0xde6   :  { %4599 = vmatprep.mubr.msk.bf16.mxu1 %vm5373_vm0, %v5372_v1 }
 0xeb8   :  { %v725_v17 = vpop.f32.mrb[8].mxu1 }
 0xeb9   :  { %v726_v18 = vadd.f32 %v5493_v8, %v725_v17  ;;  %v4589_v19 = vpop.f32.mrb[9].mxu1 }
 0xeba   :  { %v728_v21 = vpop.f32.mrb[10].mxu1 }
 0xebb   :  { %5121 = vtanh.f32 %v726_v18  ;;  %v4590_v22 = vpop.f32.mrb[11].mxu1  ;;  %v4091_v24 = vmul.f32 -1.442695, %v726_v18 }
 0xebc   :  { %v4094_v22 = vld [vmem:[%s6543_s7] ss:$0 sm:$0xff] }
 0xebd   :  { %5123 = vpow2.f32 %v4091_v24 }
 0xec5   :  { %v5122_v23 = vpop.eup %5121 }
 0xec6   :  { %740 = vrot.lane.b32.xlu0 %v5122_v23, %s5374_s14 }
 0xec7   :  { %v5124_v25 = vpop.eup %5123 }
 0xec8   :  { %v734_v26 = vadd.f32 1.0, %v5124_v25 }
 0xeca   :  { %5125 = vrcp.f32 %v734_v26 }
 0xed4   :  { %v5126_v27 = vpop.eup %5125 }
 0xed5   :  { %v738_v8 = vmul.f32 %v5126_v27, %v630_v4  ;;  %v5070_v4 = vld [vmem:[%s6542_s6 + $0x8] sm:$0xff]  }
 0xf38   :  { %v741_v28 = vpop.permute.xlu0 %740 }
 0xf39   :  { %v743_v29 = vmul.f32 %v5126_v27, %v741_v28 }
 0xf3b   :  { %745 = vrot.lane.b32.xlu1 %v743_v29, %s5375_s5 }
 0xf3f   :  { %165 = vrot.lane.b32.xlu1 %v5515_v30, %s5375_s5 }
 0xf43   :  { %402 = vrot.lane.b32.xlu1 %v5577_v20, %s5375_s5  ;;  %v765_v20 = vlaneseq }
 0xf45   :  { %v5666_v36 = vand.u32 127, %v765_v20 }
 0xf47   :  { %638 = vrot.lane.b32.xlu1 %v636_v12, %s5375_s5 }
 0xfad   :  { %v746_v31 = vpop.permute.xlu1 %745 }
 0xfae   :  { %v5655_v32 = vadd.f32 %v746_v31, %v738_v8 }
 0xfb0   :  { %5127 = vtanh.f32 %v5655_v32 }
 0xfb1   :  { %v166_v33 = vpop.permute.xlu1 %165 }
 0xfb2   :  { %169 = vst.msk [vmem:[#allocation2] sm:$0x3] %vm168_vm3, %v166_v33 }
 0xfb5   :  { %v403_v34 = vpop.permute.xlu1 %402 }
 0xfb6   :  { %405 = vst.msk [vmem:[#allocation2 + $0x4] sm:$0x3] %vm168_vm3, %v403_v34 }
 0xfb9   :  { %v639_v35 = vpop.permute.xlu1 %638 }
 0xfba   :  { %v5128_v30 = vpop.eup %5127  ;;  %641 = vst.msk [vmem:[#allocation2 + $0x8] sm:$0x3] %vm168_vm3, %v639_v35 }
 0xfbb   :  { %751 = vrot.lane.b32.xlu0 %v5128_v30, %s5374_s14 }
 0xfbf   :  { %284 = vrot.lane.b32.xlu0 %v5546_v56, %s5375_s5 }
 0xfc3   :  { %520 = vrot.lane.b32.xlu0 %v5608_v47, %s5375_s5 }
0x102d   :  { %v752_v37 = vpop.permute.xlu0 %751 }
0x102e   :  { %v754_v38 = vmul.f32 %v5126_v27, %v752_v37 }
0x1030   :  { %756 = vrot.lane.b32.xlu0 %v754_v38, %s5375_s5  ;;  %v770_v39 = vpack.c.bf16 %v754_v38, %v754_v38 }
0x1031   :  { %v285_v40 = vpop.permute.xlu0 %284 }
0x1032   :  { %287 = vst.msk [vmem:[#allocation2 + $0x2] sm:$0x3] %vm168_vm3, %v285_v40  ;;  %772 = vrot.lane.b32.xlu1 %v770_v39, %s5375_s5  ;;  %v5076_v39 = vld [vmem:[%s6544_s8 + $0x8] sm:$0xff]  }
0x1035   :  { %v521_v41 = vpop.permute.xlu0 %520 }
0x1036   :  { %523 = vst.msk [vmem:[#allocation2 + $0x6] sm:$0x3] %vm168_vm3, %v521_v41  ;;  %v5078_v41 = vld [vmem:[%s6544_s8 + $0x18] sm:$0xff]  }
0x103d   :  { %v760_v42 = vld [vmem:[#allocation2] sm:$0xff] }
0x10a2   :  { %v757_v56 = vpop.permute.xlu0 %756 }
0x10a3   :  { %759 = vst.msk [vmem:[#allocation2 + $0xa] sm:$0x3] %vm168_vm3, %v757_v56  ;;  %v5079_v56 = vld [vmem:[%s6544_s8 + $0x20] sm:$0xff]  }
0x10a4   :  { %v773_v47 = vpop.permute.xlu1 %772 }
0x10aa   :  { %v761_v43 = vld [vmem:[#allocation2 + $0x8] sm:$0xf] }
0x10ab   :  { %v762_v44 = vpack.c.bf16 %v761_v43, %v760_v42  ;;  %v5080_v42 = vld [vmem:[%s6544_s8 + $0x28] sm:$0xff]  }
0x10ad   :  { %v5674_v45 = vsel %vm54_vm1, %v762_v44, 0  ;;  %v5676_v46 = vsel %vm837_vm4, %v762_v44, 0 }
0x10ae   :  { %4592 = vmatpush3.bf16.xpose.msra.mxu0 %v5674_v45  ;;  %4598 = vmatpush3.bf16.msra.mxu1 %v5676_v46 }
0x10af   :  { %4603 = vmatprep.subr.bf16.mxu0 %v5372_v1  ;;  %4619 = vmatprep.subr.bf16.mxu1 %v5372_v1 }
0x10b5   :  { %4594 = vmatmul.mubr.msk.bf16.vlgmr.msra.gmra.mrb[12].mxu0 %vm54_vm1, %v773_v47 }
0x10b6   :  { %4615 = vmatprep.mubr.msk.bf16.mxu0 %vm5373_vm0, %v5372_v1  ;;  %4604 = vmatpush3.bf16.msra.mxu0 %v5069_v2 }
0x10b7   :  { %4605 = vmatprep.subr.bf16.mxu0 %v5372_v1 }
0x10ba   :  { %4606 = vmatpush3.bf16.msra.mxu0 %v5070_v4  ;;  %v5377_v4 = vmov (!%p4113_p5), 0.0  }
0x10bb   :  { %4607 = vmatprep.subr.bf16.mxu0 %v5372_v1 }
0x10be   :  { %4608 = vmatpush3.bf16.msra.mxu0 %v5071_v5  ;;  %v5142_v5 = vld [vmem:[%s6539_s3 + $0x8] sm:$0xff] (!%p4113_p5)  }
0x10bf   :  { %4609 = vmatprep.subr.bf16.mxu0 %v5372_v1 }
0x10c2   :  { %4610 = vmatpush3.bf16.msra.mxu0 %v5072_v9  ;;  %v5145_v9 = vld [vmem:[%s6539_s3 + $0x20] sm:$0xff] (!%p4113_p5)  }
0x10c3   :  { %4611 = vmatprep.subr.bf16.mxu0 %v5372_v1 }
0x10c6   :  { %4612 = vmatpush3.bf16.msra.mxu0 %v5073_v10  ;;  %v5146_v10 = vld [vmem:[%s6539_s3 + $0x28] sm:$0xff] (!%p4113_p5)  }
0x10c7   :  { %4613 = vmatprep.subr.bf16.mxu0 %v5372_v1 }
0x10ca   :  { %4614 = vmatpush3.bf16.msra.mxu0 %v5074_v11  ;;  %v5147_v11 = vld [vmem:[%s6539_s3 + $0x30] sm:$0xff] (!%p4113_p5)  }
0x10cb   :  { %4635 = vmatprep.subr.bf16.mxu0 (!%p4113_p5), %v5377_v4 }
0x1188   :  { %v814_v49 = vpop.f32.mrb[12].mxu0 }
0x1189   :  { %v815_v50 = vadd.f32 %v814_v49, %v5688_v48  ;;  %v4595_v51 = vpop.f32.mrb[13].mxu0 }
0x118a   :  { %v817_v52 = vpop.f32.mrb[14].mxu0 }
0x118b   :  { %v4596_v53 = vpop.f32.mrb[15].mxu0  ;;  %v821_v54 = vsel %vm820_vm5, %v815_v50, -inf }
0x118c   :  { %822 = vmax.xlane.f32.xlu0 %v821_v54  ;;  %v4103_v53 = vld [vmem:[%s6545_s9] ss:$0 sm:$0xff] }
0x1219   :  { %v823_v55 = vpop.xlane.xlu0 %822 }
0x121a   :  { %v824_v57 = vsub.f32 %v815_v50, %v823_v55 }
0x121c   :  { %v825_v58 = vmul.f32 1.442695, %v824_v57 }
0x121e   :  { %5129 = vpow2.f32 %v825_v58 }
0x1228   :  { %v5130_v59 = vpop.eup %5129 }
0x1229   :  { %v827_v60 = vsel %vm820_vm5, %v5130_v59, 0.0 }
0x122a   :  { %828 = vadd.xlane.f32.xlu1 %v827_v60 }
0x123b   :  { %884 = vrot.lane.b32.xlu1 %v754_v38, %s5376_s10  ;;  %v5075_v38 = vld [vmem:[%s6544_s8] sm:$0xff]  }
0x12b7   :  { %v829_v61 = vpop.xlane.xlu1 %828 }
0x12b8   :  { %5131 = vrcp.f32 %v829_v61 }
0x12bb   :  { %v885_v17 = vpop.permute.xlu1 %884 }
0x12c2   :  { %v5132_v62 = vpop.eup %5131 }
0x12c3   :  { %v831_v63 = vmul.f32 %v5132_v62, %v5130_v59 }
0x12c5   :  { %v832_v0 = vpack.c.bf16 %v831_v63, %v831_v63 }
0x12c7   :  { %4600 = vmatmul.mubr.msk.bf16.vlgmr.msra.gmra.mrb[12].mxu1 %vm833_vm6, %v832_v0 }
0x12c8   :  { %4631 = vmatprep.mubr.msk.bf16.mxu1 %vm5373_vm0, %v5372_v1  ;;  %4620 = vmatpush3.bf16.msra.mxu1 %v5075_v38 }
0x12c9   :  { %4621 = vmatprep.subr.bf16.mxu1 %v5372_v1 }
0x12cc   :  { %4622 = vmatpush3.bf16.msra.mxu1 %v5076_v39 }
0x12cd   :  { %4623 = vmatprep.subr.bf16.mxu1 %v5372_v1 }
0x139a   :  { %v874_v12 = vpop.f32.mrb[12].mxu1 }
0x139b   :  { %881 = vrot.lane.b32.xlu0 %v874_v12, %s5375_s5  ;;  %v4601_v13 = vpop.f32.mrb[13].mxu1 }
0x139c   :  { %v877_v14 = vpop.f32.mrb[14].mxu1 }
0x139d   :  { %v4602_v15 = vpop.f32.mrb[15].mxu1 }
0x140d   :  { %v882_v16 = vpop.permute.xlu0 %881 }
0x140e   :  { %v887_v18 = vsel %vm54_vm1, %v769_v7, %v882_v16 }
0x140f   :  { %v888_v19 = vsel %vm96_vm2, %v887_v18, %v885_v17 }
0x1410   :  { %v889_v21 = vpack.c.bf16 %v888_v19, %v888_v19 }
0x1412   :  { %4616 = vmatmul.mubr.msk.bf16.vlgmr.msra.gmra.mrb[16].mxu0 %vm945_vm7, %v889_v21 }
0x1413   :  { %4636 = vmatpush3.bf16.msra.mxu0 (!%p4113_p5), %v5141_v3  ;;  %4651 = vmatprep.mubr.msk.bf16.mxu0 (!%p4113_p5), %vm5378_vm11, %v5377_v4 }
0x1414   :  { %4637 = vmatprep.subr.bf16.mxu0 (!%p4113_p5), %v5377_v4 }
0x1417   :  { %4638 = vmatpush3.bf16.msra.mxu0 (!%p4113_p5), %v5142_v5 }
0x1418   :  { %4639 = vmatprep.subr.bf16.mxu0 (!%p4113_p5), %v5377_v4 }
0x141b   :  { %4640 = vmatpush3.bf16.msra.mxu0 (!%p4113_p5), %v5143_v6 }
0x141c   :  { %4641 = vmatprep.subr.bf16.mxu0 (!%p4113_p5), %v5377_v4 }
0x14e5   :  { %v983_v23 = vpop.f32.mrb[16].mxu0 }
0x14e6   :  { %v984_v24 = vadd.f32 %v4094_v22, %v983_v23  ;;  %v4617_v25 = vpop.f32.mrb[17].mxu0  ;;  %v5379_v23 = vmov (!%p4113_p5), 1.0|1.0  }
0x14e7   :  { %v986_v26 = vpop.f32.mrb[18].mxu0 }
0x14e8   :  { %5133 = vtanh.f32 %v984_v24  ;;  %v4618_v27 = vpop.f32.mrb[19].mxu0  ;;  %v4102_v29 = vmul.f32 -1.442695, %v984_v24 }
0x14ea   :  { %5135 = vpow2.f32 %v4102_v29 }
0x14f2   :  { %v5134_v28 = vpop.eup %5133 }
0x14f3   :  { %998 = vrot.lane.b32.xlu0 %v5134_v28, %s5374_s14 }
0x14f4   :  { %v5136_v8 = vpop.eup %5135 }
0x14f5   :  { %v992_v31 = vadd.f32 1.0, %v5136_v8 }
0x14f7   :  { %5137 = vrcp.f32 %v992_v31 }
0x1501   :  { %v5138_v33 = vpop.eup %5137 }
0x1502   :  { %v996_v30 = vmul.f32 %v5138_v33, %v5655_v32  ;;  %v5077_v32 = vld [vmem:[%s6544_s8 + $0x10] sm:$0xff]  }
0x1503   :  { %4624 = vmatpush3.bf16.msra.mxu1 %v5077_v32 }
0x1504   :  { %4625 = vmatprep.subr.bf16.mxu1 %v5372_v1 }
0x1507   :  { %4626 = vmatpush3.bf16.msra.mxu1 %v5078_v41 }
0x1508   :  { %4627 = vmatprep.subr.bf16.mxu1 %v5372_v1 }
0x150b   :  { %4628 = vmatpush3.bf16.msra.mxu1 %v5079_v56 }
0x150c   :  { %4629 = vmatprep.subr.bf16.mxu1 %v5372_v1 }
0x150f   :  { %4630 = vmatpush3.bf16.msra.mxu1 %v5080_v42 }
0x1565   :  { %v999_v34 = vpop.permute.xlu0 %998 }
0x1566   :  { %v1001_v35 = vmul.f32 %v5138_v33, %v999_v34 }
0x1568   :  { %1003 = vrot.lane.b32.xlu1 %v1001_v35, %s5375_s5 }
0x15da   :  { %v1004_v20 = vpop.permute.xlu1 %1003 }
0x15db   :  { %v5738_v37 = vadd.f32 %v1004_v20, %v996_v30 }
0x15dd   :  { %5139 = vtanh.f32 %v5738_v37 }
0x15e7   :  { %v5140_v40 = vpop.eup %5139 }
0x15e8   :  { %1009 = vrot.lane.b32.xlu0 %v5140_v40, %s5374_s14 }
0x15ec   :  { %1018 = vrot.lane.b32.xlu0 %v769_v7, %s5374_s14  ;;  %v5144_v7 = vld [vmem:[%s6539_s3 + $0x18] sm:$0xff] (!%p4113_p5)  }
0x15ed   :  { %4642 = vmatpush3.bf16.msra.mxu0 (!%p4113_p5), %v5144_v7 }
0x15ee   :  { %4643 = vmatprep.subr.bf16.mxu0 (!%p4113_p5), %v5377_v4 }
0x15f1   :  { %4644 = vmatpush3.bf16.msra.mxu0 (!%p4113_p5), %v5145_v9 }
0x15f2   :  { %4645 = vmatprep.subr.bf16.mxu0 (!%p4113_p5), %v5377_v4 }
0x15f5   :  { %4646 = vmatpush3.bf16.msra.mxu0 (!%p4113_p5), %v5146_v10 }
0x15f6   :  { %4647 = vmatprep.subr.bf16.mxu0 (!%p4113_p5), %v5377_v4 }
0x15f9   :  { %4648 = vmatpush3.bf16.msra.mxu0 (!%p4113_p5), %v5147_v11 }
0x15fa   :  { %4649 = vmatprep.subr.bf16.mxu0 (!%p4113_p5), %v5377_v4 }
0x165a   :  { %v1010_v43 = vpop.permute.xlu0 %1009 }
0x165b   :  { %v5766_v44 = vmul.f32 %v5138_v33, %v1010_v43 }
0x165d   :  { %1014 = vrot.lane.b32.xlu1 %v5766_v44, %s5375_s5 }
0x165e   :  { %v1019_v47 = vpop.permute.xlu0 %1018 }
0x16cf   :  { %v1015_v49 = vpop.permute.xlu1 %1014 }
0x16d0   :  { %v1021_v50 = vsel %vm54_vm1, %v1015_v49, %v882_v16  ;;  %v5148_v16 = vld [vmem:[%s6539_s3 + $0x38] sm:$0xff] (!%p4113_p5)  }
0x16d1   :  { %v1022_v51 = vsel %vm96_vm2, %v1021_v50, %v1019_v47  ;;  %4650 = vmatpush3.bf16.msra.mxu0 (!%p4113_p5), %v5148_v16 }
0x16d2   :  { %v1023_v52 = vpack.c.bf16 %v1022_v51, %v1022_v51 }
0x16d4   :  { %4632 = vmatmul.mubr.msk.bf16.vlgmr.msra.gmra.mrb[16].mxu1 %vm945_vm7, %v1023_v52 }
0x17a4   :  { %1131 = sbr.rel (%p4113_p5) target bundleno = 6715 (0x1a3b), region = 53 }
0x17a7   :  { %v1116_v54 = vpop.f32.mrb[16].mxu1 }
0x17a8   :  { %v1117_v55 = vadd.f32 %v4103_v53, %v1116_v54  ;;  %v4633_v57 = vpop.f32.mrb[17].mxu1 }
0x17a9   :  { %v1119_v58 = vpop.f32.mrb[18].mxu1 }
0x17aa   :  { %1123 = vst [vmem:[#allocation7 + $0x2] sm:$0x3] %v1117_v55  ;;  %v4634_v59 = vpop.f32.mrb[19].mxu1  ;;  %v1133_v60 = vsel (!%p4113_p5), %vm1132_vm8, %v1117_v55, -inf }
0x17ab   :  { %1134 = vmax.xlane.f32.xlu0 %v1133_v60 }
0x1838   :  { %v1135_v61 = vpop.xlane.xlu0 %1134 }
0x1839   :  { %vm1136_vm9 = vcmp.eq.f32.partialorder %v1117_v55, %v1135_v61 }
0x183a   :  { %v1137_v62 = vsel %vm1136_vm9, %v5666_v36, 128 }
0x183b   :  { %v1138_v63 = vsel %vm1132_vm8, %v1137_v62, 2147483647 }
0x183c   :  { %v1140_v0 = vshra.s32 %v1138_v63, 16  ;;  %v1139_v12 = vand.u32 65535, %v1138_v63 }
0x183e   :  { %v1142_v2 = vcvt.s32.f32 %v1140_v0  ;;  %v1141_v14 = vcvt.s32.f32 %v1139_v12 }
0x1840   :  { %1143 = vmin.xlane.f32.xlu0 %v1142_v2 }
0x18cd   :  { %v1144_v13 = vpop.xlane.xlu0 %1143 }
0x18ce   :  { %vm1145_vm10 = vcmp.eq.f32.partialorder %v1142_v2, %v1144_v13  ;;  %v1150_v17 = vcvt.f32.s32 %v1144_v13 }
0x18cf   :  { %v1146_v15 = vsel %vm1145_vm10, %v1141_v14, inf }
0x18d0   :  { %1147 = vmin.xlane.f32.xlu1 %v1146_v15  ;;  %v1151_v19 = vshll.u32 %v1150_v17, 16 }
0x195d   :  { %v1148_v18 = vpop.xlane.xlu1 %1147 }
0x195e   :  { %v1149_v21 = vcvt.f32.s32 %v1148_v18 }
0x1960   :  { %v1152_v22 = vadd.s32 %v1151_v19, %v1149_v21 }
0x1962   :  { %vm1153_vm12 = vcmp.eq.s32.totalorder %v5666_v36, %v1152_v22 }
0x1963   :  { %vm4123_vm13 = vmpackc.low %vm1153_vm12, %vm1153_vm12 }
0x1964   :  { %4652 = vmatmul.mubr.msk.bf16.vlgmr.msra.gmra.mrb[0].mxu0 %vm4123_vm13, %v5379_v23 }
0x1a37   :  { %v1255_v24 = vpop.f32.mrb[0].mxu0 }
0x1a38   :  { %1261 = vst.msk [vmem:[#allocation3] sm:$0x3] %vm168_vm3, %v1255_v24  ;;  %v4653_v25 = vpop.f32.mrb[1].mxu0 }
0x1a39   :  { %v1258_v26 = vpop.f32.mrb[2].mxu0 }
0x1a3a   :  { %v4654_v27 = vpop.f32.mrb[3].mxu0 }
0x1a3b PF:  { %v1263_v28 = vpack.c.bf16 %v5766_v44, %v5766_v44  ;;  %4655 = vmatprep.subr.bf16.mxu0 %v5372_v1  ;;  %4657 = vmatprep.mubr.msk.bf16.mxu0 %vm5373_vm0, %v5372_v1  ;;  %v5149_v47 = vld [vmem:[%s6542_s6] sm:$0xff]   ;;  %v5150_v49 = vld [vmem:[%s6542_s6 + $0x8] sm:$0xff]   ;;  %v5151_v50 = vld [vmem:[%s6542_s6 + $0x10] sm:$0xff]   ;;  %s4145_s22 = sld [smem:[#allocation4 + $0x2]] }
0x1a3c   :  { %4656 = vmatpush3.bf16.xpose.msra.mxu0 %v5674_v45  ;;  %4661 = vmatprep.subr.bf16.mxu1 %v5372_v1  ;;  %v5152_v51 = vld [vmem:[%s6542_s6 + $0x18] sm:$0xff]   ;;  %v5153_v52 = vld [vmem:[%s6542_s6 + $0x20] sm:$0xff]   ;;  %v5154_v55 = vld [vmem:[%s6542_s6 + $0x28] sm:$0xff]  }
0x1a3d   :  { %1265 = vrot.lane.b32.xlu0 %v1263_v28, %s5375_s5  ;;  %4662 = vmatpush3.bf16.msra.mxu1 %v5676_v46  ;;  %v4144_v53 = vld [vmem:[%s6538_s2 + $0x4] sm:$0x3]  ;;  %v4127_v3 = vld [vmem:[%s6543_s7] ss:$0 sm:$0xff]  ;;  %v5156_v21 = vld [vmem:[%s6544_s8 + $0x8] sm:$0xff]  }
0x1a3e   :  { %4663 = vmatprep.mubr.msk.bf16.mxu1 %vm5373_vm0, %v5372_v1  ;;  %4667 = vmatprep.subr.bf16.mxu1 %v5372_v1  ;;  %v5155_v19 = vld [vmem:[%s6544_s8] sm:$0xff]   ;;  %v5158_v23 = vld [vmem:[%s6544_s8 + $0x18] sm:$0xff]   ;;  %v5160_v25 = vld [vmem:[%s6544_s8 + $0x28] sm:$0xff]  }
0x1a3f   :  { %4683 = vmatprep.subr.bf16.mxu0 %v5372_v1  ;;  %v1262_v54 = vld [vmem:[#allocation3] sm:$0x3]  ;;  %v5159_v24 = vld [vmem:[%s6544_s8 + $0x20] sm:$0xff]  }
0x1a40   :  { %1610 = vst.msk [vmem:[#allocation3] sm:$0x3] %vm168_vm3, %v4144_v53 }
0x1a41   :  { %p4146_p6 = scmp.ne.s32.totalorder %s4145_s22, 0 }
0x1a42   :  { %vm1616_vm14 = vcmask (!%p4146_p6), 1041408   ;;  %v5177_v53 = vld [vmem:[%s6539_s3 + $0x20] sm:$0xff] (!%p4146_p6)   ;;  %vm5381_vm8 = vmmov (!%p4146_p6), 0  }
0x1aaf   :  { %v1266_v29 = vpop.permute.xlu0 %1265 }
0x1ab0   :  { %4658 = vmatmul.mubr.msk.bf16.vlgmr.msra.gmra.mrb[0].mxu0 %vm54_vm1, %v1266_v29 }
0x1ab1   :  { %4695 = vmatprep.mubr.msk.bf16.mxu0 %vm5373_vm0, %v5372_v1  ;;  %4684 = vmatpush3.bf16.msra.mxu0 %v5155_v19 }
0x1ab2   :  { %4685 = vmatprep.subr.bf16.mxu0 %v5372_v1 }
0x1ab5   :  { %4686 = vmatpush3.bf16.msra.mxu0 %v5156_v21 }
0x1ab6   :  { %4687 = vmatprep.subr.bf16.mxu0 %v5372_v1 }
0x1b83   :  { %v1304_v8 = vpop.f32.mrb[0].mxu0 }
0x1b84   :  { %v1305_v31 = vadd.f32 %v1304_v8, %v5688_v48  ;;  %v4659_v33 = vpop.f32.mrb[1].mxu0 }
0x1b85   :  { %v1307_v34 = vpop.f32.mrb[2].mxu0 }
0x1b86   :  { %v4660_v35 = vpop.f32.mrb[3].mxu0  ;;  %v1310_v30 = vsel %vm820_vm5, %v1305_v31, -inf  ;;  %v4136_v34 = vld [vmem:[%s6545_s9] ss:$0 sm:$0xff] }
0x1b87   :  { %1311 = vmax.xlane.f32.xlu0 %v1310_v30 }
0x1c14   :  { %v1312_v20 = vpop.xlane.xlu0 %1311 }
0x1c15   :  { %v1313_v38 = vsub.f32 %v1305_v31, %v1312_v20 }
0x1c17   :  { %v1314_v39 = vmul.f32 1.442695, %v1313_v38 }
0x1c19   :  { %5161 = vpow2.f32 %v1314_v39 }
0x1c23   :  { %v5162_v32 = vpop.eup %5161 }
0x1c24   :  { %v1316_v40 = vsel %vm820_vm5, %v5162_v32, 0.0 }
0x1c25   :  { %1317 = vadd.xlane.f32.xlu1 %v1316_v40 }
0x1cb2   :  { %v1318_v41 = vpop.xlane.xlu1 %1317 }
0x1cb3   :  { %5163 = vrcp.f32 %v1318_v41 }
0x1cbd   :  { %v5164_v56 = vpop.eup %5163 }
0x1cbe   :  { %v1320_v42 = vmul.f32 %v5164_v56, %v5162_v32 }
0x1cc0   :  { %v1321_v43 = vpack.c.bf16 %v1320_v42, %v1320_v42 }
0x1cc2   :  { %4664 = vmatmul.mubr.msk.bf16.vlgmr.msra.gmra.mrb[0].mxu1 %vm833_vm6, %v1321_v43 }
0x1cc3   :  { %4679 = vmatprep.mubr.msk.bf16.mxu1 %vm5373_vm0, %v5372_v1  ;;  %4668 = vmatpush3.bf16.msra.mxu1 %v5149_v47  ;;  %v5173_v47 = vld [vmem:[%s6539_s3] sm:$0xff] (!%p4146_p6)  }
0x1cc4   :  { %4669 = vmatprep.subr.bf16.mxu1 %v5372_v1 }
0x1cc7   :  { %4670 = vmatpush3.bf16.msra.mxu1 %v5150_v49  ;;  %v5380_v49 = vmov (!%p4146_p6), 0.0  }
0x1cc8   :  { %4671 = vmatprep.subr.bf16.mxu1 %v5372_v1 }
0x1ccb   :  { %4672 = vmatpush3.bf16.msra.mxu1 %v5151_v50  ;;  %v5174_v50 = vld [vmem:[%s6539_s3 + $0x8] sm:$0xff] (!%p4146_p6)  }
0x1ccc   :  { %4673 = vmatprep.subr.bf16.mxu1 %v5372_v1 }
0x1ccf   :  { %4674 = vmatpush3.bf16.msra.mxu1 %v5152_v51  ;;  %v5175_v51 = vld [vmem:[%s6539_s3 + $0x10] sm:$0xff] (!%p4146_p6)  }
0x1cd0   :  { %4675 = vmatprep.subr.bf16.mxu1 %v5372_v1 }
0x1cd3   :  { %4676 = vmatpush3.bf16.msra.mxu1 %v5153_v52  ;;  %v5176_v52 = vld [vmem:[%s6539_s3 + $0x18] sm:$0xff] (!%p4146_p6)  }
0x1cd4   :  { %4677 = vmatprep.subr.bf16.mxu1 %v5372_v1 }
0x1cd7   :  { %4678 = vmatpush3.bf16.msra.mxu1 %v5154_v55  ;;  %v5179_v55 = vld [vmem:[%s6539_s3 + $0x30] sm:$0xff] (!%p4146_p6)  }
0x1d95   :  { %v1359_v57 = vpop.f32.mrb[0].mxu1 }
0x1d96   :  { %1366 = vrot.lane.b32.xlu1 %v1359_v57, %s5375_s5  ;;  %v4665_v58 = vpop.f32.mrb[1].mxu1 }
0x1d97   :  { %v1362_v59 = vpop.f32.mrb[2].mxu1 }
0x1d98   :  { %v4666_v60 = vpop.f32.mrb[3].mxu1 }
0x1d9a   :  { %1369 = vrot.lane.b32.xlu1 %v5766_v44, %s5376_s10 }
0x1e08   :  { %v1367_v61 = vpop.permute.xlu1 %1366 }
0x1e09   :  { %v1372_v63 = vsel %vm54_vm1, %v1262_v54, %v1367_v61 }
0x1e0c   :  { %v1370_v62 = vpop.permute.xlu1 %1369 }
0x1e0d   :  { %v1373_v0 = vsel %vm96_vm2, %v1372_v63, %v1370_v62 }
0x1e0e   :  { %v1374_v2 = vpack.c.bf16 %v1373_v0, %v1373_v0 }
0x1e10   :  { %4680 = vmatmul.mubr.msk.bf16.vlgmr.msra.gmra.mrb[4].mxu1 %vm945_vm7, %v1374_v2 }
0x1ee3   :  { %v1467_v4 = vpop.f32.mrb[4].mxu1 }
0x1ee4   :  { %v1468_v5 = vadd.f32 %v4127_v3, %v1467_v4  ;;  %v4681_v6 = vpop.f32.mrb[5].mxu1  ;;  %v5382_v4 = vmov (!%p4146_p6), 1.0|1.0  }
0x1ee5   :  { %v1470_v7 = vpop.f32.mrb[6].mxu1 }
0x1ee6   :  { %5165 = vtanh.f32 %v1468_v5  ;;  %v4682_v9 = vpop.f32.mrb[7].mxu1  ;;  %v4135_v10 = vmul.f32 -1.442695, %v1468_v5 }
0x1ee8   :  { %5167 = vpow2.f32 %v4135_v10 }
0x1ef0   :  { %v5166_v44 = vpop.eup %5165 }
0x1ef1   :  { %1482 = vrot.lane.b32.xlu1 %v5166_v44, %s5374_s14 }
0x1ef2   :  { %v5168_v11 = vpop.eup %5167 }
0x1ef3   :  { %v1476_v12 = vadd.f32 1.0, %v5168_v11 }
0x1ef5   :  { %5169 = vrcp.f32 %v1476_v12 }
0x1eff   :  { %v5170_v13 = vpop.eup %5169 }
0x1f00   :  { %v1480_v16 = vmul.f32 %v5170_v13, %v5738_v37  ;;  %v5157_v37 = vld [vmem:[%s6544_s8 + $0x10] sm:$0xff]  }
0x1f01   :  { %4688 = vmatpush3.bf16.msra.mxu0 %v5157_v37 }
0x1f02   :  { %4689 = vmatprep.subr.bf16.mxu0 %v5372_v1 }
0x1f05   :  { %4690 = vmatpush3.bf16.msra.mxu0 %v5158_v23 }
0x1f06   :  { %4691 = vmatprep.subr.bf16.mxu0 %v5372_v1 }
0x1f09   :  { %4692 = vmatpush3.bf16.msra.mxu0 %v5159_v24 }
0x1f0a   :  { %4693 = vmatprep.subr.bf16.mxu0 %v5372_v1 }
0x1f0d   :  { %4694 = vmatpush3.bf16.msra.mxu0 %v5160_v25 }
0x1f0e   :  { %4699 = vmatprep.subr.bf16.mxu0 (!%p4146_p6), %v5380_v49 }
0x1f63   :  { %v1483_v14 = vpop.permute.xlu1 %1482 }
0x1f64   :  { %v1485_v15 = vmul.f32 %v5170_v13, %v1483_v14 }
0x1f66   :  { %1487 = vrot.lane.b32.xlu1 %v1485_v15, %s5375_s5 }
0x1fd8   :  { %v1488_v17 = vpop.permute.xlu1 %1487 }
0x1fd9   :  { %v5864_v18 = vadd.f32 %v1488_v17, %v1480_v16 }
0x1fdb   :  { %5171 = vtanh.f32 %v5864_v18 }
0x1fe5   :  { %v5172_v22 = vpop.eup %5171 }
0x1fe6   :  { %1493 = vrot.lane.b32.xlu1 %v5172_v22, %s5374_s14 }
0x1fea   :  { %1502 = vrot.lane.b32.xlu1 %v1262_v54, %s5374_s14  ;;  %v5178_v54 = vld [vmem:[%s6539_s3 + $0x28] sm:$0xff] (!%p4146_p6)  }
0x2058   :  { %v1494_v26 = vpop.permute.xlu1 %1493 }
0x2059   :  { %v5892_v27 = vmul.f32 %v5170_v13, %v1494_v26 }
0x205b   :  { %1498 = vrot.lane.b32.xlu0 %v5892_v27, %s5375_s5 }
0x205c   :  { %v1503_v28 = vpop.permute.xlu1 %1502 }
0x20cd   :  { %v1499_v29 = vpop.permute.xlu0 %1498 }
0x20ce   :  { %v1505_v8 = vsel %vm54_vm1, %v1499_v29, %v1367_v61  ;;  %v5180_v61 = vld [vmem:[%s6539_s3 + $0x38] sm:$0xff] (!%p4146_p6)  }
0x20cf   :  { %v1506_v31 = vsel %vm96_vm2, %v1505_v8, %v1503_v28 }
0x20d0   :  { %v1507_v33 = vpack.c.bf16 %v1506_v31, %v1506_v31 }
0x20d2   :  { %4696 = vmatmul.mubr.msk.bf16.vlgmr.msra.gmra.mrb[4].mxu0 %vm945_vm7, %v1507_v33 }
0x20d3   :  { %4700 = vmatpush3.bf16.msra.mxu0 (!%p4146_p6), %v5173_v47  ;;  %4715 = vmatprep.mubr.msk.bf16.mxu0 (!%p4146_p6), %vm5381_vm8, %v5380_v49 }
0x20d4   :  { %4701 = vmatprep.subr.bf16.mxu0 (!%p4146_p6), %v5380_v49 }
0x20d7   :  { %4702 = vmatpush3.bf16.msra.mxu0 (!%p4146_p6), %v5174_v50 }
0x20d8   :  { %4703 = vmatprep.subr.bf16.mxu0 (!%p4146_p6), %v5380_v49 }
0x20db   :  { %4704 = vmatpush3.bf16.msra.mxu0 (!%p4146_p6), %v5175_v51 }
0x20dc   :  { %4705 = vmatprep.subr.bf16.mxu0 (!%p4146_p6), %v5380_v49 }
0x20df   :  { %4706 = vmatpush3.bf16.msra.mxu0 (!%p4146_p6), %v5176_v52 }
0x20e0   :  { %4707 = vmatprep.subr.bf16.mxu0 (!%p4146_p6), %v5380_v49 }
0x20e3   :  { %4708 = vmatpush3.bf16.msra.mxu0 (!%p4146_p6), %v5177_v53 }
0x20e4   :  { %4709 = vmatprep.subr.bf16.mxu0 (!%p4146_p6), %v5380_v49 }
0x20e7   :  { %4710 = vmatpush3.bf16.msra.mxu0 (!%p4146_p6), %v5178_v54 }
0x20e8   :  { %4711 = vmatprep.subr.bf16.mxu0 (!%p4146_p6), %v5380_v49 }
0x20eb   :  { %4712 = vmatpush3.bf16.msra.mxu0 (!%p4146_p6), %v5179_v55 }
0x20ec   :  { %4713 = vmatprep.subr.bf16.mxu0 (!%p4146_p6), %v5380_v49 }
0x20ef   :  { %4714 = vmatpush3.bf16.msra.mxu0 (!%p4146_p6), %v5180_v61 }
0x21a2   :  { %1615 = sbr.rel (%p4146_p6) target bundleno = 9273 (0x2439), region = 57 }
0x21a5   :  { %v1600_v35 = vpop.f32.mrb[4].mxu0 }
0x21a6   :  { %v1601_v30 = vadd.f32 %v4136_v34, %v1600_v35  ;;  %v4697_v20 = vpop.f32.mrb[5].mxu0 }
0x21a7   :  { %v1603_v38 = vpop.f32.mrb[6].mxu0 }
0x21a8   :  { %1607 = vst [vmem:[#allocation7 + $0x4] sm:$0x3] %v1601_v30  ;;  %v4698_v39 = vpop.f32.mrb[7].mxu0  ;;  %v1617_v32 = vsel (!%p4146_p6), %vm1616_vm14, %v1601_v30, -inf }
0x21a9   :  { %1618 = vmax.xlane.f32.xlu0 %v1617_v32 }
0x2236   :  { %v1619_v40 = vpop.xlane.xlu0 %1618 }
0x2237   :  { %vm1620_vm15 = vcmp.eq.f32.partialorder %v1601_v30, %v1619_v40 }
0x2238   :  { %v1621_v41 = vsel %vm1620_vm15, %v5666_v36, 128 }
0x2239   :  { %v1622_v56 = vsel %vm1616_vm14, %v1621_v41, 2147483647 }
0x223a   :  { %v1624_v42 = vshra.s32 %v1622_v56, 16  ;;  %v1623_v57 = vand.u32 65535, %v1622_v56 }
0x223c   :  { %v1626_v43 = vcvt.s32.f32 %v1624_v42  ;;  %v1625_v59 = vcvt.s32.f32 %v1623_v57 }
0x223e   :  { %1627 = vmin.xlane.f32.xlu0 %v1626_v43 }
0x22cb   :  { %v1628_v58 = vpop.xlane.xlu0 %1627 }
0x22cc   :  { %vm1629_vm4 = vcmp.eq.f32.partialorder %v1626_v43, %v1628_v58  ;;  %v1634_v62 = vcvt.f32.s32 %v1628_v58 }
0x22cd   :  { %v1630_v60 = vsel %vm1629_vm4, %v1625_v59, inf }
0x22ce   :  { %1631 = vmin.xlane.f32.xlu1 %v1630_v60  ;;  %v1635_v0 = vshll.u32 %v1634_v62, 16 }
0x235b   :  { %v1632_v63 = vpop.xlane.xlu1 %1631 }
0x235c   :  { %v1633_v2 = vcvt.f32.s32 %v1632_v63 }
0x235e   :  { %v1636_v3 = vadd.s32 %v1635_v0, %v1633_v2 }
0x2360   :  { %vm1637_vm9 = vcmp.eq.s32.totalorder %v5666_v36, %v1636_v3 }
0x2361   :  { %vm4156_vm10 = vmpackc.low %vm1637_vm9, %vm1637_vm9 }
0x2362   :  { %4716 = vmatmul.mubr.msk.bf16.vlgmr.msra.gmra.mrb[0].mxu0 %vm4156_vm10, %v5382_v4 }
0x2435   :  { %v1739_v5 = vpop.f32.mrb[0].mxu0 }
0x2436   :  { %1745 = vst.msk [vmem:[#allocation3] sm:$0x3] %vm168_vm3, %v1739_v5  ;;  %v4717_v6 = vpop.f32.mrb[1].mxu0 }
0x2437   :  { %v1742_v7 = vpop.f32.mrb[2].mxu0 }
0x2438   :  { %v4718_v9 = vpop.f32.mrb[3].mxu0 }
0x2439 PF:  { %v1747_v44 = vpack.c.bf16 %v5892_v27, %v5892_v27  ;;  %4719 = vmatprep.subr.bf16.mxu0 %v5372_v1  ;;  %4721 = vmatprep.mubr.msk.bf16.mxu0 %vm5373_vm0, %v5372_v1  ;;  %v5181_v28 = vld [vmem:[%s6542_s6] sm:$0xff]   ;;  %v5182_v29 = vld [vmem:[%s6542_s6 + $0x8] sm:$0xff]   ;;  %v5183_v8 = vld [vmem:[%s6542_s6 + $0x10] sm:$0xff]   ;;  %s4178_s1 = sld [smem:[#allocation4 + $0x3]] }
0x243a   :  { %4720 = vmatpush3.bf16.xpose.msra.mxu0 %v5674_v45  ;;  %4725 = vmatprep.subr.bf16.mxu1 %v5372_v1  ;;  %v5184_v31 = vld [vmem:[%s6542_s6 + $0x18] sm:$0xff]   ;;  %v5185_v33 = vld [vmem:[%s6542_s6 + $0x20] sm:$0xff]   ;;  %v5186_v30 = vld [vmem:[%s6542_s6 + $0x28] sm:$0xff]  }
0x243b   :  { %1749 = vrot.lane.b32.xlu0 %v1747_v44, %s5375_s5  ;;  %4726 = vmatpush3.bf16.msra.mxu1 %v5676_v46  ;;  %v4177_v34 = vld [vmem:[%s6538_s2 + $0x6] sm:$0x3]  ;;  %v4160_v47 = vld [vmem:[%s6543_s7] ss:$0 sm:$0xff]  ;;  %v5188_v2 = vld [vmem:[%s6544_s8 + $0x8] sm:$0xff]  }
0x243c   :  { %4727 = vmatprep.mubr.msk.bf16.mxu1 %vm5373_vm0, %v5372_v1  ;;  %4731 = vmatprep.subr.bf16.mxu1 %v5372_v1  ;;  %v5187_v0 = vld [vmem:[%s6544_s8] sm:$0xff]   ;;  %v5190_v4 = vld [vmem:[%s6544_s8 + $0x18] sm:$0xff]   ;;  %v5192_v6 = vld [vmem:[%s6544_s8 + $0x28] sm:$0xff]  }
0x243d   :  { %4747 = vmatprep.subr.bf16.mxu0 %v5372_v1  ;;  %v1746_v35 = vld [vmem:[#allocation3] sm:$0x3]  ;;  %v5191_v5 = vld [vmem:[%s6544_s8 + $0x20] sm:$0xff]  }
0x243e   :  { %2094 = vst.msk [vmem:[#allocation3] sm:$0x3] %vm168_vm3, %v4177_v34 }
0x243f   :  { %p4179_p7 = scmp.ne.s32.totalorder %s4178_s1, 0 }
0x2440   :  { %vm2100_vm11 = vcmask (!%p4179_p7), 1041408   ;;  %v5209_v34 = vld [vmem:[%s6539_s3 + $0x20] sm:$0xff] (!%p4179_p7)   ;;  %vm5384_vm14 = vmmov (!%p4179_p7), 0  }
0x24ad   :  { %v1750_v10 = vpop.permute.xlu0 %1749 }
0x24ae   :  { %4722 = vmatmul.mubr.msk.bf16.vlgmr.msra.gmra.mrb[0].mxu0 %vm54_vm1, %v1750_v10 }
0x24af   :  { %4759 = vmatprep.mubr.msk.bf16.mxu0 %vm5373_vm0, %v5372_v1  ;;  %4748 = vmatpush3.bf16.msra.mxu0 %v5187_v0 }
0x24b0   :  { %4749 = vmatprep.subr.bf16.mxu0 %v5372_v1 }
0x24b3   :  { %4750 = vmatpush3.bf16.msra.mxu0 %v5188_v2 }
0x24b4   :  { %4751 = vmatprep.subr.bf16.mxu0 %v5372_v1 }
0x2581   :  { %v1788_v11 = vpop.f32.mrb[0].mxu0 }
0x2582   :  { %v1789_v12 = vadd.f32 %v1788_v11, %v5688_v48  ;;  %v4723_v13 = vpop.f32.mrb[1].mxu0 }
0x2583   :  { %v1791_v14 = vpop.f32.mrb[2].mxu0 }
0x2584   :  { %v4724_v15 = vpop.f32.mrb[3].mxu0  ;;  %v1794_v16 = vsel %vm820_vm5, %v1789_v12, -inf  ;;  %v4169_v14 = vld [vmem:[%s6545_s9] ss:$0 sm:$0xff] }
0x2585   :  { %1795 = vmax.xlane.f32.xlu0 %v1794_v16 }
0x2612   :  { %v1796_v17 = vpop.xlane.xlu0 %1795 }
0x2613   :  { %v1797_v19 = vsub.f32 %v1789_v12, %v1796_v17 }
0x2615   :  { %v1798_v21 = vmul.f32 1.442695, %v1797_v19 }
0x2617   :  { %5193 = vpow2.f32 %v1798_v21 }
0x2621   :  { %v5194_v37 = vpop.eup %5193 }
0x2622   :  { %v1800_v22 = vsel %vm820_vm5, %v5194_v37, 0.0 }
0x2623   :  { %1801 = vadd.xlane.f32.xlu1 %v1800_v22 }
0x26b0   :  { %v1802_v23 = vpop.xlane.xlu1 %1801 }
0x26b1   :  { %5195 = vrcp.f32 %v1802_v23 }
0x26bb   :  { %v5196_v24 = vpop.eup %5195 }
0x26bc   :  { %v1804_v25 = vmul.f32 %v5196_v24, %v5194_v37 }
0x26be   :  { %v1805_v26 = vpack.c.bf16 %v1804_v25, %v1804_v25 }
0x26c0   :  { %4728 = vmatmul.mubr.msk.bf16.vlgmr.msra.gmra.mrb[0].mxu1 %vm833_vm6, %v1805_v26 }
0x26c1   :  { %4743 = vmatprep.mubr.msk.bf16.mxu1 %vm5373_vm0, %v5372_v1  ;;  %4732 = vmatpush3.bf16.msra.mxu1 %v5181_v28  ;;  %v5205_v28 = vld [vmem:[%s6539_s3] sm:$0xff] (!%p4179_p7)  }
0x26c2   :  { %4733 = vmatprep.subr.bf16.mxu1 %v5372_v1 }
0x26c5   :  { %4734 = vmatpush3.bf16.msra.mxu1 %v5182_v29  ;;  %v5383_v29 = vmov (!%p4179_p7), 0.0  }
0x26c6   :  { %4735 = vmatprep.subr.bf16.mxu1 %v5372_v1 }
0x26c9   :  { %4736 = vmatpush3.bf16.msra.mxu1 %v5183_v8  ;;  %v5206_v8 = vld [vmem:[%s6539_s3 + $0x8] sm:$0xff] (!%p4179_p7)  }
0x26ca   :  { %4737 = vmatprep.subr.bf16.mxu1 %v5372_v1 }
0x26cd   :  { %4738 = vmatpush3.bf16.msra.mxu1 %v5184_v31  ;;  %v5207_v31 = vld [vmem:[%s6539_s3 + $0x10] sm:$0xff] (!%p4179_p7)  }
0x26ce   :  { %4739 = vmatprep.subr.bf16.mxu1 %v5372_v1 }
0x26d1   :  { %4740 = vmatpush3.bf16.msra.mxu1 %v5185_v33  ;;  %v5208_v33 = vld [vmem:[%s6539_s3 + $0x18] sm:$0xff] (!%p4179_p7)  }
0x26d2   :  { %4741 = vmatprep.subr.bf16.mxu1 %v5372_v1 }
0x26d5   :  { %4742 = vmatpush3.bf16.msra.mxu1 %v5186_v30  ;;  %v5211_v30 = vld [vmem:[%s6539_s3 + $0x30] sm:$0xff] (!%p4179_p7)  }
0x2793   :  { %v1843_v20 = vpop.f32.mrb[0].mxu1 }
0x2794   :  { %1850 = vrot.lane.b32.xlu1 %v1843_v20, %s5375_s5  ;;  %v4729_v38 = vpop.f32.mrb[1].mxu1 }
0x2795   :  { %v1846_v39 = vpop.f32.mrb[2].mxu1 }
0x2796   :  { %v4730_v32 = vpop.f32.mrb[3].mxu1 }
0x2798   :  { %1853 = vrot.lane.b32.xlu1 %v5892_v27, %s5376_s10 }
0x2806   :  { %v1851_v40 = vpop.permute.xlu1 %1850 }
0x2807   :  { %v1856_v56 = vsel %vm54_vm1, %v1746_v35, %v1851_v40 }
0x280a   :  { %v1854_v41 = vpop.permute.xlu1 %1853 }
0x280b   :  { %v1857_v42 = vsel %vm96_vm2, %v1856_v56, %v1854_v41 }
0x280c   :  { %v1858_v43 = vpack.c.bf16 %v1857_v42, %v1857_v42 }
0x280e   :  { %4744 = vmatmul.mubr.msk.bf16.vlgmr.msra.gmra.mrb[4].mxu1 %vm945_vm7, %v1858_v43 }
0x28e1   :  { %v1951_v49 = vpop.f32.mrb[4].mxu1 }
0x28e2   :  { %v1952_v50 = vadd.f32 %v4160_v47, %v1951_v49  ;;  %v4745_v51 = vpop.f32.mrb[5].mxu1  ;;  %v5385_v49 = vmov (!%p4179_p7), 1.0|1.0  }
0x28e3   :  { %v1954_v52 = vpop.f32.mrb[6].mxu1 }
0x28e4   :  { %5197 = vtanh.f32 %v1952_v50  ;;  %v4746_v53 = vpop.f32.mrb[7].mxu1  ;;  %v4168_v54 = vmul.f32 -1.442695, %v1952_v50 }
0x28e6   :  { %5199 = vpow2.f32 %v4168_v54 }
0x28ee   :  { %v5198_v27 = vpop.eup %5197 }
0x28ef   :  { %1966 = vrot.lane.b32.xlu1 %v5198_v27, %s5374_s14 }
0x28f0   :  { %v5200_v55 = vpop.eup %5199 }
0x28f1   :  { %v1960_v57 = vadd.f32 1.0, %v5200_v55 }
0x28f3   :  { %5201 = vrcp.f32 %v1960_v57 }
0x28fd   :  { %v5202_v58 = vpop.eup %5201 }
0x28fe   :  { %v1964_v61 = vmul.f32 %v5202_v58, %v5864_v18  ;;  %v5189_v18 = vld [vmem:[%s6544_s8 + $0x10] sm:$0xff]  }
0x28ff   :  { %4752 = vmatpush3.bf16.msra.mxu0 %v5189_v18 }
0x2900   :  { %4753 = vmatprep.subr.bf16.mxu0 %v5372_v1 }
0x2903   :  { %4754 = vmatpush3.bf16.msra.mxu0 %v5190_v4 }
0x2904   :  { %4755 = vmatprep.subr.bf16.mxu0 %v5372_v1 }
0x2907   :  { %4756 = vmatpush3.bf16.msra.mxu0 %v5191_v5 }
0x2908   :  { %4757 = vmatprep.subr.bf16.mxu0 %v5372_v1 }
0x290b   :  { %4758 = vmatpush3.bf16.msra.mxu0 %v5192_v6 }
0x290c   :  { %4763 = vmatprep.subr.bf16.mxu0 (!%p4179_p7), %v5383_v29 }
0x2961   :  { %v1967_v59 = vpop.permute.xlu1 %1966 }
0x2962   :  { %v1969_v60 = vmul.f32 %v5202_v58, %v1967_v59 }
0x2964   :  { %1971 = vrot.lane.b32.xlu1 %v1969_v60, %s5375_s5 }
0x29d6   :  { %v1972_v62 = vpop.permute.xlu1 %1971 }
0x29d7   :  { %v5990_v63 = vadd.f32 %v1972_v62, %v1964_v61 }
0x29d9   :  { %5203 = vtanh.f32 %v5990_v63 }
0x29e3   :  { %v5204_v3 = vpop.eup %5203 }
0x29e4   :  { %1977 = vrot.lane.b32.xlu1 %v5204_v3, %s5374_s14 }
0x29e8   :  { %1986 = vrot.lane.b32.xlu1 %v1746_v35, %s5374_s14  ;;  %v5210_v35 = vld [vmem:[%s6539_s3 + $0x28] sm:$0xff] (!%p4179_p7)  }
0x2a56   :  { %v1978_v7 = vpop.permute.xlu1 %1977 }
0x2a57   :  { %v6018_v9 = vmul.f32 %v5202_v58, %v1978_v7 }
0x2a59   :  { %1982 = vrot.lane.b32.xlu0 %v6018_v9, %s5375_s5 }
0x2a5a   :  { %v1987_v44 = vpop.permute.xlu1 %1986 }
0x2acb   :  { %v1983_v10 = vpop.permute.xlu0 %1982 }
0x2acc   :  { %v1989_v11 = vsel %vm54_vm1, %v1983_v10, %v1851_v40  ;;  %v5212_v40 = vld [vmem:[%s6539_s3 + $0x38] sm:$0xff] (!%p4179_p7)  }
0x2acd   :  { %v1990_v12 = vsel %vm96_vm2, %v1989_v11, %v1987_v44 }
0x2ace   :  { %v1991_v13 = vpack.c.bf16 %v1990_v12, %v1990_v12 }
0x2ad0   :  { %4760 = vmatmul.mubr.msk.bf16.vlgmr.msra.gmra.mrb[4].mxu0 %vm945_vm7, %v1991_v13 }
0x2ad1   :  { %4764 = vmatpush3.bf16.msra.mxu0 (!%p4179_p7), %v5205_v28  ;;  %4779 = vmatprep.mubr.msk.bf16.mxu0 (!%p4179_p7), %vm5384_vm14, %v5383_v29 }
0x2ad2   :  { %4765 = vmatprep.subr.bf16.mxu0 (!%p4179_p7), %v5383_v29 }
0x2ad5   :  { %4766 = vmatpush3.bf16.msra.mxu0 (!%p4179_p7), %v5206_v8 }
0x2ad6   :  { %4767 = vmatprep.subr.bf16.mxu0 (!%p4179_p7), %v5383_v29 }
0x2ad9   :  { %4768 = vmatpush3.bf16.msra.mxu0 (!%p4179_p7), %v5207_v31 }
0x2ada   :  { %4769 = vmatprep.subr.bf16.mxu0 (!%p4179_p7), %v5383_v29 }
0x2add   :  { %4770 = vmatpush3.bf16.msra.mxu0 (!%p4179_p7), %v5208_v33 }
0x2ade   :  { %4771 = vmatprep.subr.bf16.mxu0 (!%p4179_p7), %v5383_v29 }
0x2ae1   :  { %4772 = vmatpush3.bf16.msra.mxu0 (!%p4179_p7), %v5209_v34 }
0x2ae2   :  { %4773 = vmatprep.subr.bf16.mxu0 (!%p4179_p7), %v5383_v29 }
0x2ae5   :  { %4774 = vmatpush3.bf16.msra.mxu0 (!%p4179_p7), %v5210_v35 }
0x2ae6   :  { %4775 = vmatprep.subr.bf16.mxu0 (!%p4179_p7), %v5383_v29 }
0x2ae9   :  { %4776 = vmatpush3.bf16.msra.mxu0 (!%p4179_p7), %v5211_v30 }
0x2aea   :  { %4777 = vmatprep.subr.bf16.mxu0 (!%p4179_p7), %v5383_v29 }
0x2aed   :  { %4778 = vmatpush3.bf16.msra.mxu0 (!%p4179_p7), %v5212_v40 }
0x2ba0   :  { %2099 = sbr.rel (%p4179_p7) target bundleno = 11831 (0x2e37), region = 61 }
0x2ba3   :  { %v2084_v15 = vpop.f32.mrb[4].mxu0 }
0x2ba4   :  { %v2085_v16 = vadd.f32 %v4169_v14, %v2084_v15  ;;  %v4761_v17 = vpop.f32.mrb[5].mxu0 }
0x2ba5   :  { %v2087_v19 = vpop.f32.mrb[6].mxu0 }
0x2ba6   :  { %2091 = vst [vmem:[#allocation7 + $0x6] sm:$0x3] %v2085_v16  ;;  %v4762_v21 = vpop.f32.mrb[7].mxu0  ;;  %v2101_v37 = vsel (!%p4179_p7), %vm2100_vm11, %v2085_v16, -inf }
0x2ba7   :  { %2102 = vmax.xlane.f32.xlu0 %v2101_v37 }
0x2c34   :  { %v2103_v22 = vpop.xlane.xlu0 %2102 }
0x2c35   :  { %vm2104_vm12 = vcmp.eq.f32.partialorder %v2085_v16, %v2103_v22 }
0x2c36   :  { %v2105_v23 = vsel %vm2104_vm12, %v5666_v36, 128 }
0x2c37   :  { %v2106_v24 = vsel %vm2100_vm11, %v2105_v23, 2147483647 }
0x2c38   :  { %v2108_v25 = vshra.s32 %v2106_v24, 16  ;;  %v2107_v20 = vand.u32 65535, %v2106_v24 }
0x2c3a   :  { %v2110_v26 = vcvt.s32.f32 %v2108_v25  ;;  %v2109_v39 = vcvt.s32.f32 %v2107_v20 }
0x2c3c   :  { %2111 = vmin.xlane.f32.xlu0 %v2110_v26 }
0x2cc9   :  { %v2112_v38 = vpop.xlane.xlu0 %2111 }
0x2cca   :  { %vm2113_vm13 = vcmp.eq.f32.partialorder %v2110_v26, %v2112_v38  ;;  %v2118_v41 = vcvt.f32.s32 %v2112_v38 }
0x2ccb   :  { %v2114_v32 = vsel %vm2113_vm13, %v2109_v39, inf }
0x2ccc   :  { %2115 = vmin.xlane.f32.xlu1 %v2114_v32  ;;  %v2119_v42 = vshll.u32 %v2118_v41, 16 }
0x2d59   :  { %v2116_v56 = vpop.xlane.xlu1 %2115 }
0x2d5a   :  { %v2117_v43 = vcvt.f32.s32 %v2116_v56 }
0x2d5c   :  { %v2120_v47 = vadd.s32 %v2119_v42, %v2117_v43 }
0x2d5e   :  { %vm2121_vm15 = vcmp.eq.s32.totalorder %v5666_v36, %v2120_v47 }
0x2d5f   :  { %vm4189_vm4 = vmpackc.low %vm2121_vm15, %vm2121_vm15 }
0x2d60   :  { %4780 = vmatmul.mubr.msk.bf16.vlgmr.msra.gmra.mrb[0].mxu0 %vm4189_vm4, %v5385_v49 }
0x2e33   :  { %v2223_v50 = vpop.f32.mrb[0].mxu0 }
0x2e34   :  { %2229 = vst.msk [vmem:[#allocation3] sm:$0x3] %vm168_vm3, %v2223_v50  ;;  %v4781_v51 = vpop.f32.mrb[1].mxu0 }
0x2e35   :  { %v2226_v52 = vpop.f32.mrb[2].mxu0 }
0x2e36   :  { %v4782_v53 = vpop.f32.mrb[3].mxu0 }
0x2e37 PF:  { %v2231_v27 = vpack.c.bf16 %v6018_v9, %v6018_v9  ;;  %4783 = vmatprep.subr.bf16.mxu0 %v5372_v1  ;;  %4785 = vmatprep.mubr.msk.bf16.mxu0 %vm5373_vm0, %v5372_v1  ;;  %v5213_v44 = vld [vmem:[%s6542_s6] sm:$0xff]   ;;  %v5214_v10 = vld [vmem:[%s6542_s6 + $0x8] sm:$0xff]   ;;  %v5215_v11 = vld [vmem:[%s6542_s6 + $0x10] sm:$0xff]   ;;  %s4211_s29 = sld [smem:[#allocation4 + $0x4]] }
0x2e38   :  { %4784 = vmatpush3.bf16.xpose.msra.mxu0 %v5674_v45  ;;  %4789 = vmatprep.subr.bf16.mxu1 %v5372_v1  ;;  %v5216_v12 = vld [vmem:[%s6542_s6 + $0x18] sm:$0xff]   ;;  %v5217_v13 = vld [vmem:[%s6542_s6 + $0x20] sm:$0xff]   ;;  %v4210_v14 = vld [vmem:[%s6538_s2 + $0x8] sm:$0x3] }
0x2e39   :  { %2233 = vrot.lane.b32.xlu0 %v2231_v27, %s5375_s5  ;;  %4790 = vmatpush3.bf16.msra.mxu1 %v5676_v46  ;;  %v5218_v16 = vld [vmem:[%s6542_s6 + $0x28] sm:$0xff]   ;;  %v4193_v28 = vld [vmem:[%s6543_s7] ss:$0 sm:$0xff]  ;;  %v5222_v49 = vld [vmem:[%s6544_s8 + $0x18] sm:$0xff]  }
0x2e3a   :  { %4791 = vmatprep.mubr.msk.bf16.mxu1 %vm5373_vm0, %v5372_v1  ;;  %4795 = vmatprep.subr.bf16.mxu1 %v5372_v1  ;;  %v5219_v42 = vld [vmem:[%s6544_s8] sm:$0xff]   ;;  %v5220_v43 = vld [vmem:[%s6544_s8 + $0x8] sm:$0xff]  }
0x2e3b   :  { %4811 = vmatprep.subr.bf16.mxu0 %v5372_v1  ;;  %v2230_v15 = vld [vmem:[#allocation3] sm:$0x3]  ;;  %v5223_v50 = vld [vmem:[%s6544_s8 + $0x20] sm:$0xff]   ;;  %v5224_v51 = vld [vmem:[%s6544_s8 + $0x28] sm:$0xff]  }
0x2e3c   :  { %2578 = vst.msk [vmem:[#allocation3] sm:$0x3] %vm168_vm3, %v4210_v14 }
0x2e3d   :  { %p4212_p8 = scmp.ne.s32.totalorder %s4211_s29, 0 }
0x2e3e   :  { %vm2584_vm8 = vcmask (!%p4212_p8), 1041408   ;;  %v5241_v14 = vld [vmem:[%s6539_s3 + $0x20] sm:$0xff] (!%p4212_p8)   ;;  %vm5387_vm11 = vmmov (!%p4212_p8), 0  }
0x2eab   :  { %v2234_v54 = vpop.permute.xlu0 %2233 }
0x2eac   :  { %4786 = vmatmul.mubr.msk.bf16.vlgmr.msra.gmra.mrb[0].mxu0 %vm54_vm1, %v2234_v54 }
0x2ead   :  { %4823 = vmatprep.mubr.msk.bf16.mxu0 %vm5373_vm0, %v5372_v1  ;;  %4812 = vmatpush3.bf16.msra.mxu0 %v5219_v42 }
0x2eae   :  { %4813 = vmatprep.subr.bf16.mxu0 %v5372_v1 }
0x2eb1   :  { %4814 = vmatpush3.bf16.msra.mxu0 %v5220_v43 }
0x2eb2   :  { %4815 = vmatprep.subr.bf16.mxu0 %v5372_v1 }
0x2f7f   :  { %v2272_v55 = vpop.f32.mrb[0].mxu0 }
0x2f80   :  { %v2273_v57 = vadd.f32 %v2272_v55, %v5688_v48  ;;  %v4787_v58 = vpop.f32.mrb[1].mxu0 }
0x2f81   :  { %v2275_v59 = vpop.f32.mrb[2].mxu0 }
0x2f82   :  { %v4788_v60 = vpop.f32.mrb[3].mxu0  ;;  %v2278_v61 = vsel %vm820_vm5, %v2273_v57, -inf  ;;  %v4202_v59 = vld [vmem:[%s6545_s9] ss:$0 sm:$0xff] }
0x2f83   :  { %2279 = vmax.xlane.f32.xlu0 %v2278_v61 }
0x3010   :  { %v2280_v62 = vpop.xlane.xlu0 %2279 }
0x3011   :  { %v2281_v0 = vsub.f32 %v2273_v57, %v2280_v62 }
0x3013   :  { %v2282_v2 = vmul.f32 1.442695, %v2281_v0 }
0x3015   :  { %5225 = vpow2.f32 %v2282_v2 }
0x301f   :  { %v5226_v18 = vpop.eup %5225 }
0x3020   :  { %v2284_v3 = vsel %vm820_vm5, %v5226_v18, 0.0 }
0x3021   :  { %2285 = vadd.xlane.f32.xlu1 %v2284_v3 }
0x30ae   :  { %v2286_v4 = vpop.xlane.xlu1 %2285 }
0x30af   :  { %5227 = vrcp.f32 %v2286_v4 }
0x30b9   :  { %v5228_v5 = vpop.eup %5227 }
0x30ba   :  { %v2288_v6 = vmul.f32 %v5228_v5, %v5226_v18 }
0x30bc   :  { %v2289_v7 = vpack.c.bf16 %v2288_v6, %v2288_v6 }
0x30be   :  { %4792 = vmatmul.mubr.msk.bf16.vlgmr.msra.gmra.mrb[0].mxu1 %vm833_vm6, %v2289_v7 }
0x30bf   :  { %4807 = vmatprep.mubr.msk.bf16.mxu1 %vm5373_vm0, %v5372_v1  ;;  %4796 = vmatpush3.bf16.msra.mxu1 %v5213_v44  ;;  %v5237_v44 = vld [vmem:[%s6539_s3] sm:$0xff] (!%p4212_p8)  }
0x30c0   :  { %4797 = vmatprep.subr.bf16.mxu1 %v5372_v1 }
0x30c3   :  { %4798 = vmatpush3.bf16.msra.mxu1 %v5214_v10  ;;  %v5386_v10 = vmov (!%p4212_p8), 0.0  }
0x30c4   :  { %4799 = vmatprep.subr.bf16.mxu1 %v5372_v1 }
0x30c7   :  { %4800 = vmatpush3.bf16.msra.mxu1 %v5215_v11  ;;  %v5238_v11 = vld [vmem:[%s6539_s3 + $0x8] sm:$0xff] (!%p4212_p8)  }
0x30c8   :  { %4801 = vmatprep.subr.bf16.mxu1 %v5372_v1 }
0x30cb   :  { %4802 = vmatpush3.bf16.msra.mxu1 %v5216_v12  ;;  %v5239_v12 = vld [vmem:[%s6539_s3 + $0x10] sm:$0xff] (!%p4212_p8)  }
0x30cc   :  { %4803 = vmatprep.subr.bf16.mxu1 %v5372_v1 }
0x30cf   :  { %4804 = vmatpush3.bf16.msra.mxu1 %v5217_v13  ;;  %v5240_v13 = vld [vmem:[%s6539_s3 + $0x18] sm:$0xff] (!%p4212_p8)  }
0x30d0   :  { %4805 = vmatprep.subr.bf16.mxu1 %v5372_v1 }
0x30d3   :  { %4806 = vmatpush3.bf16.msra.mxu1 %v5218_v16  ;;  %v5243_v16 = vld [vmem:[%s6539_s3 + $0x30] sm:$0xff] (!%p4212_p8)  }
0x3191   :  { %v2327_v17 = vpop.f32.mrb[0].mxu1 }
0x3192   :  { %2334 = vrot.lane.b32.xlu1 %v2327_v17, %s5375_s5  ;;  %v4793_v19 = vpop.f32.mrb[1].mxu1 }
0x3193   :  { %v2330_v21 = vpop.f32.mrb[2].mxu1 }
0x3194   :  { %v4794_v37 = vpop.f32.mrb[3].mxu1 }
0x3196   :  { %2337 = vrot.lane.b32.xlu1 %v6018_v9, %s5376_s10 }
0x3204   :  { %v2335_v22 = vpop.permute.xlu1 %2334 }
0x3205   :  { %v2340_v24 = vsel %vm54_vm1, %v2230_v15, %v2335_v22 }
0x3208   :  { %v2338_v23 = vpop.permute.xlu1 %2337 }
0x3209   :  { %v2341_v25 = vsel %vm96_vm2, %v2340_v24, %v2338_v23 }
0x320a   :  { %v2342_v26 = vpack.c.bf16 %v2341_v25, %v2341_v25 }
0x320c   :  { %4808 = vmatmul.mubr.msk.bf16.vlgmr.msra.gmra.mrb[4].mxu1 %vm945_vm7, %v2342_v26 }
0x32df   :  { %v2435_v29 = vpop.f32.mrb[4].mxu1 }
0x32e0   :  { %v2436_v8 = vadd.f32 %v4193_v28, %v2435_v29  ;;  %v4809_v31 = vpop.f32.mrb[5].mxu1  ;;  %v5388_v29 = vmov (!%p4212_p8), 1.0|1.0  }
0x32e1   :  { %v2438_v33 = vpop.f32.mrb[6].mxu1 }
0x32e2   :  { %5229 = vtanh.f32 %v2436_v8  ;;  %v4810_v34 = vpop.f32.mrb[7].mxu1  ;;  %v4201_v35 = vmul.f32 -1.442695, %v2436_v8 }
0x32e4   :  { %5231 = vpow2.f32 %v4201_v35 }
0x32ec   :  { %v5230_v9 = vpop.eup %5229 }
0x32ed   :  { %2450 = vrot.lane.b32.xlu1 %v5230_v9, %s5374_s14 }
0x32ee   :  { %v5232_v30 = vpop.eup %5231 }
0x32ef   :  { %v2444_v20 = vadd.f32 1.0, %v5232_v30 }
0x32f1   :  { %5233 = vrcp.f32 %v2444_v20 }
0x32fb   :  { %v5234_v38 = vpop.eup %5233 }
0x32fc   :  { %v2448_v40 = vmul.f32 %v5234_v38, %v5990_v63  ;;  %v5221_v63 = vld [vmem:[%s6544_s8 + $0x10] sm:$0xff]  }
0x32fd   :  { %4816 = vmatpush3.bf16.msra.mxu0 %v5221_v63 }
0x32fe   :  { %4817 = vmatprep.subr.bf16.mxu0 %v5372_v1 }
0x3301   :  { %4818 = vmatpush3.bf16.msra.mxu0 %v5222_v49 }
0x3302   :  { %4819 = vmatprep.subr.bf16.mxu0 %v5372_v1 }
0x3305   :  { %4820 = vmatpush3.bf16.msra.mxu0 %v5223_v50 }
0x3306   :  { %4821 = vmatprep.subr.bf16.mxu0 %v5372_v1 }
0x3309   :  { %4822 = vmatpush3.bf16.msra.mxu0 %v5224_v51 }
0x330a   :  { %4827 = vmatprep.subr.bf16.mxu0 (!%p4212_p8), %v5386_v10 }
0x335f   :  { %v2451_v39 = vpop.permute.xlu1 %2450 }
0x3360   :  { %v2453_v32 = vmul.f32 %v5234_v38, %v2451_v39 }
0x3362   :  { %2455 = vrot.lane.b32.xlu1 %v2453_v32, %s5375_s5 }
0x33d4   :  { %v2456_v41 = vpop.permute.xlu1 %2455 }
0x33d5   :  { %v6116_v56 = vadd.f32 %v2456_v41, %v2448_v40 }
0x33d7   :  { %5235 = vtanh.f32 %v6116_v56 }
0x33e1   :  { %v5236_v47 = vpop.eup %5235 }
0x33e2   :  { %2461 = vrot.lane.b32.xlu1 %v5236_v47, %s5374_s14 }
0x33e6   :  { %2470 = vrot.lane.b32.xlu1 %v2230_v15, %s5374_s14  ;;  %v5242_v15 = vld [vmem:[%s6539_s3 + $0x28] sm:$0xff] (!%p4212_p8)  }
0x3454   :  { %v2462_v52 = vpop.permute.xlu1 %2461 }
0x3455   :  { %v6144_v53 = vmul.f32 %v5234_v38, %v2462_v52 }
0x3457   :  { %2466 = vrot.lane.b32.xlu0 %v6144_v53, %s5375_s5 }
0x3458   :  { %v2471_v27 = vpop.permute.xlu1 %2470 }
0x34c9   :  { %v2467_v54 = vpop.permute.xlu0 %2466 }
0x34ca   :  { %v2473_v55 = vsel %vm54_vm1, %v2467_v54, %v2335_v22  ;;  %v5244_v22 = vld [vmem:[%s6539_s3 + $0x38] sm:$0xff] (!%p4212_p8)  }
0x34cb   :  { %v2474_v57 = vsel %vm96_vm2, %v2473_v55, %v2471_v27 }
0x34cc   :  { %v2475_v58 = vpack.c.bf16 %v2474_v57, %v2474_v57 }
0x34ce   :  { %4824 = vmatmul.mubr.msk.bf16.vlgmr.msra.gmra.mrb[4].mxu0 %vm945_vm7, %v2475_v58 }
0x34cf   :  { %4828 = vmatpush3.bf16.msra.mxu0 (!%p4212_p8), %v5237_v44  ;;  %4843 = vmatprep.mubr.msk.bf16.mxu0 (!%p4212_p8), %vm5387_vm11, %v5386_v10 }
0x34d0   :  { %4829 = vmatprep.subr.bf16.mxu0 (!%p4212_p8), %v5386_v10 }
0x34d3   :  { %4830 = vmatpush3.bf16.msra.mxu0 (!%p4212_p8), %v5238_v11 }
0x34d4   :  { %4831 = vmatprep.subr.bf16.mxu0 (!%p4212_p8), %v5386_v10 }
0x34d7   :  { %4832 = vmatpush3.bf16.msra.mxu0 (!%p4212_p8), %v5239_v12 }
0x34d8   :  { %4833 = vmatprep.subr.bf16.mxu0 (!%p4212_p8), %v5386_v10 }
0x34db   :  { %4834 = vmatpush3.bf16.msra.mxu0 (!%p4212_p8), %v5240_v13 }
0x34dc   :  { %4835 = vmatprep.subr.bf16.mxu0 (!%p4212_p8), %v5386_v10 }
0x34df   :  { %4836 = vmatpush3.bf16.msra.mxu0 (!%p4212_p8), %v5241_v14 }
0x34e0   :  { %4837 = vmatprep.subr.bf16.mxu0 (!%p4212_p8), %v5386_v10 }
0x34e3   :  { %4838 = vmatpush3.bf16.msra.mxu0 (!%p4212_p8), %v5242_v15 }
0x34e4   :  { %4839 = vmatprep.subr.bf16.mxu0 (!%p4212_p8), %v5386_v10 }
0x34e7   :  { %4840 = vmatpush3.bf16.msra.mxu0 (!%p4212_p8), %v5243_v16 }
0x34e8   :  { %4841 = vmatprep.subr.bf16.mxu0 (!%p4212_p8), %v5386_v10 }
0x34eb   :  { %4842 = vmatpush3.bf16.msra.mxu0 (!%p4212_p8), %v5244_v22 }
0x359e   :  { %2583 = sbr.rel (%p4212_p8) target bundleno = 14389 (0x3835), region = 65 }
0x35a1   :  { %v2568_v60 = vpop.f32.mrb[4].mxu0 }
0x35a2   :  { %v2569_v61 = vadd.f32 %v4202_v59, %v2568_v60  ;;  %v4825_v62 = vpop.f32.mrb[5].mxu0 }
0x35a3   :  { %v2571_v0 = vpop.f32.mrb[6].mxu0 }
0x35a4   :  { %2575 = vst [vmem:[#allocation7 + $0x8] sm:$0x3] %v2569_v61  ;;  %v4826_v2 = vpop.f32.mrb[7].mxu0  ;;  %v2585_v18 = vsel (!%p4212_p8), %vm2584_vm8, %v2569_v61, -inf }
0x35a5   :  { %2586 = vmax.xlane.f32.xlu0 %v2585_v18 }
0x3632   :  { %v2587_v3 = vpop.xlane.xlu0 %2586 }
0x3633   :  { %vm2588_vm9 = vcmp.eq.f32.partialorder %v2569_v61, %v2587_v3 }
0x3634   :  { %v2589_v4 = vsel %vm2588_vm9, %v5666_v36, 128 }
0x3635   :  { %v2590_v5 = vsel %vm2584_vm8, %v2589_v4, 2147483647 }
0x3636   :  { %v2592_v6 = vshra.s32 %v2590_v5, 16  ;;  %v2591_v17 = vand.u32 65535, %v2590_v5 }
0x3638   :  { %v2594_v7 = vcvt.s32.f32 %v2592_v6  ;;  %v2593_v21 = vcvt.s32.f32 %v2591_v17 }
0x363a   :  { %2595 = vmin.xlane.f32.xlu0 %v2594_v7 }
0x36c7   :  { %v2596_v19 = vpop.xlane.xlu0 %2595 }
0x36c8   :  { %vm2597_vm10 = vcmp.eq.f32.partialorder %v2594_v7, %v2596_v19  ;;  %v2602_v23 = vcvt.f32.s32 %v2596_v19 }
0x36c9   :  { %v2598_v37 = vsel %vm2597_vm10, %v2593_v21, inf }
0x36ca   :  { %2599 = vmin.xlane.f32.xlu1 %v2598_v37  ;;  %v2603_v25 = vshll.u32 %v2602_v23, 16 }
0x3757   :  { %v2600_v24 = vpop.xlane.xlu1 %2599 }
0x3758   :  { %v2601_v26 = vcvt.f32.s32 %v2600_v24 }
0x375a   :  { %v2604_v28 = vadd.s32 %v2603_v25, %v2601_v26 }
0x375c   :  { %vm2605_vm12 = vcmp.eq.s32.totalorder %v5666_v36, %v2604_v28 }
0x375d   :  { %vm4222_vm13 = vmpackc.low %vm2605_vm12, %vm2605_vm12 }
0x375e   :  { %4844 = vmatmul.mubr.msk.bf16.vlgmr.msra.gmra.mrb[0].mxu0 %vm4222_vm13, %v5388_v29 }
0x3831   :  { %v2707_v8 = vpop.f32.mrb[0].mxu0 }
0x3832   :  { %2713 = vst.msk [vmem:[#allocation3] sm:$0x3] %vm168_vm3, %v2707_v8  ;;  %v4845_v31 = vpop.f32.mrb[1].mxu0 }
0x3833   :  { %v2710_v33 = vpop.f32.mrb[2].mxu0 }
0x3834   :  { %v4846_v34 = vpop.f32.mrb[3].mxu0 }
0x3835 PF:  { %v2715_v9 = vpack.c.bf16 %v6144_v53, %v6144_v53  ;;  %4847 = vmatprep.subr.bf16.mxu0 %v5372_v1  ;;  %4849 = vmatprep.mubr.msk.bf16.mxu0 %vm5373_vm0, %v5372_v1  ;;  %v5245_v27 = vld [vmem:[%s6542_s6] sm:$0xff]   ;;  %v5246_v54 = vld [vmem:[%s6542_s6 + $0x8] sm:$0xff]   ;;  %v5247_v55 = vld [vmem:[%s6542_s6 + $0x10] sm:$0xff]   ;;  %s4244_s16 = sld [smem:[#allocation4 + $0x5]] }
0x3836   :  { %4848 = vmatpush3.bf16.xpose.msra.mxu0 %v5674_v45  ;;  %4853 = vmatprep.subr.bf16.mxu1 %v5372_v1  ;;  %v5248_v57 = vld [vmem:[%s6542_s6 + $0x18] sm:$0xff]   ;;  %v5249_v58 = vld [vmem:[%s6542_s6 + $0x20] sm:$0xff]   ;;  %v4243_v59 = vld [vmem:[%s6538_s2 + $0xa] sm:$0x3] }
0x3837   :  { %2717 = vrot.lane.b32.xlu0 %v2715_v9, %s5375_s5  ;;  %4854 = vmatpush3.bf16.msra.mxu1 %v5676_v46  ;;  %v5250_v61 = vld [vmem:[%s6542_s6 + $0x28] sm:$0xff]   ;;  %v4226_v44 = vld [vmem:[%s6543_s7] ss:$0 sm:$0xff]  ;;  %v5254_v29 = vld [vmem:[%s6544_s8 + $0x18] sm:$0xff]  }
0x3838   :  { %4855 = vmatprep.mubr.msk.bf16.mxu1 %vm5373_vm0, %v5372_v1  ;;  %4859 = vmatprep.subr.bf16.mxu1 %v5372_v1  ;;  %v5251_v25 = vld [vmem:[%s6544_s8] sm:$0xff]   ;;  %v5252_v26 = vld [vmem:[%s6544_s8 + $0x8] sm:$0xff]  }
0x3839   :  { %4875 = vmatprep.subr.bf16.mxu0 %v5372_v1  ;;  %v2714_v60 = vld [vmem:[#allocation3] sm:$0x3]  ;;  %v5255_v8 = vld [vmem:[%s6544_s8 + $0x20] sm:$0xff]   ;;  %v5256_v31 = vld [vmem:[%s6544_s8 + $0x28] sm:$0xff]  }
0x383a   :  { %3062 = vst.msk [vmem:[#allocation3] sm:$0x3] %vm168_vm3, %v4243_v59 }
0x383b   :  { %p4245_p9 = scmp.ne.s32.totalorder %s4244_s16, 0 }
0x383c   :  { %vm3068_vm14 = vcmask (!%p4245_p9), 1041408   ;;  %v5273_v59 = vld [vmem:[%s6539_s3 + $0x20] sm:$0xff] (!%p4245_p9)   ;;  %vm5390_vm8 = vmmov (!%p4245_p9), 0  }
0x38a9   :  { %v2718_v35 = vpop.permute.xlu0 %2717 }
0x38aa   :  { %4850 = vmatmul.mubr.msk.bf16.vlgmr.msra.gmra.mrb[0].mxu0 %vm54_vm1, %v2718_v35 }
0x38ab   :  { %4887 = vmatprep.mubr.msk.bf16.mxu0 %vm5373_vm0, %v5372_v1  ;;  %4876 = vmatpush3.bf16.msra.mxu0 %v5251_v25 }
0x38ac   :  { %4877 = vmatprep.subr.bf16.mxu0 %v5372_v1 }
0x38af   :  { %4878 = vmatpush3.bf16.msra.mxu0 %v5252_v26 }
0x38b0   :  { %4879 = vmatprep.subr.bf16.mxu0 %v5372_v1 }
0x397d   :  { %v2756_v30 = vpop.f32.mrb[0].mxu0 }
0x397e   :  { %v2757_v20 = vadd.f32 %v2756_v30, %v5688_v48  ;;  %v4851_v38 = vpop.f32.mrb[1].mxu0 }
0x397f   :  { %v2759_v39 = vpop.f32.mrb[2].mxu0 }
0x3980   :  { %v4852_v32 = vpop.f32.mrb[3].mxu0  ;;  %v2762_v40 = vsel %vm820_vm5, %v2757_v20, -inf  ;;  %v4235_v39 = vld [vmem:[%s6545_s9] ss:$0 sm:$0xff] }
0x3981   :  { %2763 = vmax.xlane.f32.xlu0 %v2762_v40 }
0x3a0e   :  { %v2764_v41 = vpop.xlane.xlu0 %2763 }
0x3a0f   :  { %v2765_v42 = vsub.f32 %v2757_v20, %v2764_v41 }
0x3a11   :  { %v2766_v43 = vmul.f32 1.442695, %v2765_v42 }
0x3a13   :  { %5257 = vpow2.f32 %v2766_v43 }
0x3a1d   :  { %v5258_v63 = vpop.eup %5257 }
0x3a1e   :  { %v2768_v47 = vsel %vm820_vm5, %v5258_v63, 0.0 }
0x3a1f   :  { %2769 = vadd.xlane.f32.xlu1 %v2768_v47 }
0x3aac   :  { %v2770_v49 = vpop.xlane.xlu1 %2769 }
0x3aad   :  { %5259 = vrcp.f32 %v2770_v49 }
0x3ab7   :  { %v5260_v50 = vpop.eup %5259 }
0x3ab8   :  { %v2772_v51 = vmul.f32 %v5260_v50, %v5258_v63 }
0x3aba   :  { %v2773_v52 = vpack.c.bf16 %v2772_v51, %v2772_v51 }
0x3abc   :  { %4856 = vmatmul.mubr.msk.bf16.vlgmr.msra.gmra.mrb[0].mxu1 %vm833_vm6, %v2773_v52 }
0x3abd   :  { %4871 = vmatprep.mubr.msk.bf16.mxu1 %vm5373_vm0, %v5372_v1  ;;  %4860 = vmatpush3.bf16.msra.mxu1 %v5245_v27  ;;  %v5269_v27 = vld [vmem:[%s6539_s3] sm:$0xff] (!%p4245_p9)  }
0x3abe   :  { %4861 = vmatprep.subr.bf16.mxu1 %v5372_v1 }
0x3ac1   :  { %4862 = vmatpush3.bf16.msra.mxu1 %v5246_v54  ;;  %v5389_v54 = vmov (!%p4245_p9), 0.0  }
0x3ac2   :  { %4863 = vmatprep.subr.bf16.mxu1 %v5372_v1 }
0x3ac5   :  { %4864 = vmatpush3.bf16.msra.mxu1 %v5247_v55  ;;  %v5270_v55 = vld [vmem:[%s6539_s3 + $0x8] sm:$0xff] (!%p4245_p9)  }
0x3ac6   :  { %4865 = vmatprep.subr.bf16.mxu1 %v5372_v1 }
0x3ac9   :  { %4866 = vmatpush3.bf16.msra.mxu1 %v5248_v57  ;;  %v5271_v57 = vld [vmem:[%s6539_s3 + $0x10] sm:$0xff] (!%p4245_p9)  }
0x3aca   :  { %4867 = vmatprep.subr.bf16.mxu1 %v5372_v1 }
0x3acd   :  { %4868 = vmatpush3.bf16.msra.mxu1 %v5249_v58  ;;  %v5272_v58 = vld [vmem:[%s6539_s3 + $0x18] sm:$0xff] (!%p4245_p9)  }
0x3ace   :  { %4869 = vmatprep.subr.bf16.mxu1 %v5372_v1 }
0x3ad1   :  { %4870 = vmatpush3.bf16.msra.mxu1 %v5250_v61  ;;  %v5275_v61 = vld [vmem:[%s6539_s3 + $0x30] sm:$0xff] (!%p4245_p9)  }
0x3b8f   :  { %v2811_v62 = vpop.f32.mrb[0].mxu1 }
0x3b90   :  { %2818 = vrot.lane.b32.xlu1 %v2811_v62, %s5375_s5  ;;  %v4857_v0 = vpop.f32.mrb[1].mxu1 }
0x3b91   :  { %v2814_v2 = vpop.f32.mrb[2].mxu1 }
0x3b92   :  { %v4858_v18 = vpop.f32.mrb[3].mxu1 }
0x3b94   :  { %2821 = vrot.lane.b32.xlu1 %v6144_v53, %s5376_s10 }
0x3c02   :  { %v2819_v3 = vpop.permute.xlu1 %2818 }
0x3c03   :  { %v2824_v5 = vsel %vm54_vm1, %v2714_v60, %v2819_v3 }
0x3c06   :  { %v2822_v4 = vpop.permute.xlu1 %2821 }
0x3c07   :  { %v2825_v6 = vsel %vm96_vm2, %v2824_v5, %v2822_v4 }
0x3c08   :  { %v2826_v7 = vpack.c.bf16 %v2825_v6, %v2825_v6 }
0x3c0a   :  { %4872 = vmatmul.mubr.msk.bf16.vlgmr.msra.gmra.mrb[4].mxu1 %vm945_vm7, %v2826_v7 }
0x3cdd   :  { %v2919_v10 = vpop.f32.mrb[4].mxu1 }
0x3cde   :  { %v2920_v11 = vadd.f32 %v4226_v44, %v2919_v10  ;;  %v4873_v12 = vpop.f32.mrb[5].mxu1  ;;  %v5391_v10 = vmov (!%p4245_p9), 1.0|1.0  }
0x3cdf   :  { %v2922_v13 = vpop.f32.mrb[6].mxu1 }
0x3ce0   :  { %5261 = vtanh.f32 %v2920_v11  ;;  %v4874_v14 = vpop.f32.mrb[7].mxu1  ;;  %v4234_v15 = vmul.f32 -1.442695, %v2920_v11 }
0x3ce2   :  { %5263 = vpow2.f32 %v4234_v15 }
0x3cea   :  { %v5262_v53 = vpop.eup %5261 }
0x3ceb   :  { %2934 = vrot.lane.b32.xlu1 %v5262_v53, %s5374_s14 }
0x3cec   :  { %v5264_v16 = vpop.eup %5263 }
0x3ced   :  { %v2928_v17 = vadd.f32 1.0, %v5264_v16 }
0x3cef   :  { %5265 = vrcp.f32 %v2928_v17 }
0x3cf9   :  { %v5266_v19 = vpop.eup %5265 }
0x3cfa   :  { %v2932_v22 = vmul.f32 %v5266_v19, %v6116_v56  ;;  %v5253_v56 = vld [vmem:[%s6544_s8 + $0x10] sm:$0xff]  }
0x3cfb   :  { %4880 = vmatpush3.bf16.msra.mxu0 %v5253_v56 }
0x3cfc   :  { %4881 = vmatprep.subr.bf16.mxu0 %v5372_v1 }
0x3cff   :  { %4882 = vmatpush3.bf16.msra.mxu0 %v5254_v29 }
0x3d00   :  { %4883 = vmatprep.subr.bf16.mxu0 %v5372_v1 }
0x3d03   :  { %4884 = vmatpush3.bf16.msra.mxu0 %v5255_v8 }
0x3d04   :  { %4885 = vmatprep.subr.bf16.mxu0 %v5372_v1 }
0x3d07   :  { %4886 = vmatpush3.bf16.msra.mxu0 %v5256_v31 }
0x3d08   :  { %4891 = vmatprep.subr.bf16.mxu0 (!%p4245_p9), %v5389_v54 }
0x3d5d   :  { %v2935_v21 = vpop.permute.xlu1 %2934 }
0x3d5e   :  { %v2937_v37 = vmul.f32 %v5266_v19, %v2935_v21 }
0x3d60   :  { %2939 = vrot.lane.b32.xlu1 %v2937_v37, %s5375_s5 }
0x3dd2   :  { %v2940_v23 = vpop.permute.xlu1 %2939 }
0x3dd3   :  { %v6242_v24 = vadd.f32 %v2940_v23, %v2932_v22 }
0x3dd5   :  { %5267 = vtanh.f32 %v6242_v24 }
0x3ddf   :  { %v5268_v28 = vpop.eup %5267 }
0x3de0   :  { %2945 = vrot.lane.b32.xlu1 %v5268_v28, %s5374_s14 }
0x3de4   :  { %2954 = vrot.lane.b32.xlu1 %v2714_v60, %s5374_s14  ;;  %v5274_v60 = vld [vmem:[%s6539_s3 + $0x28] sm:$0xff] (!%p4245_p9)  }
0x3e52   :  { %v2946_v33 = vpop.permute.xlu1 %2945 }
0x3e53   :  { %v6270_v34 = vmul.f32 %v5266_v19, %v2946_v33 }
0x3e55   :  { %2950 = vrot.lane.b32.xlu0 %v6270_v34, %s5375_s5 }
0x3e56   :  { %v2955_v9 = vpop.permute.xlu1 %2954 }
0x3ec7   :  { %v2951_v35 = vpop.permute.xlu0 %2950 }
0x3ec8   :  { %v2957_v30 = vsel %vm54_vm1, %v2951_v35, %v2819_v3  ;;  %v5276_v3 = vld [vmem:[%s6539_s3 + $0x38] sm:$0xff] (!%p4245_p9)  }
0x3ec9   :  { %v2958_v20 = vsel %vm96_vm2, %v2957_v30, %v2955_v9 }
0x3eca   :  { %v2959_v38 = vpack.c.bf16 %v2958_v20, %v2958_v20 }
0x3ecc   :  { %4888 = vmatmul.mubr.msk.bf16.vlgmr.msra.gmra.mrb[4].mxu0 %vm945_vm7, %v2959_v38 }
0x3ecd   :  { %4892 = vmatpush3.bf16.msra.mxu0 (!%p4245_p9), %v5269_v27  ;;  %4907 = vmatprep.mubr.msk.bf16.mxu0 (!%p4245_p9), %vm5390_vm8, %v5389_v54 }
0x3ece   :  { %4893 = vmatprep.subr.bf16.mxu0 (!%p4245_p9), %v5389_v54 }
0x3ed1   :  { %4894 = vmatpush3.bf16.msra.mxu0 (!%p4245_p9), %v5270_v55 }
0x3ed2   :  { %4895 = vmatprep.subr.bf16.mxu0 (!%p4245_p9), %v5389_v54 }
0x3ed5   :  { %4896 = vmatpush3.bf16.msra.mxu0 (!%p4245_p9), %v5271_v57 }
0x3ed6   :  { %4897 = vmatprep.subr.bf16.mxu0 (!%p4245_p9), %v5389_v54 }
0x3ed9   :  { %4898 = vmatpush3.bf16.msra.mxu0 (!%p4245_p9), %v5272_v58 }
0x3eda   :  { %4899 = vmatprep.subr.bf16.mxu0 (!%p4245_p9), %v5389_v54 }
0x3edd   :  { %4900 = vmatpush3.bf16.msra.mxu0 (!%p4245_p9), %v5273_v59 }
0x3ede   :  { %4901 = vmatprep.subr.bf16.mxu0 (!%p4245_p9), %v5389_v54 }
0x3ee1   :  { %4902 = vmatpush3.bf16.msra.mxu0 (!%p4245_p9), %v5274_v60 }
0x3ee2   :  { %4903 = vmatprep.subr.bf16.mxu0 (!%p4245_p9), %v5389_v54 }
0x3ee5   :  { %4904 = vmatpush3.bf16.msra.mxu0 (!%p4245_p9), %v5275_v61 }
0x3ee6   :  { %4905 = vmatprep.subr.bf16.mxu0 (!%p4245_p9), %v5389_v54 }
0x3ee9   :  { %4906 = vmatpush3.bf16.msra.mxu0 (!%p4245_p9), %v5276_v3 }
0x3f9c   :  { %3067 = sbr.rel (%p4245_p9) target bundleno = 16947 (0x4233), region = 69 }
0x3f9f   :  { %v3052_v32 = vpop.f32.mrb[4].mxu0 }
0x3fa0   :  { %v3053_v40 = vadd.f32 %v4235_v39, %v3052_v32  ;;  %v4889_v41 = vpop.f32.mrb[5].mxu0 }
0x3fa1   :  { %v3055_v42 = vpop.f32.mrb[6].mxu0 }
0x3fa2   :  { %3059 = vst [vmem:[#allocation7 + $0xa] sm:$0x3] %v3053_v40  ;;  %v4890_v43 = vpop.f32.mrb[7].mxu0  ;;  %v3069_v63 = vsel (!%p4245_p9), %vm3068_vm14, %v3053_v40, -inf }
0x3fa3   :  { %3070 = vmax.xlane.f32.xlu0 %v3069_v63 }
0x4030   :  { %v3071_v47 = vpop.xlane.xlu0 %3070 }
0x4031   :  { %vm3072_vm15 = vcmp.eq.f32.partialorder %v3053_v40, %v3071_v47 }
0x4032   :  { %v3073_v49 = vsel %vm3072_vm15, %v5666_v36, 128 }
0x4033   :  { %v3074_v50 = vsel %vm3068_vm14, %v3073_v49, 2147483647 }
0x4034   :  { %v3076_v51 = vshra.s32 %v3074_v50, 16  ;;  %v3075_v62 = vand.u32 65535, %v3074_v50 }
0x4036   :  { %v3078_v52 = vcvt.s32.f32 %v3076_v51  ;;  %v3077_v2 = vcvt.s32.f32 %v3075_v62 }
0x4038   :  { %3079 = vmin.xlane.f32.xlu0 %v3078_v52 }
0x40c5   :  { %v3080_v0 = vpop.xlane.xlu0 %3079 }
0x40c6   :  { %vm3081_vm4 = vcmp.eq.f32.partialorder %v3078_v52, %v3080_v0  ;;  %v3086_v4 = vcvt.f32.s32 %v3080_v0 }
0x40c7   :  { %v3082_v18 = vsel %vm3081_vm4, %v3077_v2, inf }
0x40c8   :  { %3083 = vmin.xlane.f32.xlu1 %v3082_v18  ;;  %v3087_v6 = vshll.u32 %v3086_v4, 16 }
0x4155   :  { %v3084_v5 = vpop.xlane.xlu1 %3083 }
0x4156   :  { %v3085_v7 = vcvt.f32.s32 %v3084_v5 }
0x4158   :  { %v3088_v44 = vadd.s32 %v3087_v6, %v3085_v7 }
0x415a   :  { %vm3089_vm9 = vcmp.eq.s32.totalorder %v5666_v36, %v3088_v44 }
0x415b   :  { %vm4255_vm10 = vmpackc.low %vm3089_vm9, %vm3089_vm9 }
0x415c   :  { %4908 = vmatmul.mubr.msk.bf16.vlgmr.msra.gmra.mrb[0].mxu0 %vm4255_vm10, %v5391_v10 }
0x422f   :  { %v3191_v11 = vpop.f32.mrb[0].mxu0 }
0x4230   :  { %3197 = vst.msk [vmem:[#allocation3] sm:$0x3] %vm168_vm3, %v3191_v11  ;;  %v4909_v12 = vpop.f32.mrb[1].mxu0 }
0x4231   :  { %v3194_v13 = vpop.f32.mrb[2].mxu0 }
0x4232   :  { %v4910_v14 = vpop.f32.mrb[3].mxu0 }
0x4233 PF:  { %v3199_v53 = vpack.c.bf16 %v6270_v34, %v6270_v34  ;;  %4911 = vmatprep.subr.bf16.mxu0 %v5372_v1  ;;  %4913 = vmatprep.mubr.msk.bf16.mxu0 %vm5373_vm0, %v5372_v1  ;;  %v5277_v9 = vld [vmem:[%s6542_s6] sm:$0xff]   ;;  %v5278_v35 = vld [vmem:[%s6542_s6 + $0x8] sm:$0xff]   ;;  %v5279_v30 = vld [vmem:[%s6542_s6 + $0x10] sm:$0xff]   ;;  %s4277_s20 = sld [smem:[#allocation4 + $0x6]] }
0x4234   :  { %4912 = vmatpush3.bf16.xpose.msra.mxu0 %v5674_v45  ;;  %4917 = vmatprep.subr.bf16.mxu1 %v5372_v1  ;;  %v5280_v20 = vld [vmem:[%s6542_s6 + $0x18] sm:$0xff]   ;;  %v5281_v38 = vld [vmem:[%s6542_s6 + $0x20] sm:$0xff]   ;;  %v4276_v39 = vld [vmem:[%s6538_s2 + $0xc] sm:$0x3] }
0x4235   :  { %3201 = vrot.lane.b32.xlu0 %v3199_v53, %s5375_s5  ;;  %4918 = vmatpush3.bf16.msra.mxu1 %v5676_v46  ;;  %v5282_v40 = vld [vmem:[%s6542_s6 + $0x28] sm:$0xff]   ;;  %v4259_v27 = vld [vmem:[%s6543_s7] ss:$0 sm:$0xff]  ;;  %v5286_v10 = vld [vmem:[%s6544_s8 + $0x18] sm:$0xff]  }
0x4236   :  { %4919 = vmatprep.mubr.msk.bf16.mxu1 %vm5373_vm0, %v5372_v1  ;;  %4923 = vmatprep.subr.bf16.mxu1 %v5372_v1  ;;  %v5283_v6 = vld [vmem:[%s6544_s8] sm:$0xff]   ;;  %v5284_v7 = vld [vmem:[%s6544_s8 + $0x8] sm:$0xff]  }
0x4237   :  { %4939 = vmatprep.subr.bf16.mxu0 %v5372_v1  ;;  %v3198_v32 = vld [vmem:[#allocation3] sm:$0x3]  ;;  %v5287_v11 = vld [vmem:[%s6544_s8 + $0x20] sm:$0xff]   ;;  %v5288_v12 = vld [vmem:[%s6544_s8 + $0x28] sm:$0xff]  }
0x4238   :  { %3546 = vst.msk [vmem:[#allocation3] sm:$0x3] %vm168_vm3, %v4276_v39 }
0x4239   :  { %p4278_p10 = scmp.ne.s32.totalorder %s4277_s20, 0 }
0x423a   :  { %vm3552_vm11 = vcmask (!%p4278_p10), 1041408   ;;  %v5305_v39 = vld [vmem:[%s6539_s3 + $0x20] sm:$0xff] (!%p4278_p10)   ;;  %vm5393_vm14 = vmmov (!%p4278_p10), 0  }
0x42a7   :  { %v3202_v15 = vpop.permute.xlu0 %3201 }
0x42a8   :  { %4914 = vmatmul.mubr.msk.bf16.vlgmr.msra.gmra.mrb[0].mxu0 %vm54_vm1, %v3202_v15 }
0x42a9   :  { %4951 = vmatprep.mubr.msk.bf16.mxu0 %vm5373_vm0, %v5372_v1  ;;  %4940 = vmatpush3.bf16.msra.mxu0 %v5283_v6 }
0x42aa   :  { %4941 = vmatprep.subr.bf16.mxu0 %v5372_v1 }
0x42ad   :  { %4942 = vmatpush3.bf16.msra.mxu0 %v5284_v7 }
0x42ae   :  { %4943 = vmatprep.subr.bf16.mxu0 %v5372_v1 }
0x437b   :  { %v3240_v16 = vpop.f32.mrb[0].mxu0 }
0x437c   :  { %v3241_v17 = vadd.f32 %v3240_v16, %v5688_v48  ;;  %v4915_v19 = vpop.f32.mrb[1].mxu0 }
0x437d   :  { %v3243_v21 = vpop.f32.mrb[2].mxu0 }
0x437e   :  { %v4916_v37 = vpop.f32.mrb[3].mxu0  ;;  %v3246_v22 = vsel %vm820_vm5, %v3241_v17, -inf  ;;  %v4268_v21 = vld [vmem:[%s6545_s9] ss:$0 sm:$0xff] }
0x437f   :  { %3247 = vmax.xlane.f32.xlu0 %v3246_v22 }
0x440c   :  { %v3248_v23 = vpop.xlane.xlu0 %3247 }
0x440d   :  { %v3249_v25 = vsub.f32 %v3241_v17, %v3248_v23 }
0x440f   :  { %v3250_v26 = vmul.f32 1.442695, %v3249_v25 }
0x4411   :  { %5289 = vpow2.f32 %v3250_v26 }
0x441b   :  { %v5290_v56 = vpop.eup %5289 }
0x441c   :  { %v3252_v28 = vsel %vm820_vm5, %v5290_v56, 0.0 }
0x441d   :  { %3253 = vadd.xlane.f32.xlu1 %v3252_v28 }
0x44aa   :  { %v3254_v29 = vpop.xlane.xlu1 %3253 }
0x44ab   :  { %5291 = vrcp.f32 %v3254_v29 }
0x44b5   :  { %v5292_v8 = vpop.eup %5291 }
0x44b6   :  { %v3256_v31 = vmul.f32 %v5292_v8, %v5290_v56 }
0x44b8   :  { %v3257_v33 = vpack.c.bf16 %v3256_v31, %v3256_v31 }
0x44ba   :  { %4920 = vmatmul.mubr.msk.bf16.vlgmr.msra.gmra.mrb[0].mxu1 %vm833_vm6, %v3257_v33 }
0x44bb   :  { %4935 = vmatprep.mubr.msk.bf16.mxu1 %vm5373_vm0, %v5372_v1  ;;  %4924 = vmatpush3.bf16.msra.mxu1 %v5277_v9  ;;  %v5301_v9 = vld [vmem:[%s6539_s3] sm:$0xff] (!%p4278_p10)  }
0x44bc   :  { %4925 = vmatprep.subr.bf16.mxu1 %v5372_v1 }
0x44bf   :  { %4926 = vmatpush3.bf16.msra.mxu1 %v5278_v35  ;;  %v5392_v35 = vmov (!%p4278_p10), 0.0  }
0x44c0   :  { %4927 = vmatprep.subr.bf16.mxu1 %v5372_v1 }
0x44c3   :  { %4928 = vmatpush3.bf16.msra.mxu1 %v5279_v30  ;;  %v5302_v30 = vld [vmem:[%s6539_s3 + $0x8] sm:$0xff] (!%p4278_p10)  }
0x44c4   :  { %4929 = vmatprep.subr.bf16.mxu1 %v5372_v1 }
0x44c7   :  { %4930 = vmatpush3.bf16.msra.mxu1 %v5280_v20  ;;  %v5303_v20 = vld [vmem:[%s6539_s3 + $0x10] sm:$0xff] (!%p4278_p10)  }
0x44c8   :  { %4931 = vmatprep.subr.bf16.mxu1 %v5372_v1 }
0x44cb   :  { %4932 = vmatpush3.bf16.msra.mxu1 %v5281_v38  ;;  %v5304_v38 = vld [vmem:[%s6539_s3 + $0x18] sm:$0xff] (!%p4278_p10)  }
0x44cc   :  { %4933 = vmatprep.subr.bf16.mxu1 %v5372_v1 }
0x44cf   :  { %4934 = vmatpush3.bf16.msra.mxu1 %v5282_v40  ;;  %v5307_v40 = vld [vmem:[%s6539_s3 + $0x30] sm:$0xff] (!%p4278_p10)  }
0x458d   :  { %v3295_v41 = vpop.f32.mrb[0].mxu1 }
0x458e   :  { %3302 = vrot.lane.b32.xlu1 %v3295_v41, %s5375_s5  ;;  %v4921_v42 = vpop.f32.mrb[1].mxu1 }
0x458f   :  { %v3298_v43 = vpop.f32.mrb[2].mxu1 }
0x4590   :  { %v4922_v63 = vpop.f32.mrb[3].mxu1 }
0x4592   :  { %3305 = vrot.lane.b32.xlu1 %v6270_v34, %s5376_s10 }
0x4600   :  { %v3303_v47 = vpop.permute.xlu1 %3302 }
0x4601   :  { %v3308_v50 = vsel %vm54_vm1, %v3198_v32, %v3303_v47 }
0x4604   :  { %v3306_v49 = vpop.permute.xlu1 %3305 }
0x4605   :  { %v3309_v51 = vsel %vm96_vm2, %v3308_v50, %v3306_v49 }
0x4606   :  { %v3310_v52 = vpack.c.bf16 %v3309_v51, %v3309_v51 }
0x4608   :  { %4936 = vmatmul.mubr.msk.bf16.vlgmr.msra.gmra.mrb[4].mxu1 %vm945_vm7, %v3310_v52 }
0x46db   :  { %v3403_v54 = vpop.f32.mrb[4].mxu1 }
0x46dc   :  { %v3404_v55 = vadd.f32 %v4259_v27, %v3403_v54  ;;  %v4937_v57 = vpop.f32.mrb[5].mxu1  ;;  %v5394_v54 = vmov (!%p4278_p10), 1.0|1.0  }
0x46dd   :  { %v3406_v58 = vpop.f32.mrb[6].mxu1 }
0x46de   :  { %5293 = vtanh.f32 %v3404_v55  ;;  %v4938_v59 = vpop.f32.mrb[7].mxu1  ;;  %v4267_v60 = vmul.f32 -1.442695, %v3404_v55 }
0x46e0   :  { %5295 = vpow2.f32 %v4267_v60 }
0x46e8   :  { %v5294_v34 = vpop.eup %5293 }
0x46e9   :  { %3418 = vrot.lane.b32.xlu1 %v5294_v34, %s5374_s14 }
0x46ea   :  { %v5296_v61 = vpop.eup %5295 }
0x46eb   :  { %v3412_v62 = vadd.f32 1.0, %v5296_v61 }
0x46ed   :  { %5297 = vrcp.f32 %v3412_v62 }
0x46f7   :  { %v5298_v0 = vpop.eup %5297 }
0x46f8   :  { %v3416_v3 = vmul.f32 %v5298_v0, %v6242_v24  ;;  %v5285_v24 = vld [vmem:[%s6544_s8 + $0x10] sm:$0xff]  }
0x46f9   :  { %4944 = vmatpush3.bf16.msra.mxu0 %v5285_v24 }
0x46fa   :  { %4945 = vmatprep.subr.bf16.mxu0 %v5372_v1 }
0x46fd   :  { %4946 = vmatpush3.bf16.msra.mxu0 %v5286_v10 }
0x46fe   :  { %4947 = vmatprep.subr.bf16.mxu0 %v5372_v1 }
0x4701   :  { %4948 = vmatpush3.bf16.msra.mxu0 %v5287_v11 }
0x4702   :  { %4949 = vmatprep.subr.bf16.mxu0 %v5372_v1 }
0x4705   :  { %4950 = vmatpush3.bf16.msra.mxu0 %v5288_v12 }
0x4706   :  { %4955 = vmatprep.subr.bf16.mxu0 (!%p4278_p10), %v5392_v35 }
0x475b   :  { %v3419_v2 = vpop.permute.xlu1 %3418 }
0x475c   :  { %v3421_v18 = vmul.f32 %v5298_v0, %v3419_v2 }
0x475e   :  { %3423 = vrot.lane.b32.xlu1 %v3421_v18, %s5375_s5 }
0x47d0   :  { %v3424_v4 = vpop.permute.xlu1 %3423 }
0x47d1   :  { %v6368_v5 = vadd.f32 %v3424_v4, %v3416_v3 }
0x47d3   :  { %5299 = vtanh.f32 %v6368_v5 }
0x47dd   :  { %v5300_v44 = vpop.eup %5299 }
0x47de   :  { %3429 = vrot.lane.b32.xlu1 %v5300_v44, %s5374_s14 }
0x47e2   :  { %3438 = vrot.lane.b32.xlu1 %v3198_v32, %s5374_s14  ;;  %v5306_v32 = vld [vmem:[%s6539_s3 + $0x28] sm:$0xff] (!%p4278_p10)  }
0x4850   :  { %v3430_v13 = vpop.permute.xlu1 %3429 }
0x4851   :  { %v6396_v14 = vmul.f32 %v5298_v0, %v3430_v13 }
0x4853   :  { %3434 = vrot.lane.b32.xlu0 %v6396_v14, %s5375_s5 }
0x4854   :  { %v3439_v53 = vpop.permute.xlu1 %3438 }
0x48c5   :  { %v3435_v15 = vpop.permute.xlu0 %3434 }
0x48c6   :  { %v3441_v16 = vsel %vm54_vm1, %v3435_v15, %v3303_v47  ;;  %v5308_v47 = vld [vmem:[%s6539_s3 + $0x38] sm:$0xff] (!%p4278_p10)  }
0x48c7   :  { %v3442_v17 = vsel %vm96_vm2, %v3441_v16, %v3439_v53 }
0x48c8   :  { %v3443_v19 = vpack.c.bf16 %v3442_v17, %v3442_v17 }
0x48ca   :  { %4952 = vmatmul.mubr.msk.bf16.vlgmr.msra.gmra.mrb[4].mxu0 %vm945_vm7, %v3443_v19 }
0x48cb   :  { %4956 = vmatpush3.bf16.msra.mxu0 (!%p4278_p10), %v5301_v9  ;;  %4971 = vmatprep.mubr.msk.bf16.mxu0 (!%p4278_p10), %vm5393_vm14, %v5392_v35 }
0x48cc   :  { %4957 = vmatprep.subr.bf16.mxu0 (!%p4278_p10), %v5392_v35 }
0x48cf   :  { %4958 = vmatpush3.bf16.msra.mxu0 (!%p4278_p10), %v5302_v30 }
0x48d0   :  { %4959 = vmatprep.subr.bf16.mxu0 (!%p4278_p10), %v5392_v35 }
0x48d3   :  { %4960 = vmatpush3.bf16.msra.mxu0 (!%p4278_p10), %v5303_v20 }
0x48d4   :  { %4961 = vmatprep.subr.bf16.mxu0 (!%p4278_p10), %v5392_v35 }
0x48d7   :  { %4962 = vmatpush3.bf16.msra.mxu0 (!%p4278_p10), %v5304_v38 }
0x48d8   :  { %4963 = vmatprep.subr.bf16.mxu0 (!%p4278_p10), %v5392_v35 }
0x48db   :  { %4964 = vmatpush3.bf16.msra.mxu0 (!%p4278_p10), %v5305_v39 }
0x48dc   :  { %4965 = vmatprep.subr.bf16.mxu0 (!%p4278_p10), %v5392_v35 }
0x48df   :  { %4966 = vmatpush3.bf16.msra.mxu0 (!%p4278_p10), %v5306_v32 }
0x48e0   :  { %4967 = vmatprep.subr.bf16.mxu0 (!%p4278_p10), %v5392_v35 }
0x48e3   :  { %4968 = vmatpush3.bf16.msra.mxu0 (!%p4278_p10), %v5307_v40 }
0x48e4   :  { %4969 = vmatprep.subr.bf16.mxu0 (!%p4278_p10), %v5392_v35 }
0x48e7   :  { %4970 = vmatpush3.bf16.msra.mxu0 (!%p4278_p10), %v5308_v47 }
0x499a   :  { %3551 = sbr.rel (%p4278_p10) target bundleno = 19505 (0x4c31), region = 73 }
0x499d   :  { %v3536_v37 = vpop.f32.mrb[4].mxu0 }
0x499e   :  { %v3537_v22 = vadd.f32 %v4268_v21, %v3536_v37  ;;  %v4953_v23 = vpop.f32.mrb[5].mxu0 }
0x499f   :  { %v3539_v25 = vpop.f32.mrb[6].mxu0 }
0x49a0   :  { %3543 = vst [vmem:[#allocation7 + $0xc] sm:$0x3] %v3537_v22  ;;  %v4954_v26 = vpop.f32.mrb[7].mxu0  ;;  %v3553_v56 = vsel (!%p4278_p10), %vm3552_vm11, %v3537_v22, -inf }
0x49a1   :  { %3554 = vmax.xlane.f32.xlu0 %v3553_v56 }
0x4a2e   :  { %v3555_v28 = vpop.xlane.xlu0 %3554 }
0x4a2f   :  { %vm3556_vm12 = vcmp.eq.f32.partialorder %v3537_v22, %v3555_v28 }
0x4a30   :  { %v3557_v29 = vsel %vm3556_vm12, %v5666_v36, 128 }
0x4a31   :  { %v3558_v8 = vsel %vm3552_vm11, %v3557_v29, 2147483647 }
0x4a32   :  { %v3560_v31 = vshra.s32 %v3558_v8, 16  ;;  %v3559_v41 = vand.u32 65535, %v3558_v8 }
0x4a34   :  { %v3562_v33 = vcvt.s32.f32 %v3560_v31  ;;  %v3561_v43 = vcvt.s32.f32 %v3559_v41 }
0x4a36   :  { %3563 = vmin.xlane.f32.xlu0 %v3562_v33 }
0x4ac3   :  { %v3564_v42 = vpop.xlane.xlu0 %3563 }
0x4ac4   :  { %vm3565_vm13 = vcmp.eq.f32.partialorder %v3562_v33, %v3564_v42  ;;  %v3570_v49 = vcvt.f32.s32 %v3564_v42 }
0x4ac5   :  { %v3566_v63 = vsel %vm3565_vm13, %v3561_v43, inf }
0x4ac6   :  { %3567 = vmin.xlane.f32.xlu1 %v3566_v63  ;;  %v3571_v51 = vshll.u32 %v3570_v49, 16 }
0x4b53   :  { %v3568_v50 = vpop.xlane.xlu1 %3567 }
0x4b54   :  { %v3569_v52 = vcvt.f32.s32 %v3568_v50 }
0x4b56   :  { %v3572_v27 = vadd.s32 %v3571_v51, %v3569_v52 }
0x4b58   :  { %vm3573_vm15 = vcmp.eq.s32.totalorder %v5666_v36, %v3572_v27 }
0x4b59   :  { %vm4288_vm4 = vmpackc.low %vm3573_vm15, %vm3573_vm15 }
0x4b5a   :  { %4972 = vmatmul.mubr.msk.bf16.vlgmr.msra.gmra.mrb[0].mxu0 %vm4288_vm4, %v5394_v54 }
0x4c2d   :  { %v3675_v55 = vpop.f32.mrb[0].mxu0 }
0x4c2e   :  { %3681 = vst.msk [vmem:[#allocation3] sm:$0x3] %vm168_vm3, %v3675_v55  ;;  %v4973_v57 = vpop.f32.mrb[1].mxu0 }
0x4c2f   :  { %v3678_v58 = vpop.f32.mrb[2].mxu0 }
0x4c30   :  { %v4974_v59 = vpop.f32.mrb[3].mxu0 }
0x4c31 PF:  { %v3683_v34 = vpack.c.bf16 %v6396_v14, %v6396_v14  ;;  %4975 = vmatprep.subr.bf16.mxu0 %v5372_v1  ;;  %4977 = vmatprep.mubr.msk.bf16.mxu0 %vm5373_vm0, %v5372_v1  ;;  %v5310_v11 = vld [vmem:[%s6542_s6 + $0x8] sm:$0xff]   ;;  %v5311_v12 = vld [vmem:[%s6542_s6 + $0x10] sm:$0xff]   ;;  %v5312_v13 = vld [vmem:[%s6542_s6 + $0x18] sm:$0xff]   ;;  %s5395_s17 = smov [#allocation7]  }
0x4c32   :  { %4976 = vmatpush3.bf16.xpose.msra.mxu0 %v5674_v45  ;;  %4981 = vmatprep.subr.bf16.mxu1 %v5372_v1  ;;  %v5313_v53 = vld [vmem:[%s6542_s6 + $0x20] sm:$0xff]   ;;  %v5314_v15 = vld [vmem:[%s6542_s6 + $0x28] sm:$0xff]   ;;  %v5317_v47 = vld [vmem:[%s6544_s8 + $0x10] sm:$0xff]  }
0x4c33   :  { %3685 = vrot.lane.b32.xlu0 %v3683_v34, %s5375_s5  ;;  %4982 = vmatpush3.bf16.msra.mxu1 %v5676_v46  ;;  %v4292_v28 = vld [vmem:[%s6543_s7] ss:$0 sm:$0xff]  ;;  %v5316_v63 = vld [vmem:[%s6544_s8 + $0x8] sm:$0xff]   ;;  %v5318_v49 = vld [vmem:[%s6544_s8 + $0x18] sm:$0xff]  }
0x4c34   :  { %4983 = vmatprep.mubr.msk.bf16.mxu1 %vm5373_vm0, %v5372_v1  ;;  %4987 = vmatprep.subr.bf16.mxu1 %v5372_v1  ;;  %v5315_v43 = vld [vmem:[%s6544_s8] sm:$0xff]   ;;  %v5320_v51 = vld [vmem:[%s6544_s8 + $0x28] sm:$0xff]  }
0x4c35   :  { %5003 = vmatprep.subr.bf16.mxu0 %v5372_v1  ;;  %v3682_v22 = vld [vmem:[#allocation3] sm:$0x3]  ;;  %v5319_v50 = vld [vmem:[%s6544_s8 + $0x20] sm:$0xff]   ;;  %s4033_s8 = sshll.u32 %s5395_s17, 4  ;;  %s4034_s8 = int_to_ptr.vmem [resolvable:$true] %s4033_s8 }
0x4c36   :  { %s5345_s18 = scalar_lea.vmem %s4034_s8, 256  ;;  %p5350_p12 = scmp.lt.s32.totalorder %s4034_s8, %s4034_s8 }
0x4c37   :  { %p5346_p11 = scmp.ne.s32.totalorder %s4034_s8, %s5345_s18  ;;  %p5351_p13 = scmp.lt.s32.totalorder %s5345_s18, %s5345_s18 }
0x4c39   :  { %p5352_p0 = por %p5351_p13, %p5350_p12 }
0x4c3b   :  { %p5353_p1 = pnand %p5352_p0, %p5346_p11 }
0x4ca5   :  { %v3686_v36 = vpop.permute.xlu0 %3685 }
0x4ca6   :  { %4978 = vmatmul.mubr.msk.bf16.vlgmr.msra.gmra.mrb[0].mxu0 %vm54_vm1, %v3686_v36 }
0x4ca7   :  { %5015 = vmatprep.mubr.msk.bf16.mxu0 %vm5373_vm0, %v5372_v1  ;;  %5004 = vmatpush3.bf16.msra.mxu0 %v5315_v43 }
0x4ca8   :  { %5005 = vmatprep.subr.bf16.mxu0 %v5372_v1 }
0x4cab   :  { %5006 = vmatpush3.bf16.msra.mxu0 %v5316_v63 }
0x4cac   :  { %5007 = vmatprep.subr.bf16.mxu0 %v5372_v1 }
0x4caf   :  { %5008 = vmatpush3.bf16.msra.mxu0 %v5317_v47 }
0x4cb0   :  { %5009 = vmatprep.subr.bf16.mxu0 %v5372_v1 }
0x4cb3   :  { %5010 = vmatpush3.bf16.msra.mxu0 %v5318_v49 }
0x4cb4   :  { %5011 = vmatprep.subr.bf16.mxu0 %v5372_v1 }
0x4cb7   :  { %5012 = vmatpush3.bf16.msra.mxu0 %v5319_v50 }
0x4cb8   :  { %5013 = vmatprep.subr.bf16.mxu0 %v5372_v1 }
0x4cbb   :  { %5014 = vmatpush3.bf16.msra.mxu0 %v5320_v51 }
0x4d79   :  { %v3724_v45 = vpop.f32.mrb[0].mxu0 }
0x4d7a   :  { %v3725_v60 = vadd.f32 %v3724_v45, %v5688_v48  ;;  %v4979_v61 = vpop.f32.mrb[1].mxu0  ;;  %v5309_v48 = vld [vmem:[%s6542_s6] sm:$0xff]  }
0x4d7b   :  { %v3727_v62 = vpop.f32.mrb[2].mxu0 }
0x4d7c   :  { %v4980_v0 = vpop.f32.mrb[3].mxu0  ;;  %v3730_v46 = vsel %vm820_vm5, %v3725_v60, -inf }
0x4d7d   :  { %3731 = vmax.xlane.f32.xlu0 %v3730_v46 }
0x4e0a   :  { %v3732_v2 = vpop.xlane.xlu0 %3731 }
0x4e0b   :  { %v3733_v18 = vsub.f32 %v3725_v60, %v3732_v2 }
0x4e0d   :  { %v3734_v3 = vmul.f32 1.442695, %v3733_v18 }
0x4e0f   :  { %5321 = vpow2.f32 %v3734_v3 }
0x4e19   :  { %v5322_v4 = vpop.eup %5321 }
0x4e1a   :  { %v3736_v6 = vsel %vm820_vm5, %v5322_v4, 0.0 }
0x4e1b   :  { %3737 = vadd.xlane.f32.xlu1 %v3736_v6 }
0x4ea8   :  { %v3738_v7 = vpop.xlane.xlu1 %3737 }
0x4ea9   :  { %5323 = vrcp.f32 %v3738_v7 }
0x4eb3   :  { %v5324_v24 = vpop.eup %5323 }
0x4eb4   :  { %v3740_v44 = vmul.f32 %v5324_v24, %v5322_v4 }
0x4eb6   :  { %v3741_v10 = vpack.c.bf16 %v3740_v44, %v3740_v44 }
0x4eb8   :  { %4984 = vmatmul.mubr.msk.bf16.vlgmr.msra.gmra.mrb[0].mxu1 %vm833_vm6, %v3741_v10 }
0x4eb9   :  { %4999 = vmatprep.mubr.msk.bf16.mxu1 %vm5373_vm0, %v5372_v1  ;;  %4988 = vmatpush3.bf16.msra.mxu1 %v5309_v48 }
0x4eba   :  { %4989 = vmatprep.subr.bf16.mxu1 %v5372_v1 }
0x4ebd   :  { %4990 = vmatpush3.bf16.msra.mxu1 %v5310_v11 }
0x4ebe   :  { %4991 = vmatprep.subr.bf16.mxu1 %v5372_v1 }
0x4ec1   :  { %4992 = vmatpush3.bf16.msra.mxu1 %v5311_v12 }
0x4ec2   :  { %4993 = vmatprep.subr.bf16.mxu1 %v5372_v1 }
0x4ec5   :  { %4994 = vmatpush3.bf16.msra.mxu1 %v5312_v13 }
0x4ec6   :  { %4995 = vmatprep.subr.bf16.mxu1 %v5372_v1 }
0x4ec9   :  { %4996 = vmatpush3.bf16.msra.mxu1 %v5313_v53 }
0x4eca   :  { %4997 = vmatprep.subr.bf16.mxu1 %v5372_v1  ;;  %v4301_v1 = vld [vmem:[%s6545_s9] ss:$0 sm:$0xff] }
0x4ecd   :  { %4998 = vmatpush3.bf16.msra.mxu1 %v5314_v15 }
0x4f8b   :  { %v3779_v16 = vpop.f32.mrb[0].mxu1 }
0x4f8c   :  { %3786 = vrot.lane.b32.xlu1 %v3779_v16, %s5375_s5  ;;  %v4985_v17 = vpop.f32.mrb[1].mxu1 }
0x4f8d   :  { %v3782_v19 = vpop.f32.mrb[2].mxu1 }
0x4f8e   :  { %v4986_v21 = vpop.f32.mrb[3].mxu1 }
0x4f90   :  { %3789 = vrot.lane.b32.xlu1 %v6396_v14, %s5376_s10 }
0x4ffe   :  { %v3787_v37 = vpop.permute.xlu1 %3786 }
0x4fff   :  { %v3792_v25 = vsel %vm54_vm1, %v3682_v22, %v3787_v37 }
0x5002   :  { %v3790_v23 = vpop.permute.xlu1 %3789 }
0x5003   :  { %v3793_v26 = vsel %vm96_vm2, %v3792_v25, %v3790_v23 }
0x5004   :  { %v3794_v56 = vpack.c.bf16 %v3793_v26, %v3793_v26 }
0x5006   :  { %5000 = vmatmul.mubr.msk.bf16.vlgmr.msra.gmra.mrb[4].mxu1 %vm945_vm7, %v3794_v56 }
0x50d9   :  { %v3887_v29 = vpop.f32.mrb[4].mxu1 }
0x50da   :  { %v3888_v8 = vadd.f32 %v4292_v28, %v3887_v29  ;;  %v5001_v31 = vpop.f32.mrb[5].mxu1 }
0x50db   :  { %v3890_v33 = vpop.f32.mrb[6].mxu1 }
0x50dc   :  { %5325 = vtanh.f32 %v3888_v8  ;;  %v5002_v14 = vpop.f32.mrb[7].mxu1  ;;  %v4300_v35 = vmul.f32 -1.442695, %v3888_v8 }
0x50de   :  { %5327 = vpow2.f32 %v4300_v35 }
0x50e6   :  { %v5326_v9 = vpop.eup %5325 }
0x50e7   :  { %3902 = vrot.lane.b32.xlu1 %v5326_v9, %s5374_s14 }
0x50e8   :  { %v5328_v30 = vpop.eup %5327 }
0x50e9   :  { %v3896_v20 = vadd.f32 1.0, %v5328_v30 }
0x50eb   :  { %5329 = vrcp.f32 %v3896_v20 }
0x50f5   :  { %v5330_v38 = vpop.eup %5329 }
0x50f6   :  { %v3900_v40 = vmul.f32 %v5330_v38, %v6368_v5 }
0x5159   :  { %v3903_v39 = vpop.permute.xlu1 %3902 }
0x515a   :  { %v3905_v32 = vmul.f32 %v5330_v38, %v3903_v39 }
0x515c   :  { %3907 = vrot.lane.b32.xlu1 %v3905_v32, %s5375_s5 }
0x51ce   :  { %v3908_v41 = vpop.permute.xlu1 %3907 }
0x51cf   :  { %v3910_v42 = vadd.f32 %v3908_v41, %v3900_v40 }
0x51d1   :  { %5331 = vtanh.f32 %v3910_v42 }
0x51db   :  { %v5332_v5 = vpop.eup %5331 }
0x51dc   :  { %3913 = vrot.lane.b32.xlu1 %v5332_v5, %s5374_s14 }
0x51e0   :  { %3922 = vrot.lane.b32.xlu1 %v3682_v22, %s5374_s14 }
0x524e   :  { %v3914_v52 = vpop.permute.xlu1 %3913 }
0x524f   :  { %v3916_v27 = vmul.f32 %v5330_v38, %v3914_v52 }
0x5251   :  { %3918 = vrot.lane.b32.xlu0 %v3916_v27, %s5375_s5 }
0x5252   :  { %v3923_v54 = vpop.permute.xlu1 %3922 }
0x52c3   :  { %v3919_v55 = vpop.permute.xlu0 %3918 }
0x52c4   :  { %v3925_v57 = vsel %vm54_vm1, %v3919_v55, %v3787_v37 }
0x52c5   :  { %v3926_v58 = vsel %vm96_vm2, %v3925_v57, %v3923_v54 }
0x52c6   :  { %v3927_v59 = vpack.c.bf16 %v3926_v58, %v3926_v58 }
0x52c8   :  { %5016 = vmatmul.mubr.msk.bf16.vlgmr.msra.gmra.mrb[4].mxu0 %vm945_vm7, %v3927_v59 }
0x539b   :  { %v4020_v34 = vpop.f32.mrb[4].mxu0 }
0x539c   :  { %v4021_v36 = vadd.f32 %v4301_v1, %v4020_v34  ;;  %v5017_v45 = vpop.f32.mrb[5].mxu0 }
0x539d   :  { %v4023_v60 = vpop.f32.mrb[6].mxu0 }
0x539e   :  { %4027 = vst [vmem:[#allocation7 + $0xe] sm:$0x3] %v4021_v36  ;;  %v5018_v61 = vpop.f32.mrb[7].mxu0 }
0x539f   :  { %5356 = shalt.err (!%p5353_p1)
}
0x53a0   :  { %s5357_s9 = scalar_lea.hbm %s6547_s11, 256 }
0x53a1   :  { %p5358_p2 = scmp.ne.s32.totalorder %s6547_s11, %s5357_s9  ;;  %p5361_p3 = scmp.lt.u32.totalorder %s5357_s9, %s6547_s11 }
0x53a3   :  { %p5363_p4 = pnand %p5361_p3, %p5358_p2 }
0x53a5   :  { %5366 = shalt.err (!%p5363_p4)
}
0x53a6   :  { %s5396_s24 = smov 2  }
0x53a7   :  { %4039 = dma.vmem_to_hbm [thread:$0]  %s4034_s8, 256, %s6547_s11, [#allocation5], %s5375_s5, %s5375_s5, %s5396_s24  }
0x53a8   :  { %5369 = dma.done.wait [#allocation5], 256  }
0x53a9   :  { %5370 = vsyncadd [#allocation5], 4294967040 }
0x53aa   :  { %4043 = vsyncpa [#allocation5], 1 }
0x53ab   :  { %4044 = vsyncpa [#allocation6], 1 }

</bundles_post_ra>
